<compile_context>
chip_gen: v7x
topology: tpu7x:2x2x1
jax: 0.10.0
libtpu: 0.0.40
codegen_flags: <defaults>
</compile_context>

<pallas_src>
import functools

import jax
import jax.numpy as jnp
from jax.experimental import pallas as pl
from jax.experimental.pallas import tpu as pltpu

_LANE = 128


def _round_up(x, m):
    return (x + m - 1) // m * m


# ----------------------------------------------------------------------------
# Fused bottleneck-block kernel (one batch element per grid step)
# ----------------------------------------------------------------------------
def _bottleneck_kernel(*refs, stride, H, W, has_projection):
    it = iter(refs)
    x_ref = next(it)                                   # (1, Cin, H*W) f32
    xsc_ref = next(it) if (stride > 1 and has_projection) else None
    w1_ref, s1_ref, b1_ref = next(it), next(it), next(it)
    w2_ref, s2_ref, b2_ref = next(it), next(it), next(it)
    w3_ref, s3_ref, b3_ref = next(it), next(it), next(it)
    if has_projection:
        wsc_ref, ssc_ref, bsc_ref = next(it), next(it), next(it)
    o_ref = next(it)                                   # (1, Cexp, Ho*Wo) f32
    xpad_ref = next(it)                                # (H+2, W+2, mid_pad) bf16

    Cin = x_ref.shape[1]
    HW = x_ref.shape[2]
    mid_pad = w1_ref.shape[1]
    Cexp_pad = w3_ref.shape[1]
    Cexp = o_ref.shape[1]
    Ho = (H - 1) // stride + 1
    Wo = (W - 1) // stride + 1

    # ---- NCHW -> (H*W, Cin) relayout ONCE, inside VMEM (no XLA HBM pass).
    x_chw = x_ref[0]                                   # (Cin, H*W) f32, lane-dense
    xt = jnp.transpose(x_chw)                          # (H*W, Cin) f32
    xt_bf = xt.astype(jnp.bfloat16)

    # ---- conv1 (1x1) + BN1 + ReLU : one (HW, Cin) x (Cin, mid_pad) MXU matmul.
    h1 = jnp.dot(xt_bf, w1_ref[...], preferred_element_type=jnp.float32)
    h1 = jnp.maximum(h1 * s1_ref[...] + b1_ref[...], 0.0)   # padded lanes -> 0

    # ---- halo padding: zero ONLY the 1px border (interior fully overwritten).
    zdt = xpad_ref.dtype
    zero_row = jnp.zeros((1, W + 2, mid_pad), zdt)
    xpad_ref[0:1, :, :] = zero_row
    xpad_ref[H + 1:H + 2, :, :] = zero_row
    zero_col = jnp.zeros((H, 1, mid_pad), zdt)
    xpad_ref[1:H + 1, 0:1, :] = zero_col
    xpad_ref[1:H + 1, W + 1:W + 2, :] = zero_col
    xpad_ref[1:H + 1, 1:W + 1, :] = h1.reshape(H, W, mid_pad).astype(zdt)

    # ---- conv2 (3x3, stride) + BN2 + ReLU as ONE im2col matmul, K = 9*mid_pad.
    #      With mid_pad == 128 each tap is a whole lane-tile -> vreg-granular
    #      concat (no cross-lane shuffles).
    taps = []
    for dy in range(3):
        for dx in range(3):
            if stride == 1:
                taps.append(xpad_ref[dy:dy + Ho, dx:dx + Wo, :])
            else:
                taps.append(xpad_ref[pl.ds(dy, Ho, stride),
                                     pl.ds(dx, Wo, stride), :])
    patches = jnp.concatenate(taps, axis=-1).reshape(Ho * Wo, 9 * mid_pad)
    h2 = jnp.dot(patches, w2_ref[...], preferred_element_type=jnp.float32)
    h2 = jnp.maximum(h2 * s2_ref[...] + b2_ref[...], 0.0)

    # ---- conv3 (1x1) + BN3.
    h3 = jnp.dot(h2.astype(jnp.bfloat16), w3_ref[...],
                 preferred_element_type=jnp.float32)
    h3 = h3 * s3_ref[...] + b3_ref[...]                # padded lanes stay 0

    # ---- shortcut (fused in the same kernel).
    if has_projection:
        if stride == 1:
            xs_bf = xt_bf
        else:
            xs_bf = jnp.transpose(xsc_ref[0]).astype(jnp.bfloat16)  # (Ho*Wo, Cin)
        sc = jnp.dot(xs_bf, wsc_ref[...], preferred_element_type=jnp.float32)
        sc = sc * ssc_ref[...] + bsc_ref[...]
    else:
        # identity: stride == 1 and Cin == Cexp (asserted in wrapper); keep f32.
        sc = xt
        if Cexp_pad > Cin:
            sc = jnp.concatenate(
                [sc, jnp.zeros((HW, Cexp_pad - Cin), sc.dtype)], axis=-1)

    out = jnp.maximum(h3 + sc, 0.0)                    # (Ho*Wo, Cexp_pad) f32
    # Channel-major store: lane axis = Ho*Wo (dense vst); result is already NCHW.
    o_ref[0] = jnp.transpose(out)[:Cexp, :]


# ----------------------------------------------------------------------------
# pallas_call wrapper (PyTorch NCHW in / NCHW out; only free reshapes outside)
# ----------------------------------------------------------------------------
def bottleneck_residual_block(x_nchw, kparams, *, cexp, stride=1):
    N, Cin, H, W = x_nchw.shape
    mid_pad = kparams['w1'].shape[1]
    Cexp_pad = kparams['w3'].shape[1]
    has_projection = 'wsc' in kparams
    if not has_projection:
        assert stride == 1 and Cin == cexp, (
            "identity shortcut requires stride == 1 and in_channels == out_channels*4")
    Ho = (H - 1) // stride + 1
    Wo = (W - 1) // stride + 1

    # Free view (NCHW is contiguous); no transpose / dtype blow-up in XLA.
    x2 = x_nchw.reshape(N, Cin, H * W).astype(jnp.float32)

    args = [x2]
    in_specs = [pl.BlockSpec((1, Cin, H * W), lambda n: (n, 0, 0))]
    if stride > 1 and has_projection:
        # TODO(synk): stride>1 shortcut subsample done by XLA (tiny tensor);
        # move in-kernel if this path becomes hot.
        xsc = x_nchw[:, :, ::stride, ::stride].reshape(N, Cin, Ho * Wo)
        args.append(xsc.astype(jnp.float32))
        in_specs.append(pl.BlockSpec((1, Cin, Ho * Wo), lambda n: (n, 0, 0)))

    def full_spec(arr):
        nd = arr.ndim
        return pl.BlockSpec(arr.shape, lambda n, _nd=nd: (0,) * _nd)

    names = ['w1', 's1', 'b1', 'w2', 's2', 'b2', 'w3', 's3', 'b3']
    if has_projection:
        names += ['wsc', 'ssc', 'bsc']
    for name in names:
        args.append(kparams[name])
        in_specs.append(full_spec(kparams[name]))

    kernel = functools.partial(_bottleneck_kernel, stride=stride, H=H, W=W,
                               has_projection=has_projection)

    # VMEM budget from the actual per-step working set, clamped to 48 MiB so
    # the same config is safe on v7x (64 MiB/TC) as well as v5e/v6e (128 MiB).
    weight_bytes = sum(kparams[k].size * kparams[k].dtype.itemsize for k in names)
    io_bytes = (Cin * H * W + cexp * Ho * Wo) * 4
    scratch_bytes = (H + 2) * (W + 2) * mid_pad * 2
    temp_bytes = Ho * Wo * (9 * mid_pad * 2 + 8 * mid_pad + 12 * Cexp_pad)
    est = 4 * io_bytes + 2 * weight_bytes + scratch_bytes + 2 * temp_bytes
    vmem_limit = int(max(min(est, 48 * 1024 * 1024), 8 * 1024 * 1024))

    out = pl.pallas_call(
        kernel,
        grid=(N,),
        in_specs=in_specs,
        out_specs=pl.BlockSpec((1, cexp, Ho * Wo), lambda n: (n, 0, 0)),
        out_shape=jax.ShapeDtypeStruct((N, cexp, Ho * Wo), jnp.float32),
        scratch_shapes=[pltpu.VMEM((H + 2, W + 2, mid_pad), jnp.bfloat16)],
        compiler_params=pltpu.CompilerParams(
            dimension_semantics=("parallel",),
            vmem_limit_bytes=vmem_limit),
    )(*args)
    # (N, Cexp, Ho*Wo) -> NCHW via a free reshape (no transpose HBM pass).
    return out.reshape(N, cexp, Ho, Wo)


# ----------------------------------------------------------------------------
# Parameters: PyTorch-layout raw params + packing (BN folding + 128-lane pad)
# ----------------------------------------------------------------------------
def init_params(key, in_channels, out_channels, stride=1):
    """Random parameters in PyTorch layout (f32): conv (Cout,Cin,KH,KW), BN tuples."""
    expansion = 4
    mid = out_channels
    cexp = out_channels * expansion
    keys = iter(jax.random.split(key, 32))

    def conv_w(cout, cin, k):
        return 0.1 * jax.random.normal(next(keys), (cout, cin, k, k), jnp.float32)

    def bn(c):
        gamma = 1.0 + 0.1 * jax.random.normal(next(keys), (c,), jnp.float32)
        beta = 0.1 * jax.random.normal(next(keys), (c,), jnp.float32)
        mean = 0.1 * jax.random.normal(next(keys), (c,), jnp.float32)
        var = 1.0 + 0.1 * jnp.abs(jax.random.normal(next(keys), (c,), jnp.float32))
        return gamma, beta, mean, var

    p = {'w1': conv_w(mid, in_channels, 1), 'bn1': bn(mid),
         'w2': conv_w(mid, mid, 3), 'bn2': bn(mid),
         'w3': conv_w(cexp, mid, 1), 'bn3': bn(cexp)}
    if stride != 1 or in_channels != cexp:
        p['wsc'] = conv_w(cexp, in_channels, 1)
        p['bnsc'] = bn(cexp)
    return p


def _pad_axis(a, axis, target):
    pad = target - a.shape[axis]
    if pad <= 0:
        return a
    widths = [(0, 0)] * a.ndim
    widths[axis] = (0, pad)
    return jnp.pad(a, widths)


def pack_params(p, eps=1e-5):
    """Fold eval-mode BN into scale/bias and pad channel dims to 128 lanes.

    Padded weight rows/cols and padded scale/bias entries are zero, so padded
    lanes carry exact zeros through the whole kernel.
    """
    mid = p['w1'].shape[0]
    cexp = p['w3'].shape[0]
    mid_pad = _round_up(mid, _LANE)
    cexp_pad = _round_up(cexp, _LANE)

    def fold(bn_params, cpad):
        gamma, beta, mean, var = bn_params
        scale = gamma / jnp.sqrt(var + eps)
        bias = beta - scale * mean
        scale = _pad_axis(scale.reshape(1, -1), 1, cpad).astype(jnp.float32)
        bias = _pad_axis(bias.reshape(1, -1), 1, cpad).astype(jnp.float32)
        return scale, bias

    kp = {}
    # conv1: (mid, Cin, 1, 1) -> (Cin, mid_pad)
    w1 = jnp.transpose(p['w1'][:, :, 0, 0], (1, 0))
    kp['w1'] = _pad_axis(w1, 1, mid_pad).astype(jnp.bfloat16)
    kp['s1'], kp['b1'] = fold(p['bn1'], mid_pad)
    # conv2: (mid, mid, 3, 3) OIHW -> (3,3,I,O) -> pad I,O -> (9*mid_pad, mid_pad)
    # row index is (dy*3 + dx)*mid_pad + cin, matching the kernel tap order.
    w2 = jnp.transpose(p['w2'], (2, 3, 1, 0))
    w2 = _pad_axis(_pad_axis(w2, 2, mid_pad), 3, mid_pad)
    kp['w2'] = w2.reshape(9 * mid_pad, mid_pad).astype(jnp.bfloat16)
    kp['s2'], kp['b2'] = fold(p['bn2'], mid_pad)
    # conv3: (cexp, mid, 1, 1) -> (mid_pad, cexp_pad)
    w3 = jnp.transpose(p['w3'][:, :, 0, 0], (1, 0))
    kp['w3'] = _pad_axis(_pad_axis(w3, 0, mid_pad), 1, cexp_pad).astype(jnp.bfloat16)
    kp['s3'], kp['b3'] = fold(p['bn3'], cexp_pad)
    if 'wsc' in p:
        wsc = jnp.transpose(p['wsc'][:, :, 0, 0], (1, 0))
        kp['wsc'] = _pad_axis(wsc, 1, cexp_pad).astype(jnp.bfloat16)
        kp['ssc'], kp['bsc'] = fold(p['bnsc'], cexp_pad)
    return kp


# ----------------------------------------------------------------------------
# Pure-JAX reference (matches the PyTorch module in eval mode)
# ----------------------------------------------------------------------------
def ref_forward(x_nchw, p, stride=1, eps=1e-5):
    def conv(x, w, s=1, pad=0):
        return jax.lax.conv_general_dilated(
            x, w, window_strides=(s, s), padding=[(pad, pad), (pad, pad)],
            dimension_numbers=('NCHW', 'OIHW', 'NCHW'),
            precision=jax.lax.Precision.HIGHEST)

    def bn(x, params):
        gamma, beta, mean, var = (t[None, :, None, None] for t in params)
        return gamma * (x - mean) / jnp.sqrt(var + eps) + beta

    out = jax.nn.relu(bn(conv(x_nchw, p['w1']), p['bn1']))
    out = jax.nn.relu(bn(conv(out, p['w2'], s=stride, pad=1), p['bn2']))
    out = bn(conv(out, p['w3']), p['bn3'])
    sc = bn(conv(x_nchw, p['wsc'], s=stride), p['bnsc']) if 'wsc' in p else x_nchw
    return jax.nn.relu(out + sc)


# ----------------------------------------------------------------------------
# Main
# ----------------------------------------------------------------------------
if __name__ == "__main__":
    def run_case(case_key, n, cin, cout, h, w, stride):
        pkey, xkey = jax.random.split(case_key)
        p = init_params(pkey, cin, cout, stride)
        kp = pack_params(p)
        x = jax.random.normal(xkey, (n, cin, h, w), jnp.float32)
        cexp = cout * 4

        fwd = jax.jit(functools.partial(bottleneck_residual_block,
                                        stride=stride, cexp=cexp))
        out = fwd(x, kp)
        jax.block_until_ready(out)

        ho = (h - 1) // stride + 1
        wo = (w - 1) // stride + 1
        assert out.shape == (n, cexp, ho, wo), out.shape
        assert bool(jnp.all(jnp.isfinite(out)))

        ref = ref_forward(x, p, stride)
        rel = jnp.sqrt(jnp.mean((out - ref) ** 2)) / (jnp.sqrt(jnp.mean(ref ** 2)) + 1e-6)
        assert float(rel) < 5e-2, float(rel)

    key = jax.random.PRNGKey(0)
    k1, k2 = jax.random.split(key)
    # Projection-shortcut case (in_channels != out_channels*4), stride 1 (default).
    run_case(k1, n=2, cin=32, cout=32, h=16, w=16, stride=1)
    # Identity-shortcut case (in_channels == out_channels*4), stride 1.
    run_case(k2, n=2, cin=64, cout=16, h=8, w=8, stride=1)

    print("KERNEL_OK")
</pallas_src>

<mosaic_0001>
module attributes {stable_mosaic.version = 11 : i64} {
  func.func @_bottleneck_kernel(%arg0: i32, %arg1: memref<1x32x256xf32, #tpu.memory_space<vmem>>, %arg2: memref<32x128xbf16, #tpu.memory_space<vmem>>, %arg3: memref<1x128xf32, #tpu.memory_space<vmem>>, %arg4: memref<1x128xf32, #tpu.memory_space<vmem>>, %arg5: memref<1152x128xbf16, #tpu.memory_space<vmem>>, %arg6: memref<1x128xf32, #tpu.memory_space<vmem>>, %arg7: memref<1x128xf32, #tpu.memory_space<vmem>>, %arg8: memref<128x128xbf16, #tpu.memory_space<vmem>>, %arg9: memref<1x128xf32, #tpu.memory_space<vmem>>, %arg10: memref<1x128xf32, #tpu.memory_space<vmem>>, %arg11: memref<32x128xbf16, #tpu.memory_space<vmem>>, %arg12: memref<1x128xf32, #tpu.memory_space<vmem>>, %arg13: memref<1x128xf32, #tpu.memory_space<vmem>>, %arg14: memref<1x128x256xf32, #tpu.memory_space<vmem>>, %arg15: memref<18x18x128xbf16, #tpu.memory_space<vmem>>) attributes {dimension_semantics = [#tpu.dimension_semantics<parallel>], iteration_bounds = array<i64: 2>, scalar_prefetch = 0 : i64, scratch_operands = 1 : i64, tpu.core_type = #tpu.core_type<tc>, window_params = [{transform_indices = @transform_0, window_bounds = array<i64: 1, 32, 256>}, {pipeline_mode = #tpu.pipeline_mode<synchronous>, transform_indices = @transform_1, window_bounds = array<i64: 32, 128>}, {pipeline_mode = #tpu.pipeline_mode<synchronous>, transform_indices = @transform_2, window_bounds = array<i64: 1, 128>}, {pipeline_mode = #tpu.pipeline_mode<synchronous>, transform_indices = @transform_3, window_bounds = array<i64: 1, 128>}, {pipeline_mode = #tpu.pipeline_mode<synchronous>, transform_indices = @transform_4, window_bounds = array<i64: 1152, 128>}, {pipeline_mode = #tpu.pipeline_mode<synchronous>, transform_indices = @transform_5, window_bounds = array<i64: 1, 128>}, {pipeline_mode = #tpu.pipeline_mode<synchronous>, transform_indices = @transform_6, window_bounds = array<i64: 1, 128>}, {pipeline_mode = #tpu.pipeline_mode<synchronous>, transform_indices = @transform_7, window_bounds = array<i64: 128, 128>}, {pipeline_mode = #tpu.pipeline_mode<synchronous>, transform_indices = @transform_8, window_bounds = array<i64: 1, 128>}, {pipeline_mode = #tpu.pipeline_mode<synchronous>, transform_indices = @transform_9, window_bounds = array<i64: 1, 128>}, {pipeline_mode = #tpu.pipeline_mode<synchronous>, transform_indices = @transform_10, window_bounds = array<i64: 32, 128>}, {pipeline_mode = #tpu.pipeline_mode<synchronous>, transform_indices = @transform_11, window_bounds = array<i64: 1, 128>}, {pipeline_mode = #tpu.pipeline_mode<synchronous>, transform_indices = @transform_12, window_bounds = array<i64: 1, 128>}, {transform_indices = @transform_13, window_bounds = array<i64: 1, 128, 256>}]} {
    %c0 = arith.constant 0 : index
    %c0_0 = arith.constant 0 : index
    %c0_1 = arith.constant 0 : index
    %0 = vector.load %arg1[%c0, %c0_0, %c0_1] : memref<1x32x256xf32, #tpu.memory_space<vmem>>, vector<1x32x256xf32>
    %1 = vector.shape_cast %0 : vector<1x32x256xf32> to vector<32x256xf32>
    %2 = tpu.transpose %1, [1, 0] : vector<32x256xf32> -> vector<256x32xf32>
    %3 = arith.truncf %2 : vector<256x32xf32> to vector<256x32xbf16>
    %c0_2 = arith.constant 0 : index
    %c0_3 = arith.constant 0 : index
    %4 = vector.load %arg2[%c0_2, %c0_3] : memref<32x128xbf16, #tpu.memory_space<vmem>>, vector<32x128xbf16>
    %cst = arith.constant dense<0.000000e+00> : vector<256x128xf32>
    %5 = tpu.matmul %3, %4, %cst {dimension_numbers = #tpu.dot_dimension_numbers<[1], [0], [0], [1], [0, 0, 1, 1], [], []>} : vector<256x32xbf16>, vector<32x128xbf16>, vector<256x128xf32> -> vector<256x128xf32>
    %c0_4 = arith.constant 0 : index
    %c0_5 = arith.constant 0 : index
    %6 = vector.load %arg3[%c0_4, %c0_5] : memref<1x128xf32, #tpu.memory_space<vmem>>, vector<1x128xf32>
    %7 = vector.broadcast %6 : vector<1x128xf32> to vector<256x128xf32>
    %8 = arith.mulf %5, %7 : vector<256x128xf32>
    %c0_6 = arith.constant 0 : index
    %c0_7 = arith.constant 0 : index
    %9 = vector.load %arg4[%c0_6, %c0_7] : memref<1x128xf32, #tpu.memory_space<vmem>>, vector<1x128xf32>
    %10 = vector.broadcast %9 : vector<1x128xf32> to vector<256x128xf32>
    %11 = arith.addf %8, %10 : vector<256x128xf32>
    %cst_8 = arith.constant 0.000000e+00 : f32
    %12 = vector.broadcast %cst_8 : f32 to vector<256x128xf32>
    %13 = arith.maximumf %11, %12 : vector<256x128xf32>
    %cst_9 = arith.constant 0.000000e+00 : bf16
    %14 = vector.broadcast %cst_9 : bf16 to vector<1x18x128xbf16>
    %c0_10 = arith.constant 0 : index
    %c0_11 = arith.constant 0 : index
    %c0_12 = arith.constant 0 : index
    %15 = vector.load %arg15[%c0_10, %c0_11, %c0_12] : memref<18x18x128xbf16, #tpu.memory_space<vmem>>, vector<1x18x128xbf16>
    tpu.vector_store %arg15[%c0_10, %c0_11, %c0_12], %14 {strides = array<i32>} : memref<18x18x128xbf16, #tpu.memory_space<vmem>>, vector<1x18x128xbf16>,
    %c17 = arith.constant 17 : index
    %c0_13 = arith.constant 0 : index
    %c0_14 = arith.constant 0 : index
    %16 = vector.load %arg15[%c17, %c0_13, %c0_14] : memref<18x18x128xbf16, #tpu.memory_space<vmem>>, vector<1x18x128xbf16>
    tpu.vector_store %arg15[%c17, %c0_13, %c0_14], %14 {strides = array<i32>} : memref<18x18x128xbf16, #tpu.memory_space<vmem>>, vector<1x18x128xbf16>,
    %cst_15 = arith.constant 0.000000e+00 : bf16
    %17 = vector.broadcast %cst_15 : bf16 to vector<16x1x128xbf16>
    %c1 = arith.constant 1 : index
    %c0_16 = arith.constant 0 : index
    %c0_17 = arith.constant 0 : index
    %18 = vector.load %arg15[%c1, %c0_16, %c0_17] : memref<18x18x128xbf16, #tpu.memory_space<vmem>>, vector<16x1x128xbf16>
    tpu.vector_store %arg15[%c1, %c0_16, %c0_17], %17 {strides = array<i32>} : memref<18x18x128xbf16, #tpu.memory_space<vmem>>, vector<16x1x128xbf16>,
    %c1_18 = arith.constant 1 : index
    %c17_19 = arith.constant 17 : index
    %c0_20 = arith.constant 0 : index
    %19 = vector.load %arg15[%c1_18, %c17_19, %c0_20] : memref<18x18x128xbf16, #tpu.memory_space<vmem>>, vector<16x1x128xbf16>
    tpu.vector_store %arg15[%c1_18, %c17_19, %c0_20], %17 {strides = array<i32>} : memref<18x18x128xbf16, #tpu.memory_space<vmem>>, vector<16x1x128xbf16>,
    %20 = vector.shape_cast %13 : vector<256x128xf32> to vector<16x16x128xf32>
    %21 = arith.truncf %20 : vector<16x16x128xf32> to vector<16x16x128xbf16>
    %c1_21 = arith.constant 1 : index
    %c1_22 = arith.constant 1 : index
    %c0_23 = arith.constant 0 : index
    %22 = vector.load %arg15[%c1_21, %c1_22, %c0_23] : memref<18x18x128xbf16, #tpu.memory_space<vmem>>, vector<16x16x128xbf16>
    tpu.vector_store %arg15[%c1_21, %c1_22, %c0_23], %21 {strides = array<i32>} : memref<18x18x128xbf16, #tpu.memory_space<vmem>>, vector<16x16x128xbf16>,
    %c0_24 = arith.constant 0 : index
    %c0_25 = arith.constant 0 : index
    %c0_26 = arith.constant 0 : index
    %23 = vector.load %arg15[%c0_24, %c0_25, %c0_26] : memref<18x18x128xbf16, #tpu.memory_space<vmem>>, vector<16x16x128xbf16>
    %c0_27 = arith.constant 0 : index
    %c1_28 = arith.constant 1 : index
    %c0_29 = arith.constant 0 : index
    %24 = vector.load %arg15[%c0_27, %c1_28, %c0_29] : memref<18x18x128xbf16, #tpu.memory_space<vmem>>, vector<16x16x128xbf16>
    %c0_30 = arith.constant 0 : index
    %c2 = arith.constant 2 : index
    %c0_31 = arith.constant 0 : index
    %25 = vector.load %arg15[%c0_30, %c2, %c0_31] : memref<18x18x128xbf16, #tpu.memory_space<vmem>>, vector<16x16x128xbf16>
    %c1_32 = arith.constant 1 : index
    %c0_33 = arith.constant 0 : index
    %c0_34 = arith.constant 0 : index
    %26 = vector.load %arg15[%c1_32, %c0_33, %c0_34] : memref<18x18x128xbf16, #tpu.memory_space<vmem>>, vector<16x16x128xbf16>
    %c1_35 = arith.constant 1 : index
    %c1_36 = arith.constant 1 : index
    %c0_37 = arith.constant 0 : index
    %27 = vector.load %arg15[%c1_35, %c1_36, %c0_37] : memref<18x18x128xbf16, #tpu.memory_space<vmem>>, vector<16x16x128xbf16>
    %c1_38 = arith.constant 1 : index
    %c2_39 = arith.constant 2 : index
    %c0_40 = arith.constant 0 : index
    %28 = vector.load %arg15[%c1_38, %c2_39, %c0_40] : memref<18x18x128xbf16, #tpu.memory_space<vmem>>, vector<16x16x128xbf16>
    %c2_41 = arith.constant 2 : index
    %c0_42 = arith.constant 0 : index
    %c0_43 = arith.constant 0 : index
    %29 = vector.load %arg15[%c2_41, %c0_42, %c0_43] : memref<18x18x128xbf16, #tpu.memory_space<vmem>>, vector<16x16x128xbf16>
    %c2_44 = arith.constant 2 : index
    %c1_45 = arith.constant 1 : index
    %c0_46 = arith.constant 0 : index
    %30 = vector.load %arg15[%c2_44, %c1_45, %c0_46] : memref<18x18x128xbf16, #tpu.memory_space<vmem>>, vector<16x16x128xbf16>
    %c2_47 = arith.constant 2 : index
    %c2_48 = arith.constant 2 : index
    %c0_49 = arith.constant 0 : index
    %31 = vector.load %arg15[%c2_47, %c2_48, %c0_49] : memref<18x18x128xbf16, #tpu.memory_space<vmem>>, vector<16x16x128xbf16>
    %32 = tpu.concatenate %23, %24, %25, %26, %27, %28, %29, %30, %31 in 2 : vector<16x16x128xbf16>, vector<16x16x128xbf16>, vector<16x16x128xbf16>, vector<16x16x128xbf16>, vector<16x16x128xbf16>, vector<16x16x128xbf16>, vector<16x16x128xbf16>, vector<16x16x128xbf16>, vector<16x16x128xbf16> -> vector<16x16x1152xbf16>
    %33 = vector.shape_cast %32 : vector<16x16x1152xbf16> to vector<256x1152xbf16>
    %c0_50 = arith.constant 0 : index
    %c0_51 = arith.constant 0 : index
    %34 = vector.load %arg5[%c0_50, %c0_51] : memref<1152x128xbf16, #tpu.memory_space<vmem>>, vector<1152x128xbf16>
    %cst_52 = arith.constant dense<0.000000e+00> : vector<256x128xf32>
    %35 = tpu.matmul %33, %34, %cst_52 {dimension_numbers = #tpu.dot_dimension_numbers<[1], [0], [0], [1], [0, 0, 1, 1], [], []>} : vector<256x1152xbf16>, vector<1152x128xbf16>, vector<256x128xf32> -> vector<256x128xf32>
    %c0_53 = arith.constant 0 : index
    %c0_54 = arith.constant 0 : index
    %36 = vector.load %arg6[%c0_53, %c0_54] : memref<1x128xf32, #tpu.memory_space<vmem>>, vector<1x128xf32>
    %37 = vector.broadcast %36 : vector<1x128xf32> to vector<256x128xf32>
    %38 = arith.mulf %35, %37 : vector<256x128xf32>
    %c0_55 = arith.constant 0 : index
    %c0_56 = arith.constant 0 : index
    %39 = vector.load %arg7[%c0_55, %c0_56] : memref<1x128xf32, #tpu.memory_space<vmem>>, vector<1x128xf32>
    %40 = vector.broadcast %39 : vector<1x128xf32> to vector<256x128xf32>
    %41 = arith.addf %38, %40 : vector<256x128xf32>
    %cst_57 = arith.constant 0.000000e+00 : f32
    %42 = vector.broadcast %cst_57 : f32 to vector<256x128xf32>
    %43 = arith.maximumf %41, %42 : vector<256x128xf32>
    %44 = arith.truncf %43 : vector<256x128xf32> to vector<256x128xbf16>
    %c0_58 = arith.constant 0 : index
    %c0_59 = arith.constant 0 : index
    %45 = vector.load %arg8[%c0_58, %c0_59] : memref<128x128xbf16, #tpu.memory_space<vmem>>, vector<128x128xbf16>
    %cst_60 = arith.constant dense<0.000000e+00> : vector<256x128xf32>
    %46 = tpu.matmul %44, %45, %cst_60 {dimension_numbers = #tpu.dot_dimension_numbers<[1], [0], [0], [1], [0, 0, 1, 1], [], []>} : vector<256x128xbf16>, vector<128x128xbf16>, vector<256x128xf32> -> vector<256x128xf32>
    %c0_61 = arith.constant 0 : index
    %c0_62 = arith.constant 0 : index
    %47 = vector.load %arg9[%c0_61, %c0_62] : memref<1x128xf32, #tpu.memory_space<vmem>>, vector<1x128xf32>
    %48 = vector.broadcast %47 : vector<1x128xf32> to vector<256x128xf32>
    %49 = arith.mulf %46, %48 : vector<256x128xf32>
    %c0_63 = arith.constant 0 : index
    %c0_64 = arith.constant 0 : index
    %50 = vector.load %arg10[%c0_63, %c0_64] : memref<1x128xf32, #tpu.memory_space<vmem>>, vector<1x128xf32>
    %51 = vector.broadcast %50 : vector<1x128xf32> to vector<256x128xf32>
    %52 = arith.addf %49, %51 : vector<256x128xf32>
    %c0_65 = arith.constant 0 : index
    %c0_66 = arith.constant 0 : index
    %53 = vector.load %arg11[%c0_65, %c0_66] : memref<32x128xbf16, #tpu.memory_space<vmem>>, vector<32x128xbf16>
    %cst_67 = arith.constant dense<0.000000e+00> : vector<256x128xf32>
    %54 = tpu.matmul %3, %53, %cst_67 {dimension_numbers = #tpu.dot_dimension_numbers<[1], [0], [0], [1], [0, 0, 1, 1], [], []>} : vector<256x32xbf16>, vector<32x128xbf16>, vector<256x128xf32> -> vector<256x128xf32>
    %c0_68 = arith.constant 0 : index
    %c0_69 = arith.constant 0 : index
    %55 = vector.load %arg12[%c0_68, %c0_69] : memref<1x128xf32, #tpu.memory_space<vmem>>, vector<1x128xf32>
    %56 = vector.broadcast %55 : vector<1x128xf32> to vector<256x128xf32>
    %57 = arith.mulf %54, %56 : vector<256x128xf32>
    %c0_70 = arith.constant 0 : index
    %c0_71 = arith.constant 0 : index
    %58 = vector.load %arg13[%c0_70, %c0_71] : memref<1x128xf32, #tpu.memory_space<vmem>>, vector<1x128xf32>
    %59 = vector.broadcast %58 : vector<1x128xf32> to vector<256x128xf32>
    %60 = arith.addf %57, %59 : vector<256x128xf32>
    %61 = arith.addf %52, %60 : vector<256x128xf32>
    %cst_72 = arith.constant 0.000000e+00 : f32
    %62 = vector.broadcast %cst_72 : f32 to vector<256x128xf32>
    %63 = arith.maximumf %61, %62 : vector<256x128xf32>
    %64 = tpu.transpose %63, [1, 0] : vector<256x128xf32> -> vector<128x256xf32>
    %c0_73 = arith.constant 0 : index
    %c0_74 = arith.constant 0 : index
    %c0_75 = arith.constant 0 : index
    %65 = vector.load %arg14[%c0_73, %c0_74, %c0_75] : memref<1x128x256xf32, #tpu.memory_space<vmem>>, vector<1x128x256xf32>
    %66 = vector.shape_cast %65 : vector<1x128x256xf32> to vector<128x256xf32>
    %67 = vector.shape_cast %64 : vector<128x256xf32> to vector<1x128x256xf32>
    tpu.vector_store %arg14[%c0_73, %c0_74, %c0_75], %67 {strides = array<i32>} : memref<1x128x256xf32, #tpu.memory_space<vmem>>, vector<1x128x256xf32>,
    return
  }
  func.func @transform_0(%arg0: i32) -> (i32, i32, i32) {
    %c0_i32 = arith.constant 0 : i32
    %c0_i32_0 = arith.constant 0 : i32
    %c0_i32_1 = arith.constant 0 : i32
    return %arg0, %c0_i32, %c0_i32_0 : i32, i32, i32
  }
  func.func @transform_1(%arg0: i32) -> (i32, i32) {
    %c0_i32 = arith.constant 0 : i32
    %c0_i32_0 = arith.constant 0 : i32
    %c0_i32_1 = arith.constant 0 : i32
    return %c0_i32, %c0_i32_0 : i32, i32
  }
  func.func @transform_2(%arg0: i32) -> (i32, i32) {
    %c0_i32 = arith.constant 0 : i32
    %c0_i32_0 = arith.constant 0 : i32
    %c0_i32_1 = arith.constant 0 : i32
    return %c0_i32, %c0_i32_0 : i32, i32
  }
  func.func @transform_3(%arg0: i32) -> (i32, i32) {
    %c0_i32 = arith.constant 0 : i32
    %c0_i32_0 = arith.constant 0 : i32
    %c0_i32_1 = arith.constant 0 : i32
    return %c0_i32, %c0_i32_0 : i32, i32
  }
  func.func @transform_4(%arg0: i32) -> (i32, i32) {
    %c0_i32 = arith.constant 0 : i32
    %c0_i32_0 = arith.constant 0 : i32
    %c0_i32_1 = arith.constant 0 : i32
    return %c0_i32, %c0_i32_0 : i32, i32
  }
  func.func @transform_5(%arg0: i32) -> (i32, i32) {
    %c0_i32 = arith.constant 0 : i32
    %c0_i32_0 = arith.constant 0 : i32
    %c0_i32_1 = arith.constant 0 : i32
    return %c0_i32, %c0_i32_0 : i32, i32
  }
  func.func @transform_6(%arg0: i32) -> (i32, i32) {
    %c0_i32 = arith.constant 0 : i32
    %c0_i32_0 = arith.constant 0 : i32
    %c0_i32_1 = arith.constant 0 : i32
    return %c0_i32, %c0_i32_0 : i32, i32
  }
  func.func @transform_7(%arg0: i32) -> (i32, i32) {
    %c0_i32 = arith.constant 0 : i32
    %c0_i32_0 = arith.constant 0 : i32
    %c0_i32_1 = arith.constant 0 : i32
    return %c0_i32, %c0_i32_0 : i32, i32
  }
  func.func @transform_8(%arg0: i32) -> (i32, i32) {
    %c0_i32 = arith.constant 0 : i32
    %c0_i32_0 = arith.constant 0 : i32
    %c0_i32_1 = arith.constant 0 : i32
    return %c0_i32, %c0_i32_0 : i32, i32
  }
  func.func @transform_9(%arg0: i32) -> (i32, i32) {
    %c0_i32 = arith.constant 0 : i32
    %c0_i32_0 = arith.constant 0 : i32
    %c0_i32_1 = arith.constant 0 : i32
    return %c0_i32, %c0_i32_0 : i32, i32
  }
  func.func @transform_10(%arg0: i32) -> (i32, i32) {
    %c0_i32 = arith.constant 0 : i32
    %c0_i32_0 = arith.constant 0 : i32
    %c0_i32_1 = arith.constant 0 : i32
    return %c0_i32, %c0_i32_0 : i32, i32
  }
  func.func @transform_11(%arg0: i32) -> (i32, i32) {
    %c0_i32 = arith.constant 0 : i32
    %c0_i32_0 = arith.constant 0 : i32
    %c0_i32_1 = arith.constant 0 : i32
    return %c0_i32, %c0_i32_0 : i32, i32
  }
  func.func @transform_12(%arg0: i32) -> (i32, i32) {
    %c0_i32 = arith.constant 0 : i32
    %c0_i32_0 = arith.constant 0 : i32
    %c0_i32_1 = arith.constant 0 : i32
    return %c0_i32, %c0_i32_0 : i32, i32
  }
  func.func @transform_13(%arg0: i32) -> (i32, i32, i32) {
    %c0_i32 = arith.constant 0 : i32
    %c0_i32_0 = arith.constant 0 : i32
    %c0_i32_1 = arith.constant 0 : i32
    return %arg0, %c0_i32, %c0_i32_0 : i32, i32, i32
  }
}

</mosaic_0001>

<bundles_post_ra>
// kernel: bottleneck_residual_block.1
= control target key start
LH: loop header
LB: loop body
LE: loop exit
PB: predicated region body
PF: predicated region fallthrough
CT: control target
= control target key end

     0   :  { %s6762_s25 = smov 0   ;;  %s8669_s0 = inlined_call_operand.vmem [shape: f32[2,32,256], index: 0, kind: input, shape index: {}]   ;;  %s8670_s1 = inlined_call_operand.vmem [shape: bf16[32,128], index: 1, kind: input, shape index: {}]   ;;  %s8671_s2 = inlined_call_operand.vmem [shape: f32[1,128], index: 2, kind: input, shape index: {}]   ;;  %s8672_s3 = inlined_call_operand.vmem [shape: f32[1,128], index: 3, kind: input, shape index: {}]   ;;  %s8673_s4 = inlined_call_operand.vmem [shape: bf16[1152,128], index: 4, kind: input, shape index: {}]   ;;  %s8674_s5 = inlined_call_operand.vmem [shape: f32[1,128], index: 5, kind: input, shape index: {}]   ;;  %s8675_s6 = inlined_call_operand.vmem [shape: f32[1,128], index: 6, kind: input, shape index: {}]   ;;  %s8676_s7 = inlined_call_operand.vmem [shape: bf16[128,128], index: 7, kind: input, shape index: {}]   ;;  %s8677_s8 = inlined_call_operand.vmem [shape: f32[1,128], index: 8, kind: input, shape index: {}]   ;;  %s8678_s9 = inlined_call_operand.vmem [shape: f32[1,128], index: 9, kind: input, shape index: {}]   ;;  %s8679_s10 = inlined_call_operand.vmem [shape: bf16[32,128], index: 10, kind: input, shape index: {}]   ;;  %s8680_s11 = inlined_call_operand.vmem [shape: f32[1,128], index: 11, kind: input, shape index: {}]   ;;  %s8681_s12 = inlined_call_operand.vmem [shape: f32[1,128], index: 12, kind: input, shape index: {}]   ;;  %s8682_s13 = inlined_call_operand.vmem [shape: f32[2,128,256], index: 13, kind: output, shape index: {}]  }
   0x1 LB: > { %s5374_s26 = sadd.s32 4294967295, %s6689_s25   ;;  %p5378_p0 = scmp.ge.s32.totalorder %s6689_s25, 1  ;;  %s6689_s25 = sphi %s6762_s25, %s23_s25  }
   0x2   : > { %p387_p1 = scmp.lt.s32.totalorder %s6689_s25, 3 }
   0x4   : > { %p388_p2 = pnand %p5378_p0, %p387_p1 }
   0x6   : > { %391 = sbr.rel (%p388_p2) target bundleno = 1379 (0x563), region = 72 }
   0xd   : > { %p431_p3 = scmp.lt.s32.totalorder %s5374_s26, 1  ;;  %v6433_v6 = vld [vmem:[%s8670_s1] sm:$0xff]   ;;  %v6434_v9 = vld [vmem:[%s8670_s1 + $0x8] sm:$0xff]   ;;  %vm546_vm0 = vcmask 261120   ;;  %vm874_vm1 = vcmask 1040384   ;;  %vm2101_vm7 = vcmask 1046528  }
   0xe   : > { %6251 = vmatprep.subr.bf16.mxu0 %v6433_v6  ;;  %v6435_v10 = vld [vmem:[%s8673_s4 + $0x40] sm:$0xff]   ;;  %v6437_v12 = vld [vmem:[%s8673_s4 + $0x48] sm:$0xff]   ;;  %vm875_vm2 = vsmask.f32 256  ;;  %vm925_vm4 = vsmask.f32 7938 }
   0xf   : > { %s8739_s26 = smov (!%p431_p3, %s5374_s26), 1  ;;  %6252 = vmatpush3.bf16.msra.mxu0 %v6433_v6  ;;  %v6436_v11 = vld [vmem:[%s8673_s4] sm:$0xff]   ;;  %5737 = vmatprep.subr.bf16.mxu1 %v6435_v10  ;;  %v6439_v14 = vld [vmem:[%s8673_s4 + $0x8] sm:$0xff]   ;;  %vm6883_vm3 = vmand %vm874_vm1, %vm875_vm2  ;;  %vm1844_vm6 = vsmask.f32 7424  ;;  %vm1393_vm8 = vcmask 1043456  }
  0x10   : > { %s5685_s27 = sshll.u32 %s8739_s26, 6  ;;  %6253 = vmatprep.subr.bf16.mxu0 %v6434_v9  ;;  %v6438_v13 = vld [vmem:[%s8673_s4 + $0xc0] sm:$0xff]   ;;  %5738 = vmatpush3.bf16.msra.mxu1 %v6436_v11  ;;  %vm6893_vm5 = vmand %vm874_vm1, %vm925_vm4  ;;  %v877_v11 = vld [vmem:[#allocation2 + $0xc] sm:$0x1]  ;;  %vm1071_vm9 = vsmask.f32 4368 }
  0x11   : > { %s435_s30 = scalar_lea.vmem %s8669_s0, %s5685_s27  ;;  %5739 = vmatprep.subr.bf16.mxu1 %v6437_v12  ;;  %v6440_v23 = vld [vmem:[%s8673_s4 + $0x80] sm:$0xff]   ;;  %v6448_v12 = vld [vmem:[%s8673_s4 + $0x90] sm:$0xff]   ;;  %vm7072_vm10 = vmand %vm1393_vm8, %vm925_vm4  ;;  %s5686_s28 = sshll.u32 %s8739_s26, 8 }
  0x12   : > { %v442_v0 = vld [vmem:[%s435_s30] sm:$0xff]  ;;  %v443_v1 = vld [vmem:[%s435_s30 + $0x8] sm:$0xff]  ;;  %v444_v2 = vld [vmem:[%s435_s30 + $0x10] sm:$0xff]  ;;  %s8632_s14 = scalar_lea.vmem %s8682_s13, %s5686_s28 }
  0x13   : > { %450 = vxpose.xlu0.b32.start [1/4] (short) %v442_v0, 128  ;;  %482 = vxpose.xlu1.b32.start [1/4] (short) %v443_v1, 128  ;;  %v445_v3 = vld [vmem:[%s435_s30 + $0x18] sm:$0xff]  ;;  %v446_v4 = vld [vmem:[%s435_s30 + $0x20] sm:$0xff]  ;;  %v447_v5 = vld [vmem:[%s435_s30 + $0x28] sm:$0xff] }
  0x14   : > { %v448_v7 = vld [vmem:[%s435_s30 + $0x30] sm:$0xff]  ;;  %v449_v8 = vld [vmem:[%s435_s30 + $0x38] sm:$0xff]  ;;  %6254 = vmatpush3.bf16.msra.mxu0 %v6434_v9  ;;  %5740 = vmatpush3.bf16.msra.mxu1 %v6439_v14  ;;  %v6442_v1 = vld [vmem:[%s8673_s4 + $0xc8] sm:$0xff]  }
  0x15   : > { %5849 = vmatprep.subr.bf16.mxu0 %v6438_v13  ;;  %v6441_v0 = vld [vmem:[%s8673_s4 + $0x50] sm:$0xff]   ;;  %v878_v13 = vsel %vm6883_vm3, 0, %v877_v11  ;;  %v930_v14 = vld [vmem:[#allocation2 + $0x20] sm:$0x1]  ;;  %v6536_v10 = vld [vmem:[%s8673_s4 + $0x128] sm:$0xff]  }
  0x16   : > { %5741 = vmatprep.subr.bf16.mxu1 %v6441_v0  ;;  %879 = vst [vmem:[#allocation2 + $0xc] sm:$0x1] %v878_v13  ;;  %vm7084_vm11 = vmor %vm875_vm2, %vm1071_vm9 }
  0x17   : > { %451 = vxpose.xlu0.b32.cont [2/4] (short) %v444_v2, 128  ;;  %483 = vxpose.xlu1.b32.cont [2/4] (short) %v445_v3, 128  ;;  %v6443_v2 = vld [vmem:[%s8673_s4 + $0x10] sm:$0xff]   ;;  %v6444_v3 = vld [vmem:[%s8673_s4 + $0x88] sm:$0xff]  }
  0x18   : > { %5742 = vmatpush3.bf16.msra.mxu1 %v6443_v2 }
  0x1b   : > { %452 = vxpose.xlu0.b32.cont [3/4] (short) %v446_v4, 128  ;;  %484 = vxpose.xlu1.b32.cont [3/4] (short) %v447_v5, 128  ;;  %v6445_v4 = vld [vmem:[%s8673_s4 + $0x58] sm:$0xff]   ;;  %v6446_v5 = vld [vmem:[%s8673_s4 + $0xd0] sm:$0xff]  }
  0x1c   : > { %5743 = vmatprep.subr.bf16.mxu1 %v6445_v4 }
  0x1f   : > { %453 = vxpose.xlu0.b32.end [4/4] (short) %v448_v7, 128  ;;  %485 = vxpose.xlu1.b32.end [4/4] (short) %v449_v8, 128  ;;  %v880_v7 = vld [vmem:[#allocation2 + $0x18] sm:$0x1] }
  0x20   : > { %v6447_v8 = vld [vmem:[%s8673_s4 + $0x18] sm:$0xff]   ;;  %v881_v9 = vsel %vm6883_vm3, 0, %v880_v7 }
  0x21   : > { %882 = vst [vmem:[#allocation2 + $0x18] sm:$0x1] %v881_v9  ;;  %5744 = vmatpush3.bf16.msra.mxu1 %v6447_v8  ;;  %v6468_v7 = vld [vmem:[%s8673_s4 + $0xb8] sm:$0xff]  }
  0x93   : > { %v466_v15 = vpop.trf.xlu0  ;;  %v498_v16 = vpop.trf.xlu1 }
  0x97   : > { %v467_v17 = vpop.trf.xlu0  ;;  %v499_v19 = vpop.trf.xlu1 }
  0x98   : > { %v6797_v18 = vpack.c.bf16 %v467_v17, %v466_v15  ;;  %v6828_v49 = vpack.c.bf16 %v499_v19, %v498_v16  ;;  %v931_v15 = vsel %vm6893_vm5, 0, %v930_v14  ;;  %v927_v16 = vld [vmem:[#allocation2 + $0x14] sm:$0x1]  ;;  %v6449_v17 = vld [vmem:[%s8673_s4 + $0x60] sm:$0xff]   ;;  %v6450_v19 = vld [vmem:[%s8673_s4 + $0xd8] sm:$0xff]  }
  0x99   : > { %932 = vst [vmem:[#allocation2 + $0x20] sm:$0x1] %v931_v15  ;;  %5745 = vmatprep.subr.bf16.mxu1 %v6449_v17  ;;  %v6469_v15 = vld [vmem:[%s8673_s4 + $0x140] sm:$0xff]   ;;  %v892_v17 = vld [vmem:[#allocation2 + $0x48] sm:$0x1] }
  0x9a   : > { %8698 = vst [vmem:[#allocation3_spill] sm:$0xff] %v6797_v18  ;;  %6255 = vmatprep.mubr.msk.bf16.mxu0 %vm546_vm0, %v6797_v18  ;;  %8704 = vst [vmem:[#allocation9_spill] sm:$0xff] %v6828_v49 }
  0x9b   : > { %v468_v20 = vpop.trf.xlu0  ;;  %v500_v21 = vpop.trf.xlu1 }
  0x9f   : > { %v469_v22 = vpop.trf.xlu0  ;;  %v501_v26 = vpop.trf.xlu1 }
  0xa0   : > { %v6804_v24 = vpack.c.bf16 %v469_v22, %v468_v20  ;;  %v6836_v53 = vpack.c.bf16 %v501_v26, %v500_v21  ;;  %v6691_v20 = vmov 0   ;;  %v928_v21 = vsel %vm6893_vm5, 0, %v927_v16  ;;  %v6451_v22 = vld [vmem:[%s8673_s4 + $0x20] sm:$0xff]  }
  0xa1   : > { %866 = vst [vmem:[#allocation2] sm:$0xf] %v6691_v20  ;;  %867 = vst [vmem:[#allocation2 + $0x4] sm:$0xf] %v6691_v20  ;;  %5746 = vmatpush3.bf16.msra.mxu1 %v6451_v22  ;;  %v6454_v26 = vld [vmem:[%s8673_s4 + $0xe0] sm:$0xff]  }
  0xa2   : > { %8699 = vst [vmem:[#allocation4_spill] sm:$0xff] %v6804_v24  ;;  %6256 = vmatmul.mubr.msk.bf16.vlgmr.msra.gmra.mrb[0].mxu0 %vm546_vm0, %v6804_v24  ;;  %8706 = vst [vmem:[#allocation11_spill] sm:$0xff] %v6836_v53  ;;  %v6472_v16 = vld [vmem:[%s8673_s4 + $0x100] sm:$0xff]   ;;  %v942_v22 = vld [vmem:[#allocation2 + $0x50] sm:$0x1] }
  0xa3   : > { %v470_v25 = vpop.trf.xlu0  ;;  %5850 = vmatpush3.bf16.msra.mxu0 %v6440_v23  ;;  %v502_v29 = vpop.trf.xlu1  ;;  %868 = vst [vmem:[#allocation2 + $0x8] sm:$0x1] %v6691_v20  ;;  %870 = vst [vmem:[#allocation2 + $0xcc] sm:$0xf] %v6691_v20  ;;  %v6452_v23 = vld [vmem:[%s8673_s4 + $0x98] sm:$0xff]  }
  0xa4   : > { %5851 = vmatprep.subr.bf16.mxu0 %v6442_v1  ;;  %871 = vst [vmem:[#allocation2 + $0xd0] sm:$0xf] %v6691_v20  ;;  %872 = vst [vmem:[#allocation2 + $0xd4] sm:$0x1] %v6691_v20  ;;  %v933_v1 = vld [vmem:[#allocation2 + $0x2c] sm:$0x1] }
  0xa5   : > { %929 = vst [vmem:[#allocation2 + $0x14] sm:$0x1] %v928_v21  ;;  %v934_v4 = vsel %vm6893_vm5, 0, %v933_v1  ;;  %v889_v20 = vld [vmem:[#allocation2 + $0x3c] sm:$0x1] }
  0xa6   : > { %935 = vst [vmem:[#allocation2 + $0x2c] sm:$0x1] %v934_v4  ;;  %v890_v21 = vsel %vm6883_vm3, 0, %v889_v20  ;;  %v6521_v20 = vld [vmem:[%s8673_s4 + $0x160] sm:$0xff]  }
  0xa7   : > { %v471_v27 = vpop.trf.xlu0  ;;  %v503_v32 = vpop.trf.xlu1  ;;  %5852 = vmatpush3.bf16.msra.mxu0 %v6444_v3  ;;  %v6467_v3 = vld [vmem:[%s8673_s4 + $0xf8] sm:$0xff]   ;;  %891 = vst [vmem:[#allocation2 + $0x3c] sm:$0x1] %v890_v21  ;;  %v6522_v21 = vld [vmem:[%s8673_s4 + $0x120] sm:$0xff]  }
  0xa8   : > { %v6808_v28 = vpack.c.bf16 %v471_v27, %v470_v25  ;;  %v6838_v54 = vpack.c.bf16 %v503_v32, %v502_v29  ;;  %5853 = vmatprep.subr.bf16.mxu0 %v6446_v5  ;;  %v6453_v25 = vld [vmem:[%s8673_s4 + $0x68] sm:$0xff]   ;;  %v6456_v29 = vld [vmem:[%s8673_s4 + $0xa0] sm:$0xff]  }
  0xa9   : > { %v6455_v27 = vld [vmem:[%s8673_s4 + $0x28] sm:$0xff]   ;;  %5747 = vmatprep.subr.bf16.mxu1 %v6453_v25  ;;  %v1555_v8 = vld [vmem:[#allocation2] sm:$0xe]  ;;  %v939_v25 = vld [vmem:[#allocation2 + $0x44] sm:$0x1] }
  0xaa   : > { %6259 = vmatprep.mubr.msk.bf16.mxu0 %vm546_vm0, %v6808_v28  ;;  %8707 = vst [vmem:[#allocation12_spill] sm:$0xff] %v6838_v54  ;;  %5748 = vmatpush3.bf16.msra.mxu1 %v6455_v27  ;;  %v6458_v32 = vld [vmem:[%s8673_s4 + $0xe8] sm:$0xff]  }
  0xab   : > { %v472_v30 = vpop.trf.xlu0  ;;  %v504_v35 = vpop.trf.xlu1  ;;  %5854 = vmatpush3.bf16.msra.mxu0 %v6448_v12  ;;  %v6481_v27 = vld [vmem:[%s8673_s4 + $0x148] sm:$0xff]  }
  0xac   : > { %5855 = vmatprep.subr.bf16.mxu0 %v6450_v19  ;;  %v893_v19 = vsel %vm6883_vm3, 0, %v892_v17 }
  0xad   : > { %894 = vst [vmem:[#allocation2 + $0x48] sm:$0x1] %v893_v19  ;;  %v6519_v19 = vld [vmem:[%s8673_s4 + $0x1c0] sm:$0xff]  }
  0xaf   : > { %v473_v31 = vpop.trf.xlu0  ;;  %v505_v39 = vpop.trf.xlu1  ;;  %5856 = vmatpush3.bf16.msra.mxu0 %v6452_v23  ;;  %v943_v23 = vsel %vm6893_vm5, 0, %v942_v22  ;;  %v922_v22 = vld [vmem:[#allocation2 + $0xc0] sm:$0x1] }
  0xb0   : > { %v6812_v33 = vpack.c.bf16 %v473_v31, %v472_v30  ;;  %v6844_v56 = vpack.c.bf16 %v505_v39, %v504_v35  ;;  %5857 = vmatprep.subr.bf16.mxu0 %v6454_v26  ;;  %v6457_v30 = vld [vmem:[%s8673_s4 + $0x70] sm:$0xff]   ;;  %v1507_v31 = vld [vmem:[#allocation2] sm:$0xf]  ;;  %v6460_v35 = vld [vmem:[%s8673_s4 + $0xa8] sm:$0xff]   ;;  %944 = vst [vmem:[#allocation2 + $0x50] sm:$0x1] %v943_v23 }
  0xb1   : > { %5749 = vmatprep.subr.bf16.mxu1 %v6457_v30  ;;  %v6466_v39 = vld [vmem:[#allocation2 + $0x8] ss:$0 sps:$4 sm:$0x11]   ;;  %v940_v26 = vsel %vm6893_vm5, 0, %v939_v25  ;;  %v898_v30 = vld [vmem:[#allocation2 + $0x60] sm:$0x1] }
  0xb2   : > { %8700 = vst [vmem:[#allocation5_spill] sm:$0xff] %v6812_v33  ;;  %6260 = vmatmul.mubr.msk.bf16.gmra.mrb[4].mxu0 %vm546_vm0, %v6812_v33  ;;  %8708 = vst [vmem:[#allocation13_spill] sm:$0xff] %v6844_v56  ;;  %v2103_v12 = vrot.slane %v6466_v39, 1  ;;  %v923_v23 = vsel %vm6883_vm3, 0, %v922_v22  ;;  %v7050_v25 = vld [vmem:[%s8671_s2] ss:$0 sm:$0xff] }
  0xb3   : > { %v474_v34 = vpop.trf.xlu0  ;;  %v506_v42 = vpop.trf.xlu1  ;;  %5858 = vmatpush3.bf16.msra.mxu0 %v6456_v29  ;;  %941 = vst [vmem:[#allocation2 + $0x44] sm:$0x1] %v940_v26  ;;  %v6484_v29 = vld [vmem:[%s8673_s4 + $0x108] sm:$0xff]   ;;  %924 = vst [vmem:[#allocation2 + $0xc0] sm:$0x1] %v923_v23 }
  0xb4   : > { %5859 = vmatprep.subr.bf16.mxu0 %v6458_v32  ;;  %v895_v32 = vld [vmem:[#allocation2 + $0x54] sm:$0x1] }
  0xb7   : > { %v475_v36 = vpop.trf.xlu0  ;;  %v507_v45 = vpop.trf.xlu1  ;;  %5860 = vmatpush3.bf16.msra.mxu0 %v6460_v35  ;;  %v896_v35 = vsel %vm6883_vm3, 0, %v895_v32 }
  0xb8   : > { %v6816_v37 = vpack.c.bf16 %v475_v36, %v474_v34  ;;  %v6846_v57 = vpack.c.bf16 %v507_v45, %v506_v42  ;;  %v6459_v34 = vld [vmem:[%s8673_s4 + $0x30] sm:$0xff]   ;;  %v1508_v36 = vld [vmem:[#allocation2 + $0x4] sm:$0xf]  ;;  %897 = vst [vmem:[#allocation2 + $0x54] sm:$0x1] %v896_v35 }
  0xb9   : > { %5750 = vmatpush3.bf16.msra.mxu1 %v6459_v34  ;;  %v6462_v42 = vld [vmem:[%s8673_s4 + $0xf0] sm:$0xff]   ;;  %v5467_v9 = vcombine.low %v1555_v8, %v1508_v36  ;;  %v948_v34 = vld [vmem:[#allocation2 + $0x68] sm:$0x1] }
  0xba   : > { %8701 = vst [vmem:[#allocation6_spill] sm:$0xff] %v6816_v37  ;;  %6263 = vmatprep.mubr.msk.bf16.mxu0 %vm546_vm0, %v6816_v37  ;;  %8709 = vst [vmem:[#allocation14_spill] sm:$0xff] %v6846_v57  ;;  %v6464_v45 = vld [vmem:[%s8673_s4 + $0xb0] sm:$0xff]   ;;  %5861 = vmatprep.subr.bf16.mxu0 %v6462_v42  ;;  %v916_v8 = vld [vmem:[#allocation2 + $0xa8] sm:$0x1] }
  0xbb   : > { %v476_v38 = vpop.trf.xlu0  ;;  %v508_v48 = vpop.trf.xlu1  ;;  %5862 = vmatpush3.bf16.msra.mxu0 %v6464_v45  ;;  %v2102_v13 = vrot.slane %v5467_v9, 1  ;;  %v917_v9 = vsel %vm6883_vm3, 0, %v916_v8 }
  0xbc   : > { %5863 = vmatprep.subr.bf16.mxu0 %v6467_v3  ;;  %v957_v3 = vld [vmem:[#allocation2 + $0x8c] sm:$0x1]  ;;  %918 = vst [vmem:[#allocation2 + $0xa8] sm:$0x1] %v917_v9 }
  0xbd   : > { %v6970_v14 = vsel %vm2101_vm7, %v2102_v13, %v2103_v12  ;;  %v958_v4 = vsel %vm6893_vm5, 0, %v957_v3  ;;  %v966_v13 = vld [vmem:[#allocation2 + $0xb0] sm:$0x1]  ;;  %v969_v3 = vld [vmem:[#allocation2 + $0xbc] sm:$0x1] }
  0xbe   : > { %959 = vst [vmem:[#allocation2 + $0x8c] sm:$0x1] %v958_v4  ;;  %v970_v8 = vsel %vm6893_vm5, 0, %v969_v3 }
  0xbf   : > { %v477_v40 = vpop.trf.xlu0  ;;  %v509_v52 = vpop.trf.xlu1  ;;  %5864 = vmatpush3.bf16.msra.mxu0 %v6468_v7  ;;  %v6508_v7 = vld [vmem:[%s8673_s4 + $0x118] sm:$0xff]   ;;  %971 = vst [vmem:[#allocation2 + $0xbc] sm:$0x1] %v970_v8 }
  0xc0   : > { %v6820_v41 = vpack.c.bf16 %v477_v40, %v476_v38  ;;  %v6852_v60 = vpack.c.bf16 %v509_v52, %v508_v48  ;;  %v5435_v38 = vcombine.low %v1507_v31, %v1508_v36  ;;  %v6461_v40 = vld [vmem:[%s8673_s4 + $0x78] sm:$0xff]   ;;  %v883_v52 = vld [vmem:[#allocation2 + $0x24] sm:$0x1]  ;;  %v899_v31 = vsel %vm6883_vm3, 0, %v898_v30  ;;  %6073 = vmatprep.subr.bf16.mxu0 %v6519_v19  ;;  %v1395_v19 = vld [vmem:[#allocation2 + $0xc] sm:$0xf] }
  0xc1   : > { %5751 = vmatprep.subr.bf16.mxu1 %v6461_v40  ;;  %900 = vst [vmem:[#allocation2 + $0x60] sm:$0x1] %v899_v31  ;;  %v949_v36 = vsel %vm6893_vm5, 0, %v948_v34  ;;  %v904_v40 = vld [vmem:[#allocation2 + $0x78] sm:$0x1] }
  0xc2   : > { %8702 = vst [vmem:[#allocation7_spill] sm:$0xff] %v6820_v41  ;;  %6264 = vmatmul.mubr.msk.bf16.gmra.mrb[8].mxu0 %vm546_vm0, %v6820_v41  ;;  %8710 = vst [vmem:[#allocation15_spill] sm:$0xff] %v6852_v60  ;;  %v1848_v48 = vshll.u32 %v5435_v38, 16  ;;  %v905_v42 = vsel %vm6883_vm3, 0, %v904_v40 }
  0xc3   : > { %v478_v43 = vpop.trf.xlu0  ;;  %v510_v55 = vpop.trf.xlu1  ;;  %950 = vst [vmem:[#allocation2 + $0x68] sm:$0x1] %v949_v36  ;;  %906 = vst [vmem:[#allocation2 + $0x78] sm:$0x1] %v905_v42 }
  0xc7   : > { %v479_v44 = vpop.trf.xlu0  ;;  %v511_v58 = vpop.trf.xlu1 }
  0xc8   : > { %v6824_v46 = vpack.c.bf16 %v479_v44, %v478_v43  ;;  %v6854_v61 = vpack.c.bf16 %v511_v58, %v510_v55  ;;  %v886_v43 = vld [vmem:[#allocation2 + $0x30] sm:$0x1]  ;;  %v6463_v44 = vld [vmem:[%s8673_s4 + $0x38] sm:$0xff]   ;;  %v1853_v55 = vshll.u32 %v6466_v39, 16  ;;  %v884_v58 = vsel %vm6883_vm3, 0, %v883_v52 }
  0xc9   : > { %5752 = vmatpush3.bf16.msra.mxu1 %v6463_v44  ;;  %885 = vst [vmem:[#allocation2 + $0x24] sm:$0x1] %v884_v58  ;;  %v954_v44 = vld [vmem:[#allocation2 + $0x80] sm:$0x1]  ;;  %v6496_v52 = vld [vmem:[%s8673_s4 + $0x110] sm:$0xff]  }
  0xca   : > { %8703 = vst [vmem:[#allocation8_spill] sm:$0xff] %v6824_v46  ;;  %6267 = vmatprep.mubr.msk.bf16.mxu0 %vm546_vm0, %v6824_v46  ;;  %8711 = vst [vmem:[#allocation16_spill] sm:$0xff] %v6854_v61  ;;  %v1855_v2 = vrot.slane %v1853_v55, 1  ;;  %5961 = vmatprep.subr.bf16.mxu1 %v6469_v15  ;;  %v910_v58 = vld [vmem:[#allocation2 + $0x90] sm:$0x1]  ;;  %v967_v15 = vsel %vm6893_vm5, 0, %v966_v13 }
  0xcb   : > { %v480_v47 = vpop.trf.xlu0  ;;  %v512_v59 = vpop.trf.xlu1  ;;  %968 = vst [vmem:[#allocation2 + $0xb0] sm:$0x1] %v967_v15 }
  0xcf   : > { %v481_v50 = vpop.trf.xlu0  ;;  %v513_v62 = vpop.trf.xlu1 }
  0xd0   : > { %v6830_v51 = vpack.c.bf16 %v481_v50, %v480_v47  ;;  %v6860_v63 = vpack.c.bf16 %v513_v62, %v512_v59  ;;  %v1846_v47 = vshrl.u32 %v5435_v38, 16  ;;  %v887_v50 = vsel %vm6883_vm3, 0, %v886_v43  ;;  %v936_v59 = vld [vmem:[#allocation2 + $0x38] sm:$0x1]  ;;  %v901_v43 = vld [vmem:[#allocation2 + $0x6c] sm:$0x1] }
  0xd1   : > { %888 = vst [vmem:[#allocation2 + $0x30] sm:$0x1] %v887_v50  ;;  %v1850_v62 = vrot.slane %v1848_v48, 1  ;;  %v937_v0 = vsel %vm6893_vm5, 0, %v936_v59  ;;  %v902_v45 = vsel %vm6883_vm3, 0, %v901_v43  ;;  %v6493_v50 = vld [vmem:[%s8673_s4 + $0x150] sm:$0xff]  }
  0xd2   : > { %8705 = vst [vmem:[#allocation10_spill] sm:$0xff] %v6830_v51  ;;  %6268 = vmatmul.mubr.msk.bf16.gmra.mrb[12].mxu0 %vm546_vm0, %v6830_v51  ;;  %8712 = vst [vmem:[#allocation17_spill] sm:$0xff] %v6860_v63  ;;  %v951_v48 = vld [vmem:[#allocation2 + $0x74] sm:$0x1]  ;;  %v911_v59 = vsel %vm6883_vm3, 0, %v910_v58 }
  0xd3   : > { %6271 = vmatprep.mubr.msk.bf16.mxu0 %vm546_vm0, %v6828_v49  ;;  %938 = vst [vmem:[#allocation2 + $0x38] sm:$0x1] %v937_v0  ;;  %v1851_v5 = vor.u32 %v1850_v62, %v1846_v47  ;;  %v955_v47 = vsel %vm6893_vm5, 0, %v954_v44  ;;  %903 = vst [vmem:[#allocation2 + $0x6c] sm:$0x1] %v902_v45  ;;  %v952_v55 = vsel %vm6893_vm5, 0, %v951_v48 }
  0xd4   : > { %956 = vst [vmem:[#allocation2 + $0x80] sm:$0x1] %v955_v47  ;;  %953 = vst [vmem:[#allocation2 + $0x74] sm:$0x1] %v952_v55  ;;  %v907_v62 = vld [vmem:[#allocation2 + $0x84] sm:$0x1] }
  0xd5   : > { %v1856_v11 = vsel %vm1844_vm6, %v1851_v5, %v1855_v2  ;;  %912 = vst [vmem:[#allocation2 + $0x90] sm:$0x1] %v911_v59  ;;  %v960_v0 = vld [vmem:[#allocation2 + $0x98] sm:$0x1]  ;;  %v908_v1 = vsel %vm6883_vm3, 0, %v907_v62 }
  0xd6   : > { %3702 = vmatprep.mubr.bf16.mxu1 %v1856_v11  ;;  %v961_v2 = vsel %vm6893_vm5, 0, %v960_v0  ;;  %909 = vst [vmem:[#allocation2 + $0x84] sm:$0x1] %v908_v1  ;;  %v6505_v5 = vld [vmem:[%s8673_s4 + $0x158] sm:$0xff]   ;;  %v972_v43 = vld [vmem:[#allocation2 + $0xc8] sm:$0x1] }
  0xd7   : > { %3703 = vmatmul.mubr.bf16.vlgmr.msra.gmra.mrb[0].mxu1 %v5435_v38  ;;  %v945_v38 = vld [vmem:[#allocation2 + $0x5c] sm:$0x1]  ;;  %962 = vst [vmem:[#allocation2 + $0x98] sm:$0x1] %v961_v2  ;;  %v973_v47 = vsel %vm6893_vm5, 0, %v972_v43 }
  0xd8   : > { %5962 = vmatpush3.bf16.msra.mxu1 %v6472_v16  ;;  %v946_v39 = vsel %vm6893_vm5, 0, %v945_v38  ;;  %v913_v11 = vld [vmem:[#allocation2 + $0x9c] sm:$0x1]  ;;  %v963_v16 = vld [vmem:[#allocation2 + $0xa4] sm:$0x1] }
  0xd9   : > { %5963 = vmatprep.subr.bf16.mxu1 %v6481_v27  ;;  %947 = vst [vmem:[#allocation2 + $0x5c] sm:$0x1] %v946_v39  ;;  %v914_v12 = vsel %vm6883_vm3, 0, %v913_v11  ;;  %v964_v17 = vsel %vm6893_vm5, 0, %v963_v16  ;;  %v7055_v27 = vld [vmem:[%s8672_s3] ss:$0 sm:$0xff] }
  0xda   : > { %6272 = vmatmul.mubr.msk.bf16.gmra.mrb[16].mxu0 %vm546_vm0, %v6836_v53  ;;  %915 = vst [vmem:[#allocation2 + $0x9c] sm:$0x1] %v914_v12  ;;  %965 = vst [vmem:[#allocation2 + $0xa4] sm:$0x1] %v964_v17  ;;  %v919_v38 = vld [vmem:[#allocation2 + $0xb4] sm:$0x1] }
  0xdb   : > { %6275 = vmatprep.mubr.msk.bf16.mxu0 %vm546_vm0, %v6838_v54  ;;  %v920_v42 = vsel %vm6883_vm3, 0, %v919_v38  ;;  %974 = vst [vmem:[#allocation2 + $0xc8] sm:$0x1] %v973_v47  ;;  %v1402_v11 = vld [vmem:[#allocation2 + $0x18] sm:$0xf]  ;;  %v6535_v16 = vld [vmem:[%s8673_s4 + $0x168] sm:$0xff]  }
  0xdc   : > { %5964 = vmatpush3.bf16.msra.mxu1 %v6484_v29  ;;  %921 = vst [vmem:[#allocation2 + $0xb4] sm:$0x1] %v920_v42 }
  0xdd   : > { %5965 = vmatprep.subr.bf16.mxu1 %v6493_v50 }
  0xe0   : > { %5966 = vmatpush3.bf16.msra.mxu1 %v6496_v52 }
  0xe1   : > { %5967 = vmatprep.subr.bf16.mxu1 %v6505_v5 }
  0xe2   : > { %6276 = vmatmul.mubr.msk.bf16.gmra.mrb[20].mxu0 %vm546_vm0, %v6844_v56 }
  0xe3   : > { %6279 = vmatprep.mubr.msk.bf16.mxu0 %vm546_vm0, %v6846_v57 }
  0xe4   : > { %5968 = vmatpush3.bf16.msra.mxu1 %v6508_v7 }
  0xe5   : > { %5969 = vmatprep.subr.bf16.mxu1 %v6521_v20 }
  0xe8   : > { %5970 = vmatpush3.bf16.msra.mxu1 %v6522_v21 }
  0xe9   : > { %5971 = vmatprep.subr.bf16.mxu1 %v6535_v16 }
  0xea   : > { %6280 = vmatmul.mubr.msk.bf16.gmra.mrb[24].mxu0 %vm546_vm0, %v6852_v60 }
  0xeb   : > { %6283 = vmatprep.mubr.msk.bf16.mxu0 %vm546_vm0, %v6854_v61 }
  0xec   : > { %5972 = vmatpush3.bf16.msra.mxu1 %v6536_v10 }
  0xf2   : > { %6284 = vmatmul.mubr.msk.bf16.gmra.mrb[28].mxu0 %vm546_vm0, %v6860_v63 }
 0x175   : > { %v6257_v26 = vpop.f32.mrb[0].mxu0 }
 0x176   : > { %v765_v29 = vmul.f32 %v6257_v26, %v7050_v25  ;;  %v629_v30 = vpop.f32.mrb[1].mxu0  ;;  %v1406_v26 = vld [vmem:[#allocation2 + $0x20] sm:$0x1] }
 0x177   : > { %v763_v31 = vmul.f32 %v7050_v25, %v629_v30  ;;  %v6258_v32 = vpop.f32.mrb[2].mxu0 }
 0x178   : > { %v804_v34 = vadd.f32 %v7055_v27, %v765_v29  ;;  %v766_v35 = vmul.f32 %v6258_v32, %v7050_v25  ;;  %v632_v36 = vpop.f32.mrb[3].mxu0 }
 0x179   : > { %v802_v39 = vadd.f32 %v7055_v27, %v763_v31  ;;  %v764_v40 = vmul.f32 %v7050_v25, %v632_v36  ;;  %v1399_v36 = vld [vmem:[#allocation2 + $0x14] sm:$0x1] }
 0x17a   : > { %v836_v44 = vmax.f32 %v804_v34, 0.0  ;;  %v805_v45 = vadd.f32 %v7055_v27, %v766_v35 }
 0x17b   : > { %v834_v48 = vmax.f32 %v802_v39, 0.0  ;;  %v803_v50 = vadd.f32 %v7055_v27, %v764_v40 }
 0x17c   : > { %v5689_v52 = vpack.c.bf16 %v836_v44, %v836_v44  ;;  %v837_v55 = vmax.f32 %v805_v45, 0.0  ;;  %v6549_v44 = vld [vmem:[%s8673_s4 + $0x170] sm:$0xff]  }
 0x17d   : > { %v5687_v58 = vpack.c.bf16 %v834_v48, %v834_v48  ;;  %v835_v59 = vmax.f32 %v803_v50, 0.0  ;;  %5973 = vmatprep.subr.bf16.mxu1 %v6549_v44 }
 0x17e   : > { %v1091_v62 = vshrl.u32 %v5689_v52, 16  ;;  %v5690_v0 = vpack.c.bf16 %v837_v55, %v837_v55  ;;  %v1094_v5 = vshll.u32 %v5689_v52, 16 }
 0x17f   : > { %v1074_v1 = vshrl.u32 %v5687_v58, 16  ;;  %v5688_v2 = vpack.c.bf16 %v835_v59, %v835_v59  ;;  %v1077_v13 = vshll.u32 %v5687_v58, 16 }
 0x180   : > { %v1093_v4 = vrot.slane %v1091_v62, 7  ;;  %v1099_v7 = vshrl.u32 %v5690_v0, 16  ;;  %v1102_v21 = vshll.u32 %v5690_v0, 16 }
 0x181   : > { %v1076_v12 = vrot.slane %v1074_v1, 7  ;;  %v1082_v15 = vshrl.u32 %v5688_v2, 16  ;;  %v1085_v30 = vshll.u32 %v5688_v2, 16  ;;  %v6550_v2 = vld [vmem:[%s8673_s4 + $0x130] sm:$0xff]  }
 0x182   : > { %v1096_v17 = vor.u32 %v1094_v5, %v1093_v4  ;;  %v1101_v20 = vrot.slane %v1099_v7, 7  ;;  %v1097_v31 = vrot.slane %v1093_v4, 4  ;;  %5974 = vmatpush3.bf16.msra.mxu1 %v6550_v2 }
 0x183   : > { %v1079_v22 = vor.u32 %v1077_v13, %v1076_v12  ;;  %v1084_v29 = vrot.slane %v1082_v15, 7  ;;  %v1080_v38 = vrot.slane %v1076_v12, 4 }
 0x184   : > { %v1403_v32 = vsel %vm7072_vm10, %v1096_v17, %v1402_v11  ;;  %v1104_v34 = vor.u32 %v1102_v21, %v1101_v20  ;;  %v1106_v35 = vrot.slane %v1101_v20, 4  ;;  %v1416_v21 = vld [vmem:[#allocation2 + $0x30] sm:$0xf] }
 0x185   : > { %1404 = vst [vmem:[#allocation2 + $0x18] sm:$0xf] %v1403_v32  ;;  %v1396_v39 = vsel %vm7072_vm10, %v1079_v22, %v1395_v19  ;;  %v1087_v40 = vor.u32 %v1085_v30, %v1084_v29  ;;  %v1089_v42 = vrot.slane %v1084_v29, 4  ;;  %v6261_v43 = vpop.f32.mrb[4].mxu0  ;;  %v1409_v32 = vld [vmem:[#allocation2 + $0x24] sm:$0xf] }
 0x186   : > { %1397 = vst [vmem:[#allocation2 + $0xc] sm:$0xf] %v1396_v39  ;;  %v1105_v45 = vsel %vm7084_vm11, %v1097_v31, %v1104_v34  ;;  %v1407_v47 = vsel %vm6883_vm3, %v1106_v35, %v1406_v26  ;;  %v769_v48 = vmul.f32 %v6261_v43, %v7050_v25  ;;  %v645_v50 = vpop.f32.mrb[5].mxu0  ;;  %v6533_v43 = vld [vmem:[%s8673_s4 + $0x1c8] sm:$0xff]  }
 0x187   : > { %1405 = vst [vmem:[#allocation2 + $0x1c] sm:$0xf] %v1105_v45  ;;  %1408 = vst [vmem:[#allocation2 + $0x20] sm:$0x1] %v1407_v47  ;;  %v1088_v52 = vsel %vm7084_vm11, %v1080_v38, %v1087_v40  ;;  %v1400_v55 = vsel %vm6883_vm3, %v1089_v42, %v1399_v36  ;;  %v767_v58 = vmul.f32 %v7050_v25, %v645_v50  ;;  %v6262_v59 = vpop.f32.mrb[6].mxu0  ;;  %v6520_v36 = vld [vmem:[%s8673_s4 + $0x180] sm:$0xff]  }
 0x188   : > { %1398 = vst [vmem:[#allocation2 + $0x10] sm:$0xf] %v1088_v52  ;;  %1401 = vst [vmem:[#allocation2 + $0x14] sm:$0x1] %v1400_v55  ;;  %v808_v62 = vadd.f32 %v7055_v27, %v769_v48  ;;  %v770_v0 = vmul.f32 %v6262_v59, %v7050_v25  ;;  %v648_v1 = vpop.f32.mrb[7].mxu0 }
 0x189   : > { %v806_v3 = vadd.f32 %v7055_v27, %v767_v58  ;;  %v768_v4 = vmul.f32 %v7050_v25, %v648_v1  ;;  %v1420_v48 = vld [vmem:[#allocation2 + $0x38] sm:$0x1]  ;;  %v1413_v50 = vld [vmem:[#allocation2 + $0x2c] sm:$0x1] }
 0x18a   : > { %v840_v5 = vmax.f32 %v808_v62, 0.0  ;;  %v809_v7 = vadd.f32 %v7055_v27, %v770_v0  ;;  %v6534_v0 = vld [vmem:[%s8673_s4 + $0x188] sm:$0xff]  }
 0x18b   : > { %v838_v8 = vmax.f32 %v806_v3, 0.0  ;;  %v807_v11 = vadd.f32 %v7055_v27, %v768_v4 }
 0x18c   : > { %v5693_v12 = vpack.c.bf16 %v840_v5, %v840_v5  ;;  %v841_v13 = vmax.f32 %v809_v7, 0.0  ;;  %v1573_v42 = vld [vmem:[#allocation2 + $0x18] sm:$0xf] }
 0x18d   : > { %v5691_v15 = vpack.c.bf16 %v838_v8, %v838_v8  ;;  %v839_v16 = vmax.f32 %v807_v11, 0.0  ;;  %v1571_v20 = vld [vmem:[#allocation2 + $0xc] sm:$0xf] }
 0x18e   : > { %v1125_v17 = vshrl.u32 %v5693_v12, 16  ;;  %v5694_v19 = vpack.c.bf16 %v841_v13, %v841_v13  ;;  %v1574_v29 = vld [vmem:[#allocation2 + $0x1c] sm:$0xf]  ;;  %v1128_v31 = vshll.u32 %v5693_v12, 16 }
 0x18f   : > { %v1108_v10 = vshrl.u32 %v5691_v15, 16  ;;  %v5692_v22 = vpack.c.bf16 %v839_v16, %v839_v16  ;;  %v1572_v26 = vld [vmem:[#allocation2 + $0x10] sm:$0xf]  ;;  %v1111_v39 = vshll.u32 %v5691_v15, 16  ;;  %v7123_v52 = vcombine.low %v1573_v42, %v1574_v29  ;;  %v7138_v13 = vld [vmem:[#allocation2 + $0x1c] sm:$0xf] }
 0x190   : > { %v1127_v30 = vrot.slane %v1125_v17, 7  ;;  %v1133_v34 = vshrl.u32 %v5694_v19, 16  ;;  %v7114_v35 = vcombine.low %v1571_v20, %v1572_v26  ;;  %v1136_v47 = vshll.u32 %v5694_v19, 16  ;;  %v7126_v62 = vld [vmem:[#allocation2 + $0x14] ss:$0 sps:$4 sm:$0x11]  }
 0x191   : > { %v1110_v38 = vrot.slane %v1108_v10, 7  ;;  %v1116_v40 = vshrl.u32 %v5692_v22, 16  ;;  %v1119_v59 = vshll.u32 %v5692_v22, 16  ;;  %v7134_v5 = vld [vmem:[#allocation2 + $0x10] sm:$0xf] }
 0x192   : > { %v1130_v44 = vor.u32 %v1128_v31, %v1127_v30  ;;  %v1135_v45 = vrot.slane %v1133_v34, 7  ;;  %3863 = vmatprep.mubr.bf16.mxu0 %v7114_v35  ;;  %v1131_v1 = vrot.slane %v1127_v30, 4  ;;  %v6547_v15 = vld [vmem:[%s8673_s4 + $0x1d0] sm:$0xff]   ;;  %v6563_v34 = vld [vmem:[%s8673_s4 + $0x178] sm:$0xff]  }
 0x193   : > { %v1113_v55 = vor.u32 %v1111_v39, %v1110_v38  ;;  %v1118_v58 = vrot.slane %v1116_v40, 7  ;;  %3864 = vmatmul.mubr.bf16.vlgmr.msra.gmra.mrb[32].mxu0 %v6970_v14  ;;  %v1114_v7 = vrot.slane %v1110_v38, 4  ;;  %v6548_v10 = vld [vmem:[%s8673_s4 + $0x190] sm:$0xff]   ;;  %v1865_v40 = vshll.u32 %v7126_v62, 16  ;;  %5975 = vmatprep.subr.bf16.mxu1 %v6563_v34  ;;  %v1430_v34 = vld [vmem:[#allocation2 + $0x48] sm:$0xf] }
 0x194   : > { %v1417_v2 = vsel %vm7072_vm10, %v1130_v44, %v1416_v21  ;;  %v1138_v3 = vor.u32 %v1136_v47, %v1135_v45  ;;  %v1140_v4 = vrot.slane %v1135_v45, 4  ;;  %3871 = vmatprep.mubr.bf16.mxu0 %v7123_v52  ;;  %6074 = vmatpush3.bf16.msra.mxu0 %v6520_v36  ;;  %v1509_v21 = vld [vmem:[#allocation2 + $0xc] sm:$0xf]  ;;  %v6564_v44 = vld [vmem:[%s8673_s4 + $0x138] sm:$0xff]  }
 0x195   : > { %1418 = vst [vmem:[#allocation2 + $0x30] sm:$0xf] %v1417_v2  ;;  %v1410_v14 = vsel %vm7072_vm10, %v1113_v55, %v1409_v32  ;;  %v1121_v8 = vor.u32 %v1119_v59, %v1118_v58  ;;  %v1123_v11 = vrot.slane %v1118_v58, 4  ;;  %v6265_v12 = vpop.f32.mrb[8].mxu0  ;;  %6075 = vmatprep.subr.bf16.mxu0 %v6533_v43  ;;  %v7157_v31 = vcombine.low %v1509_v21, %v7134_v5  ;;  %v1511_v32 = vld [vmem:[#allocation2 + $0x18] sm:$0xf] }
 0x196   : > { %1411 = vst [vmem:[#allocation2 + $0x24] sm:$0xf] %v1410_v14  ;;  %v1139_v16 = vsel %vm7084_vm11, %v1131_v1, %v1138_v3  ;;  %v1421_v17 = vsel %vm6883_vm3, %v1140_v4, %v1420_v48  ;;  %v773_v19 = vmul.f32 %v6265_v12, %v7050_v25  ;;  %v661_v20 = vpop.f32.mrb[9].mxu0  ;;  %v7166_v42 = vcombine.low %v1511_v32, %v7138_v13  ;;  %v7168_v43 = vld [vmem:[#allocation2 + $0x20] ss:$0 sps:$4 sm:$0x11]  }
 0x197   : > { %1419 = vst [vmem:[#allocation2 + $0x34] sm:$0xf] %v1139_v16  ;;  %1422 = vst [vmem:[#allocation2 + $0x38] sm:$0x1] %v1421_v17  ;;  %v1122_v22 = vsel %vm7084_vm11, %v1114_v7, %v1121_v8  ;;  %v1414_v26 = vsel %vm6883_vm3, %v1123_v11, %v1413_v50  ;;  %v771_v29 = vmul.f32 %v7050_v25, %v661_v20  ;;  %v6266_v30 = vpop.f32.mrb[10].mxu0  ;;  %v1858_v48 = vshrl.u32 %v7157_v31, 16 }
 0x198   : > { %1412 = vst [vmem:[#allocation2 + $0x28] sm:$0xf] %v1122_v22  ;;  %1415 = vst [vmem:[#allocation2 + $0x2c] sm:$0x1] %v1414_v26  ;;  %v812_v36 = vadd.f32 %v7055_v27, %v773_v19  ;;  %v774_v38 = vmul.f32 %v6266_v30, %v7050_v25  ;;  %v664_v39 = vpop.f32.mrb[11].mxu0  ;;  %6076 = vmatpush3.bf16.msra.mxu0 %v6534_v0  ;;  %v1860_v50 = vshll.u32 %v7157_v31, 16  ;;  %5976 = vmatpush3.bf16.msra.mxu1 %v6564_v44 }
 0x199   : > { %v810_v45 = vadd.f32 %v7055_v27, %v771_v29  ;;  %v772_v47 = vmul.f32 %v7050_v25, %v664_v39  ;;  %6077 = vmatprep.subr.bf16.mxu0 %v6547_v15  ;;  %v6561_v55 = vld [vmem:[%s8673_s4 + $0x1d8] sm:$0xff]   ;;  %v1867_v0 = vrot.slane %v1865_v40, 1  ;;  %v1870_v1 = vshrl.u32 %v7166_v42, 16  ;;  %v1556_v2 = vld [vmem:[#allocation2 + $0xc] sm:$0xe]  ;;  %v6568_v32 = vld [vmem:[%s8673_s4 + $0x1e0] sm:$0xff]  }
 0x19a   : > { %v844_v58 = vmax.f32 %v812_v36, 0.0  ;;  %v813_v59 = vadd.f32 %v7055_v27, %v774_v38  ;;  %v1862_v7 = vrot.slane %v1860_v50, 1  ;;  %v1872_v14 = vshll.u32 %v7166_v42, 16  ;;  %v6562_v16 = vld [vmem:[%s8673_s4 + $0x198] sm:$0xff]   ;;  %v6571_v50 = vld [vmem:[%s8673_s4 + $0x1a0] sm:$0xff]  }
 0x19b   : > { %v842_v3 = vmax.f32 %v810_v45, 0.0  ;;  %v811_v4 = vadd.f32 %v7055_v27, %v772_v47  ;;  %v1877_v12 = vshll.u32 %v7168_v43, 16  ;;  %v5468_v15 = vcombine.low %v1556_v2, %v7134_v5  ;;  %v1423_v40 = vld [vmem:[#allocation2 + $0x3c] sm:$0xf] }
 0x19c   : > { %v5697_v8 = vpack.c.bf16 %v844_v58, %v844_v58  ;;  %v845_v11 = vmax.f32 %v813_v59, 0.0  ;;  %6078 = vmatpush3.bf16.msra.mxu0 %v6548_v10  ;;  %v1863_v20 = vor.u32 %v1862_v7, %v1858_v48  ;;  %v1874_v21 = vrot.slane %v1872_v14, 1  ;;  %v1434_v58 = vld [vmem:[#allocation2 + $0x50] sm:$0x1]  ;;  %v1427_v14 = vld [vmem:[#allocation2 + $0x44] sm:$0x1] }
 0x19d   : > { %v5695_v17 = vpack.c.bf16 %v842_v3, %v842_v3  ;;  %v843_v19 = vmax.f32 %v811_v4, 0.0  ;;  %6079 = vmatprep.subr.bf16.mxu0 %v6561_v55  ;;  %v1879_v30 = vrot.slane %v1877_v12, 1  ;;  %v2105_v3 = vrot.slane %v5468_v15, 1 }
 0x19e   : > { %v1159_v22 = vshrl.u32 %v5697_v8, 16  ;;  %v1162_v26 = vshll.u32 %v5697_v8, 16  ;;  %v5698_v29 = vpack.c.bf16 %v845_v11, %v845_v11  ;;  %v1868_v38 = vsel %vm1844_vm6, %v1863_v20, %v1867_v0  ;;  %v6572_v8 = vld [vmem:[%s8673_s4 + $0x1e8] sm:$0xff]  }
 0x19f   : > { %v1142_v5 = vshrl.u32 %v5695_v17, 16  ;;  %v1145_v10 = vshll.u32 %v5695_v17, 16  ;;  %v5696_v36 = vpack.c.bf16 %v843_v19, %v843_v19  ;;  %3710 = vmatprep.mubr.bf16.mxu1 %v1868_v38  ;;  %v1875_v47 = vor.u32 %v1874_v21, %v1870_v1  ;;  %v1576_v48 = vld [vmem:[#allocation2 + $0x28] sm:$0xf]  ;;  %v1575_v19 = vld [vmem:[#allocation2 + $0x24] sm:$0xf] }
 0x1a0   : > { %v1161_v39 = vrot.slane %v1159_v22, 7  ;;  %v1167_v44 = vshrl.u32 %v5698_v29, 16  ;;  %v1170_v45 = vshll.u32 %v5698_v29, 16  ;;  %6080 = vmatpush3.bf16.msra.mxu0 %v6562_v16  ;;  %3711 = vmatmul.mubr.bf16.gmra.mrb[4].mxu1 %v7157_v31  ;;  %v2106_v17 = vrot.slane %v7126_v62, 1  ;;  %v1557_v22 = vld [vmem:[#allocation2 + $0x18] sm:$0xe] }
 0x1a1   : > { %v1144_v55 = vrot.slane %v1142_v5, 7  ;;  %v1150_v59 = vshrl.u32 %v5696_v36, 16  ;;  %v1153_v2 = vshll.u32 %v5696_v36, 16  ;;  %6081 = vmatprep.subr.bf16.mxu0 %v6568_v32  ;;  %v1880_v1 = vsel %vm1844_vm6, %v1875_v47, %v1879_v30  ;;  %v1578_v5 = vld [vmem:[#allocation2 + $0x34] sm:$0xf] }
 0x1a2   : > { %v1164_v0 = vor.u32 %v1162_v26, %v1161_v39  ;;  %v1165_v4 = vrot.slane %v1161_v39, 4  ;;  %v1169_v7 = vrot.slane %v1167_v44, 7  ;;  %3718 = vmatprep.mubr.bf16.mxu1 %v1880_v1  ;;  %v7204_v21 = vcombine.low %v1575_v19, %v1576_v48  ;;  %v6573_v26 = vld [vmem:[%s8673_s4 + $0x1a8] sm:$0xff]   ;;  %v7254_v19 = vld [vmem:[#allocation2 + $0x34] sm:$0xf] }
 0x1a3   : > { %v1147_v11 = vor.u32 %v1145_v10, %v1144_v55  ;;  %v1148_v12 = vrot.slane %v1144_v55, 4  ;;  %v1152_v16 = vrot.slane %v1150_v59, 7  ;;  %v2107_v32 = vsel %vm2101_vm7, %v2105_v3, %v2106_v17  ;;  %v6576_v10 = vld [vmem:[%s8673_s4 + $0x1f0] sm:$0xff]   ;;  %v7221_v44 = vld [vmem:[#allocation2 + $0x2c] ss:$0 sps:$4 sm:$0x11]  }
 0x1a4   : > { %v1431_v31 = vsel %vm7072_vm10, %v1164_v0, %v1430_v34  ;;  %v1172_v15 = vor.u32 %v1170_v45, %v1169_v7  ;;  %v1174_v20 = vrot.slane %v1169_v7, 4  ;;  %6082 = vmatpush3.bf16.msra.mxu0 %v6571_v50  ;;  %v5469_v48 = vcombine.low %v1557_v22, %v7138_v13  ;;  %v6582_v59 = vld [vmem:[%s8673_s4 + $0x200] sm:$0xff]   ;;  %v6577_v13 = vld [vmem:[%s8673_s4 + $0x1b0] sm:$0xff]  }
 0x1a5   : > { %1432 = vst [vmem:[#allocation2 + $0x48] sm:$0xf] %v1431_v31  ;;  %v1424_v29 = vsel %vm7072_vm10, %v1147_v11, %v1423_v40  ;;  %v1155_v30 = vor.u32 %v1153_v2, %v1152_v16  ;;  %v1157_v62 = vrot.slane %v1152_v16, 4  ;;  %v6269_v34 = vpop.f32.mrb[12].mxu0  ;;  %6083 = vmatprep.subr.bf16.mxu0 %v6572_v8  ;;  %3872 = vmatmul.mubr.bf16.gmra.mrb[36].mxu0 %v2107_v32  ;;  %v7219_v40 = vld [vmem:[#allocation2 + $0x28] sm:$0xf] }
 0x1a6   : > { %1425 = vst [vmem:[#allocation2 + $0x3c] sm:$0xf] %v1424_v29  ;;  %v1173_v36 = vsel %vm7084_vm11, %v1165_v4, %v1172_v15  ;;  %v1435_v38 = vsel %vm6883_vm3, %v1174_v20, %v1434_v58  ;;  %v677_v39 = vpop.f32.mrb[13].mxu0  ;;  %3879 = vmatprep.mubr.bf16.mxu0 %v7204_v21  ;;  %v2109_v50 = vrot.slane %v7168_v43, 1  ;;  %v1513_v58 = vld [vmem:[#allocation2 + $0x24] sm:$0xf]  ;;  %v777_v2 = vmul.f32 %v6269_v34, %v7050_v25 }
 0x1a7   : > { %1433 = vst [vmem:[#allocation2 + $0x4c] sm:$0xf] %v1173_v36  ;;  %1436 = vst [vmem:[#allocation2 + $0x50] sm:$0x1] %v1435_v38  ;;  %v1156_v45 = vsel %vm7084_vm11, %v1148_v12, %v1155_v30  ;;  %v1428_v47 = vsel %vm6883_vm3, %v1157_v62, %v1427_v14  ;;  %v6270_v55 = vpop.f32.mrb[14].mxu0  ;;  %v775_v3 = vmul.f32 %v7050_v25, %v677_v39  ;;  %v2108_v43 = vrot.slane %v5469_v48, 1 }
 0x1a8   : > { %1426 = vst [vmem:[#allocation2 + $0x40] sm:$0xf] %v1156_v45  ;;  %1429 = vst [vmem:[#allocation2 + $0x44] sm:$0x1] %v1428_v47  ;;  %v680_v0 = vpop.f32.mrb[15].mxu0  ;;  %6084 = vmatpush3.bf16.msra.mxu0 %v6573_v26  ;;  %3719 = vmatmul.mubr.bf16.gmra.mrb[8].mxu1 %v7166_v42  ;;  %v778_v14 = vmul.f32 %v6270_v55, %v7050_v25  ;;  %v7244_v8 = vcombine.low %v1513_v58, %v7219_v40  ;;  %v6580_v11 = vld [vmem:[%s8673_s4 + $0x1f8] sm:$0xff]  }
 0x1a9   : > { %v7235_v4 = vld [vmem:[#allocation2 + $0x38] ss:$0 sps:$4 sm:$0x11]   ;;  %v1577_v7 = vld [vmem:[#allocation2 + $0x30] sm:$0xf]  ;;  %v776_v1 = vmul.f32 %v7050_v25, %v680_v0  ;;  %6085 = vmatprep.subr.bf16.mxu0 %v6576_v10  ;;  %v816_v16 = vadd.f32 %v7055_v27, %v777_v2  ;;  %v814_v42 = vadd.f32 %v7055_v27, %v775_v3  ;;  %v1889_v17 = vshll.u32 %v7221_v44, 16  ;;  %6287 = vmatprep.subr.bf16.mxu1 %v6582_v59 }
 0x1aa   : > { %v7249_v12 = vcombine.low %v1577_v7, %v1578_v5  ;;  %v2110_v31 = vsel %vm2101_vm7, %v2108_v43, %v2109_v50  ;;  %v817_v15 = vadd.f32 %v7055_v27, %v778_v14  ;;  %v1882_v22 = vshrl.u32 %v7244_v8, 16  ;;  %v1515_v26 = vld [vmem:[#allocation2 + $0x30] sm:$0xf]  ;;  %v6581_v5 = vld [vmem:[%s8673_s4 + $0x1b8] sm:$0xff]   ;;  %v1558_v39 = vld [vmem:[#allocation2 + $0x24] sm:$0xe] }
 0x1ab   : > { %v815_v20 = vadd.f32 %v7055_v27, %v776_v1  ;;  %v848_v29 = vmax.f32 %v816_v16, 0.0  ;;  %v846_v30 = vmax.f32 %v814_v42, 0.0  ;;  %v1884_v62 = vshll.u32 %v7244_v8, 16  ;;  %v1444_v16 = vld [vmem:[#allocation2 + $0x60] sm:$0xf] }
 0x1ac   : > { %v1891_v32 = vrot.slane %v1889_v17, 1  ;;  %6086 = vmatpush3.bf16.msra.mxu0 %v6577_v13  ;;  %v849_v34 = vmax.f32 %v817_v15, 0.0  ;;  %v7265_v36 = vcombine.low %v1515_v26, %v7254_v19  ;;  %v1901_v38 = vshll.u32 %v7235_v4, 16  ;;  %v1437_v26 = vld [vmem:[#allocation2 + $0x54] sm:$0xf] }
 0x1ad   : > { %v847_v10 = vmax.f32 %v815_v20, 0.0  ;;  %v7268_v45 = vpop.f32.mrb[16].mxu0  ;;  %6087 = vmatprep.subr.bf16.mxu0 %v6580_v11  ;;  %3880 = vmatmul.mubr.bf16.gmra.mrb[40].mxu0 %v2110_v31  ;;  %v5701_v47 = vpack.c.bf16 %v848_v29, %v848_v29  ;;  %v5699_v48 = vpack.c.bf16 %v846_v30, %v846_v30  ;;  %v1886_v50 = vrot.slane %v1884_v62, 1 }
 0x1ae   : > { %v5470_v55 = vcombine.low %v1558_v39, %v7219_v40  ;;  %v693_v58 = vpop.f32.mrb[17].mxu0  ;;  %3887 = vmatprep.mubr.bf16.mxu0 %v7249_v12  ;;  %v5702_v59 = vpack.c.bf16 %v849_v34, %v849_v34  ;;  %v1894_v3 = vshrl.u32 %v7265_v36, 16  ;;  %v1896_v0 = vshll.u32 %v7265_v36, 16  ;;  %v1448_v34 = vld [vmem:[#allocation2 + $0x68] sm:$0x1] }
 0x1af   : > { %v5700_v2 = vpack.c.bf16 %v847_v10, %v847_v10  ;;  %v6274_v13 = vpop.f32.mrb[18].mxu0  ;;  %v1193_v43 = vshrl.u32 %v5701_v47, 16  ;;  %v1196_v7 = vshll.u32 %v5701_v47, 16  ;;  %v1176_v14 = vshrl.u32 %v5699_v48, 16 }
 0x1b0   : > { %v1179_v1 = vshll.u32 %v5699_v48, 16  ;;  %v696_v11 = vpop.f32.mrb[19].mxu0  ;;  %6088 = vmatpush3.bf16.msra.mxu0 %v6581_v5  ;;  %v1201_v42 = vshrl.u32 %v5702_v59, 16  ;;  %v1204_v17 = vshll.u32 %v5702_v59, 16  ;;  %v1887_v29 = vor.u32 %v1886_v50, %v1882_v22  ;;  %v1441_v5 = vld [vmem:[#allocation2 + $0x5c] sm:$0x1] }
 0x1b1   : > { %v1184_v40 = vshrl.u32 %v5700_v2, 16  ;;  %v1187_v31 = vshll.u32 %v5700_v2, 16  ;;  %v1195_v15 = vrot.slane %v1193_v43, 7  ;;  %v1178_v20 = vrot.slane %v1176_v14, 7 }
 0x1b2   : > { %v1898_v30 = vrot.slane %v1896_v0, 1  ;;  %v1203_v62 = vrot.slane %v1201_v42, 7  ;;  %v1903_v39 = vrot.slane %v1901_v38, 1  ;;  %v2111_v24 = vrot.slane %v5470_v55, 1  ;;  %v1580_v0 = vld [vmem:[#allocation2 + $0x40] sm:$0xf] }
 0x1b3   : > { %v1186_v10 = vrot.slane %v1184_v40, 7  ;;  %v1198_v47 = vor.u32 %v1196_v7, %v1195_v15  ;;  %v1199_v18 = vrot.slane %v1195_v15, 4  ;;  %v1181_v48 = vor.u32 %v1179_v1, %v1178_v20 }
 0x1b4   : > { %v1182_v63 = vrot.slane %v1178_v20, 4  ;;  %v1206_v61 = vor.u32 %v1204_v17, %v1203_v62  ;;  %v1208_v60 = vrot.slane %v1203_v62, 4  ;;  %v1892_v38 = vsel %vm1844_vm6, %v1887_v29, %v1891_v32  ;;  %v1517_v29 = vld [vmem:[#allocation2 + $0x3c] sm:$0xf] }
 0x1b5   : > { %v1189_v59 = vor.u32 %v1187_v31, %v1186_v10  ;;  %v1191_v57 = vrot.slane %v1186_v10, 4  ;;  %v7274_v2 = vpop.f32.mrb[20].mxu0  ;;  %v1445_v22 = vsel %vm7072_vm10, %v1198_v47, %v1444_v16  ;;  %v1438_v50 = vsel %vm7072_vm10, %v1181_v48, %v1437_v26  ;;  %3726 = vmatprep.mubr.bf16.mxu1 %v1892_v38  ;;  %v1582_v26 = vld [vmem:[#allocation2 + $0x4c] sm:$0xf] }
 0x1b6   : > { %v1899_v55 = vor.u32 %v1898_v30, %v1894_v3  ;;  %v7281_v43 = vpop.f32.mrb[21].mxu0  ;;  %1446 = vst [vmem:[#allocation2 + $0x60] sm:$0xf] %v1445_v22  ;;  %1439 = vst [vmem:[#allocation2 + $0x54] sm:$0xf] %v1438_v50  ;;  %v1207_v7 = vsel %vm7084_vm11, %v1199_v18, %v1206_v61  ;;  %v1449_v14 = vsel %vm6883_vm3, %v1208_v60, %v1448_v34  ;;  %3727 = vmatmul.mubr.bf16.gmra.mrb[12].mxu1 %v7244_v8 }
 0x1b7   : > { %v1190_v1 = vsel %vm7084_vm11, %v1182_v63, %v1189_v59  ;;  %v1442_v16 = vsel %vm6883_vm3, %v1191_v57, %v1441_v5  ;;  %v7291_v32 = vpop.f32.mrb[22].mxu0  ;;  %1447 = vst [vmem:[#allocation2 + $0x64] sm:$0xf] %v1207_v7  ;;  %1450 = vst [vmem:[#allocation2 + $0x68] sm:$0x1] %v1449_v14  ;;  %v2112_v61 = vrot.slane %v7221_v44, 1  ;;  %v781_v60 = vmul.f32 %v7268_v45, %v7050_v25 }
 0x1b8   : > { %1440 = vst [vmem:[#allocation2 + $0x58] sm:$0xf] %v1190_v1  ;;  %1443 = vst [vmem:[#allocation2 + $0x5c] sm:$0x1] %v1442_v16  ;;  %v1904_v18 = vsel %vm1844_vm6, %v1899_v55, %v1903_v39  ;;  %v779_v63 = vmul.f32 %v7050_v25, %v693_v58  ;;  %v1579_v3 = vld [vmem:[#allocation2 + $0x3c] sm:$0xf]  ;;  %v782_v42 = vmul.f32 %v6274_v13, %v7050_v25 }
 0x1b9   : > { %v7299_v57 = vpop.f32.mrb[23].mxu0  ;;  %3734 = vmatprep.mubr.bf16.mxu1 %v1904_v18  ;;  %v780_v17 = vmul.f32 %v7050_v25, %v696_v11  ;;  %v7303_v40 = vcombine.low %v1579_v3, %v1580_v0  ;;  %v1559_v8 = vld [vmem:[#allocation2 + $0x30] sm:$0xe]  ;;  %v2113_v31 = vsel %vm2101_vm7, %v2111_v24, %v2112_v61  ;;  %v820_v44 = vadd.f32 %v7055_v27, %v781_v60  ;;  %v7309_v58 = vld [vmem:[#allocation2 + $0x40] sm:$0xf] }
 0x1ba   : > { %v818_v15 = vadd.f32 %v7055_v27, %v779_v63  ;;  %v5471_v45 = vcombine.low %v1559_v8, %v7254_v19  ;;  %3888 = vmatmul.mubr.bf16.gmra.mrb[44].mxu0 %v2113_v31  ;;  %v821_v20 = vadd.f32 %v7055_v27, %v782_v42  ;;  %v2115_v11 = vrot.slane %v7235_v4, 1  ;;  %v1581_v39 = vld [vmem:[#allocation2 + $0x48] sm:$0xf]  ;;  %v7323_v22 = vld [vmem:[#allocation2 + $0x44] ss:$0 sps:$4 sm:$0x11]  }
 0x1bb   : > { %v819_v13 = vadd.f32 %v7055_v27, %v780_v17  ;;  %v852_v30 = vmax.f32 %v820_v44, 0.0  ;;  %3895 = vmatprep.mubr.bf16.mxu0 %v7303_v40  ;;  %v7316_v19 = vcombine.low %v1517_v29, %v7309_v58  ;;  %v7321_v4 = vcombine.low %v1581_v39, %v1582_v26  ;;  %v1458_v61 = vld [vmem:[#allocation2 + $0x78] sm:$0xf]  ;;  %v1451_v31 = vld [vmem:[#allocation2 + $0x6c] sm:$0xf] }
 0x1bc   : > { %v850_v62 = vmax.f32 %v818_v15, 0.0  ;;  %v2114_v24 = vrot.slane %v5471_v45, 1  ;;  %v853_v34 = vmax.f32 %v821_v20, 0.0  ;;  %v1913_v15 = vshll.u32 %v7323_v22, 16  ;;  %v1462_v20 = vld [vmem:[#allocation2 + $0x80] sm:$0x1] }
 0x1bd   : > { %v851_v10 = vmax.f32 %v819_v13, 0.0  ;;  %v7318_v47 = vpop.f32.mrb[24].mxu0  ;;  %v5705_v48 = vpack.c.bf16 %v852_v30, %v852_v30  ;;  %v1906_v0 = vshrl.u32 %v7316_v19, 16  ;;  %v1908_v7 = vshll.u32 %v7316_v19, 16 }
 0x1be   : > { %v5703_v5 = vpack.c.bf16 %v850_v62, %v850_v62  ;;  %v2116_v59 = vsel %vm2101_vm7, %v2114_v24, %v2115_v11  ;;  %v7325_v50 = vpop.f32.mrb[25].mxu0  ;;  %v5706_v38 = vpack.c.bf16 %v853_v34, %v853_v34  ;;  %3735 = vmatmul.mubr.bf16.gmra.mrb[16].mxu1 %v7265_v36  ;;  %v785_v11 = vmul.f32 %v7274_v2, %v7050_v25  ;;  %v1455_v24 = vld [vmem:[#allocation2 + $0x74] sm:$0x1] }
 0x1bf   : > { %v5704_v55 = vpack.c.bf16 %v851_v10, %v851_v10  ;;  %v1227_v14 = vshrl.u32 %v5705_v48, 16  ;;  %v1230_v1 = vshll.u32 %v5705_v48, 16  ;;  %v1910_v44 = vrot.slane %v1908_v7, 1  ;;  %v7336_v34 = vpop.f32.mrb[26].mxu0 }
 0x1c0   : > { %v1210_v16 = vshrl.u32 %v5703_v5, 16  ;;  %v1213_v18 = vshll.u32 %v5703_v5, 16  ;;  %v1235_v60 = vshrl.u32 %v5706_v38, 16  ;;  %v1238_v63 = vshll.u32 %v5706_v38, 16 }
 0x1c1   : > { %v1218_v3 = vshrl.u32 %v5704_v55, 16  ;;  %v1221_v42 = vshll.u32 %v5704_v55, 16  ;;  %v1229_v17 = vrot.slane %v1227_v14, 7  ;;  %v783_v36 = vmul.f32 %v7050_v25, %v7281_v43  ;;  %v6600_v53 = vld [vmem:[#allocation2 + $0x5c] ss:$0 sps:$4 sm:$0x11]  }
 0x1c2   : > { %v1212_v8 = vrot.slane %v1210_v16, 7  ;;  %v1237_v45 = vrot.slane %v1235_v60, 7  ;;  %3896 = vmatmul.mubr.bf16.gmra.mrb[48].mxu0 %v2116_v59  ;;  %v7338_v59 = vld [vmem:[#allocation2 + $0x4c] sm:$0xf]  ;;  %v1911_v38 = vor.u32 %v1910_v44, %v1906_v0  ;;  %v1915_v55 = vrot.slane %v1913_v15, 1  ;;  %v7354_v60 = vpop.f32.mrb[27].mxu0 }
 0x1c3   : > { %v1220_v13 = vrot.slane %v1218_v3, 7  ;;  %v1232_v26 = vor.u32 %v1230_v1, %v1229_v17  ;;  %v1233_v29 = vrot.slane %v1229_v17, 4  ;;  %3903 = vmatprep.mubr.bf16.mxu0 %v7321_v4  ;;  %v822_v3 = vadd.f32 %v7055_v27, %v783_v36  ;;  %v1560_v17 = vld [vmem:[#allocation2 + $0x3c] sm:$0xe] }
 0x1c4   : > { %v1215_v30 = vor.u32 %v1213_v18, %v1212_v8  ;;  %v1216_v62 = vrot.slane %v1212_v8, 4  ;;  %v1240_v10 = vor.u32 %v1238_v63, %v1237_v45  ;;  %v1242_v39 = vrot.slane %v1237_v45, 4  ;;  %v1519_v18 = vld [vmem:[#allocation2 + $0x48] sm:$0xf]  ;;  %v1584_v45 = vld [vmem:[#allocation2 + $0x58] sm:$0xf] }
 0x1c5   : > { %v1223_v48 = vor.u32 %v1221_v42, %v1220_v13  ;;  %v1225_v5 = vrot.slane %v1220_v13, 4  ;;  %v1459_v2 = vsel %vm7072_vm10, %v1232_v26, %v1458_v61  ;;  %v7352_v61 = vld [vmem:[#allocation2 + $0x50] ss:$0 sps:$4 sm:$0x11]   ;;  %v1916_v0 = vsel %vm1844_vm6, %v1911_v38, %v1915_v55  ;;  %v7360_v8 = vpop.f32.mrb[28].mxu0 }
 0x1c6   : > { %v1452_v43 = vsel %vm7072_vm10, %v1215_v30, %v1451_v31  ;;  %1460 = vst [vmem:[#allocation2 + $0x78] sm:$0xf] %v1459_v2  ;;  %v1241_v7 = vsel %vm7084_vm11, %v1233_v29, %v1240_v10  ;;  %v1463_v14 = vsel %vm6883_vm3, %v1242_v39, %v1462_v20  ;;  %v824_v63 = vadd.f32 %v7055_v27, %v785_v11  ;;  %v7366_v20 = vpop.f32.mrb[29].mxu0 }
 0x1c7   : > { %1453 = vst [vmem:[#allocation2 + $0x6c] sm:$0xf] %v1452_v43  ;;  %v1224_v1 = vsel %vm7084_vm11, %v1216_v62, %v1223_v48  ;;  %v1456_v16 = vsel %vm6883_vm3, %v1225_v5, %v1455_v24  ;;  %1461 = vst [vmem:[#allocation2 + $0x7c] sm:$0xf] %v1241_v7  ;;  %v5441_v42 = vcombine.low %v1519_v18, %v7338_v59  ;;  %3742 = vmatprep.mubr.bf16.mxu1 %v1916_v0  ;;  %v7369_v26 = vpop.f32.mrb[30].mxu0 }
 0x1c8   : > { %1464 = vst [vmem:[#allocation2 + $0x80] sm:$0x1] %v1463_v14  ;;  %1454 = vst [vmem:[#allocation2 + $0x70] sm:$0xf] %v1224_v1  ;;  %v5472_v31 = vcombine.low %v1560_v17, %v7309_v58  ;;  %v2118_v44 = vrot.slane %v7323_v22, 1  ;;  %v786_v15 = vmul.f32 %v7291_v32, %v7050_v25  ;;  %v856_v13 = vmax.f32 %v824_v63, 0.0  ;;  %3743 = vmatmul.mubr.bf16.gmra.mrb[20].mxu1 %v7316_v19 }
 0x1c9   : > { %1457 = vst [vmem:[#allocation2 + $0x74] sm:$0x1] %v1456_v16  ;;  %v854_v11 = vmax.f32 %v822_v3, 0.0  ;;  %v1920_v36 = vshll.u32 %v5441_v42, 16  ;;  %v1925_v29 = vshll.u32 %v7352_v61, 16  ;;  %v784_v22 = vmul.f32 %v7050_v25, %v7299_v57  ;;  %v7375_v32 = vpop.f32.mrb[31].mxu0 }
 0x1ca   : > { %v2117_v30 = vrot.slane %v5472_v31, 1  ;;  %v825_v58 = vadd.f32 %v7055_v27, %v786_v15  ;;  %v1583_v62 = vld [vmem:[#allocation2 + $0x54] sm:$0xf]  ;;  %v5709_v24 = vpack.c.bf16 %v856_v13, %v856_v13  ;;  %v1918_v19 = vshrl.u32 %v5441_v42, 16  ;;  %v1472_v25 = vld [vmem:[#allocation2 + $0x90] sm:$0xf] }
 0x1cb   : > { %v5707_v10 = vpack.c.bf16 %v854_v11, %v854_v11  ;;  %v1922_v39 = vrot.slane %v1920_v36, 1  ;;  %v7377_v48 = vcombine.low %v1583_v62, %v1584_v45  ;;  %v823_v43 = vadd.f32 %v7055_v27, %v784_v22  ;;  %v1561_v0 = vld [vmem:[#allocation2 + $0x48] sm:$0xe]  ;;  %v1465_v17 = vld [vmem:[#allocation2 + $0x84] sm:$0xf] }
 0x1cc   : > { %v2119_v5 = vsel %vm2101_vm7, %v2117_v30, %v2118_v44  ;;  %v857_v2 = vmax.f32 %v825_v58, 0.0  ;;  %v1261_v38 = vshrl.u32 %v5709_v24, 16  ;;  %v1264_v55 = vshll.u32 %v5709_v24, 16  ;;  %v1586_v11 = vld [vmem:[#allocation2 + $0x64] sm:$0xf] }
 0x1cd   : > { %v1244_v7 = vshrl.u32 %v5707_v10, 16  ;;  %v1247_v14 = vshll.u32 %v5707_v10, 16  ;;  %3904 = vmatmul.mubr.bf16.gmra.mrb[52].mxu0 %v2119_v5  ;;  %v1923_v57 = vor.u32 %v1922_v39, %v1918_v19  ;;  %v1927_v1 = vrot.slane %v1925_v29, 1  ;;  %v1585_v58 = vld [vmem:[#allocation2 + $0x60] sm:$0xf] }
 0x1ce   : > { %v5710_v16 = vpack.c.bf16 %v857_v2, %v857_v2  ;;  %v855_v18 = vmax.f32 %v823_v43, 0.0  ;;  %3911 = vmatprep.mubr.bf16.mxu0 %v7377_v48  ;;  %v1263_v63 = vrot.slane %v1261_v38, 7  ;;  %v5473_v31 = vcombine.low %v1561_v0, %v7338_v59  ;;  %v7385_v22 = vld [vmem:[#allocation2 + $0x5c] ss:$0 sps:$4 sm:$0x11]  }
 0x1cf   : > { %v1246_v3 = vrot.slane %v1244_v7, 7  ;;  %v2121_v27 = vrot.slane %v7352_v61, 1  ;;  %v1928_v44 = vsel %vm1844_vm6, %v1923_v57, %v1927_v1  ;;  %v1522_v39 = vld [vmem:[#allocation2 + $0x58] sm:$0xf]  ;;  %v7391_v43 = vcombine.low %v1585_v58, %v1586_v11  ;;  %v1469_v57 = vld [vmem:[#allocation2 + $0x8c] sm:$0x1] }
 0x1d0   : > { %v1269_v15 = vshrl.u32 %v5710_v16, 16  ;;  %v1272_v45 = vshll.u32 %v5710_v16, 16  ;;  %v5708_v13 = vpack.c.bf16 %v855_v18, %v855_v18  ;;  %v1266_v36 = vor.u32 %v1264_v55, %v1263_v63  ;;  %3750 = vmatprep.mubr.bf16.mxu1 %v1928_v44  ;;  %v1476_v2 = vld [vmem:[#allocation2 + $0x98] sm:$0x1]  ;;  %v7398_v16 = vld [vmem:[%s8671_s2] ss:$0 sm:$0xff] }
 0x1d1   : > { %v1267_v29 = vrot.slane %v1263_v63, 4  ;;  %v1249_v30 = vor.u32 %v1247_v14, %v1246_v3  ;;  %3751 = vmatmul.mubr.bf16.gmra.mrb[24].mxu1 %v5441_v42  ;;  %v2120_v59 = vrot.slane %v5473_v31, 1  ;;  %v1250_v19 = vrot.slane %v1246_v3, 4  ;;  %v1521_v42 = vld [vmem:[#allocation2 + $0x54] sm:$0xf] }
 0x1d2   : > { %v1271_v62 = vrot.slane %v1269_v15, 7  ;;  %v1252_v24 = vshrl.u32 %v5708_v13, 16  ;;  %v1255_v10 = vshll.u32 %v5708_v13, 16  ;;  %v1473_v61 = vsel %vm7072_vm10, %v1266_v36, %v1472_v25  ;;  %v7402_v0 = vld [vmem:[#allocation2 + $0x64] sm:$0xf] }
 0x1d3   : > { %v1466_v5 = vsel %vm7072_vm10, %v1249_v30, %v1465_v17  ;;  %1474 = vst [vmem:[#allocation2 + $0x90] sm:$0xf] %v1473_v61  ;;  %v2122_v14 = vsel %vm2101_vm7, %v2120_v59, %v2121_v27  ;;  %v5442_v1 = vcombine.low %v1521_v42, %v1522_v39  ;;  %v1937_v25 = vshll.u32 %v7385_v22, 16  ;;  %v7409_v27 = vld [vmem:[#allocation2 + $0x68] ss:$0 sps:$4 sm:$0x11]  }
 0x1d4   : > { %1467 = vst [vmem:[#allocation2 + $0x84] sm:$0xf] %v1466_v5  ;;  %v1274_v38 = vor.u32 %v1272_v45, %v1271_v62  ;;  %v1276_v55 = vrot.slane %v1271_v62, 4  ;;  %v1254_v7 = vrot.slane %v1252_v24, 7  ;;  %v789_v18 = vmul.f32 %v7398_v16, %v7318_v47  ;;  %v7414_v47 = vld [vmem:[%s8672_s3] ss:$0 sm:$0xff] }
 0x1d5   : > { %3912 = vmatmul.mubr.bf16.gmra.mrb[56].mxu0 %v2122_v14  ;;  %v1930_v44 = vshrl.u32 %v5442_v1, 16  ;;  %v1932_v15 = vshll.u32 %v5442_v1, 16  ;;  %v1523_v13 = vld [vmem:[#allocation2 + $0x60] sm:$0xf]  ;;  %v1562_v11 = vld [vmem:[#allocation2 + $0x54] sm:$0xe]  ;;  %v787_v30 = vmul.f32 %v7398_v16, %v7325_v50 }
 0x1d6   : > { %v1275_v63 = vsel %vm7084_vm11, %v1267_v29, %v1274_v38  ;;  %v1477_v3 = vsel %vm6883_vm3, %v1276_v55, %v1476_v2  ;;  %v1257_v17 = vor.u32 %v1255_v10, %v1254_v7  ;;  %v1259_v31 = vrot.slane %v1254_v7, 4  ;;  %3919 = vmatprep.mubr.bf16.mxu0 %v7391_v43  ;;  %v1587_v62 = vld [vmem:[#allocation2 + $0x6c] sm:$0xf]  ;;  %v7426_v5 = vld [vmem:[#allocation2 + $0x70] sm:$0xf] }
 0x1d7   : > { %1475 = vst [vmem:[#allocation2 + $0x94] sm:$0xf] %v1275_v63  ;;  %1478 = vst [vmem:[#allocation2 + $0x98] sm:$0x1] %v1477_v3  ;;  %v828_v45 = vadd.f32 %v7414_v47, %v789_v18  ;;  %v7424_v58 = vcombine.low %v1523_v13, %v7402_v0  ;;  %v1934_v24 = vrot.slane %v1932_v15, 1  ;;  %v1939_v10 = vrot.slane %v1937_v25, 1 }
 0x1d8   : > { %v1258_v36 = vsel %vm7084_vm11, %v1250_v19, %v1257_v17  ;;  %v1470_v29 = vsel %vm6883_vm3, %v1259_v31, %v1469_v57  ;;  %v5474_v61 = vcombine.low %v1562_v11, %v1522_v39  ;;  %v826_v19 = vadd.f32 %v7414_v47, %v787_v30  ;;  %v1525_v63 = vld [vmem:[#allocation2 + $0x6c] sm:$0xf]  ;;  %v7438_v3 = vld [vmem:[#allocation2 + $0x70] sm:$0xf]  ;;  %v7772_v41 = vld [vmem:[#allocation2 + $0x7c] sm:$0xf] }
 0x1d9   : > { %1468 = vst [vmem:[#allocation2 + $0x88] sm:$0xf] %v1258_v36  ;;  %1471 = vst [vmem:[#allocation2 + $0x8c] sm:$0x1] %v1470_v29  ;;  %v860_v59 = vmax.f32 %v828_v45, 0.0  ;;  %v1944_v2 = vshll.u32 %v7424_v58, 16  ;;  %v1935_v55 = vor.u32 %v1934_v24, %v1930_v44  ;;  %v790_v39 = vmul.f32 %v7398_v16, %v7336_v34 }
 0x1da   : > { %v1949_v38 = vshll.u32 %v7409_v27, 16  ;;  %v2124_v50 = vrot.slane %v7385_v22, 1  ;;  %v1942_v14 = vshrl.u32 %v7424_v58, 16  ;;  %v2123_v42 = vrot.slane %v5474_v61, 1 }
 0x1db   : > { %v5713_v7 = vpack.c.bf16 %v860_v59, %v860_v59  ;;  %v858_v57 = vmax.f32 %v826_v19, 0.0  ;;  %v1946_v18 = vrot.slane %v1944_v2, 1  ;;  %v7436_v25 = vcombine.low %v1587_v62, %v7426_v5  ;;  %v7443_v34 = vld [vmem:[#allocation2 + $0x74] ss:$0 sps:$4 sm:$0x11]  }
 0x1dc   : > { %v1940_v17 = vsel %vm1844_vm6, %v1935_v55, %v1939_v10  ;;  %v2125_v44 = vsel %vm2101_vm7, %v2123_v42, %v2124_v50  ;;  %v1951_v13 = vrot.slane %v1949_v38, 1  ;;  %v829_v11 = vadd.f32 %v7414_v47, %v790_v39  ;;  %v1486_v62 = vld [vmem:[#allocation2 + $0xa8] sm:$0xf]  ;;  %v1479_v2 = vld [vmem:[#allocation2 + $0x9c] sm:$0xf] }
 0x1dd   : > { %v1295_v31 = vshrl.u32 %v5713_v7, 16  ;;  %v1298_v22 = vshll.u32 %v5713_v7, 16  ;;  %3758 = vmatprep.mubr.bf16.mxu1 %v1940_v17  ;;  %v5711_v15 = vpack.c.bf16 %v858_v57, %v858_v57  ;;  %v1947_v45 = vor.u32 %v1946_v18, %v1942_v14  ;;  %3920 = vmatmul.mubr.bf16.gmra.mrb[60].mxu0 %v2125_v44  ;;  %v1563_v7 = vld [vmem:[#allocation2 + $0x60] sm:$0xe]  ;;  %v1589_v39 = vld [vmem:[#allocation2 + $0x78] sm:$0xf] }
 0x1de   : > { %3759 = vmatmul.mubr.bf16.gmra.mrb[28].mxu1 %v5442_v1  ;;  %3927 = vmatprep.mubr.bf16.mxu0 %v7436_v25  ;;  %v788_v29 = vmul.f32 %v7398_v16, %v7354_v60  ;;  %v7449_v30 = vcombine.low %v1525_v63, %v7438_v3  ;;  %v861_v61 = vmax.f32 %v829_v11, 0.0  ;;  %v1961_v60 = vshll.u32 %v7443_v34, 16  ;;  %v7461_v63 = vld [vmem:[#allocation2 + $0x7c] sm:$0xf] }
 0x1df   : > { %v1297_v36 = vrot.slane %v1295_v31, 7  ;;  %v1278_v24 = vshrl.u32 %v5711_v15, 16  ;;  %v1281_v10 = vshll.u32 %v5711_v15, 16  ;;  %v1952_v59 = vsel %vm1844_vm6, %v1947_v45, %v1951_v13  ;;  %v1527_v15 = vld [vmem:[#allocation2 + $0x78] sm:$0xf] }
 0x1e0   : > { %3766 = vmatprep.mubr.bf16.mxu1 %v1952_v59  ;;  %v827_v38 = vadd.f32 %v7414_v47, %v788_v29  ;;  %v5714_v50 = vpack.c.bf16 %v861_v61, %v861_v61  ;;  %v1956_v55 = vshll.u32 %v7449_v30, 16  ;;  %v5475_v57 = vcombine.low %v1563_v7, %v7402_v0  ;;  %v7472_v59 = vld [vmem:[#allocation2 + $0x7c] sm:$0xf] }
 0x1e1   : > { %v1300_v19 = vor.u32 %v1298_v22, %v1297_v36  ;;  %v7453_v1 = vrot.slane %v1278_v24, 7  ;;  %v2127_v18 = vrot.slane %v7409_v27, 1  ;;  %v1301_v17 = vrot.slane %v1297_v36, 4 }
 0x1e2   : > { %v859_v42 = vmax.f32 %v827_v38, 0.0  ;;  %v1303_v22 = vshrl.u32 %v5714_v50, 16  ;;  %v1306_v44 = vshll.u32 %v5714_v50, 16  ;;  %v1954_v13 = vshrl.u32 %v7449_v30, 16 }
 0x1e3   : > { %v1487_v14 = vsel %vm7072_vm10, %v1300_v19, %v1486_v62  ;;  %v1283_v31 = vor.u32 %v1281_v10, %v7453_v1  ;;  %v1958_v11 = vrot.slane %v1956_v55, 1  ;;  %v2126_v29 = vrot.slane %v5475_v57, 1  ;;  %v7465_v62 = vld [vmem:[#allocation2 + $0x80] ss:$0 sps:$4 sm:$0x11]  }
 0x1e4   : > { %1488 = vst [vmem:[#allocation2 + $0xa8] sm:$0xf] %v1487_v14  ;;  %v5712_v45 = vpack.c.bf16 %v859_v42, %v859_v42  ;;  %v1305_v27 = vrot.slane %v1303_v22, 7  ;;  %v1963_v24 = vrot.slane %v1961_v60, 1  ;;  %v7470_v36 = vcombine.low %v1589_v39, %v7461_v63  ;;  %v1490_v10 = vld [vmem:[#allocation2 + $0xb0] sm:$0x1] }
 0x1e5   : > { %v1480_v0 = vsel %vm7072_vm10, %v1283_v31, %v1479_v2  ;;  %v1959_v38 = vor.u32 %v1958_v11, %v1954_v13  ;;  %v2128_v50 = vsel %vm2101_vm7, %v2126_v29, %v2127_v18  ;;  %v1284_v55 = vrot.slane %v7453_v1, 4  ;;  %v1564_v18 = vld [vmem:[#allocation2 + $0x6c] sm:$0xe]  ;;  %v1483_v31 = vld [vmem:[#allocation2 + $0xa4] sm:$0x1] }
 0x1e6   : > { %1481 = vst [vmem:[#allocation2 + $0x9c] sm:$0xf] %v1480_v0  ;;  %v1286_v61 = vshrl.u32 %v5712_v45, 16  ;;  %v1289_v19 = vshll.u32 %v5712_v45, 16  ;;  %3767 = vmatmul.mubr.bf16.gmra.mrb[32].mxu1 %v7424_v58  ;;  %v1308_v7 = vor.u32 %v1306_v44, %v1305_v27  ;;  %v1310_v2 = vrot.slane %v1305_v27, 4  ;;  %3928 = vmatmul.mubr.bf16.gmra.mrb[64].mxu0 %v2128_v50 }
 0x1e7   : > { %v793_v60 = vmul.f32 %v7398_v16, %v7360_v8  ;;  %v1964_v42 = vsel %vm1844_vm6, %v1959_v38, %v1963_v24  ;;  %3935 = vmatprep.mubr.bf16.mxu0 %v7470_v36  ;;  %v791_v57 = vmul.f32 %v7398_v16, %v7366_v20  ;;  %v7484_v58 = vcombine.low %v1527_v15, %v7472_v59  ;;  %v1591_v13 = vld [vmem:[#allocation2 + $0x84] sm:$0xf]  ;;  %v1592_v27 = vld [vmem:[#allocation2 + $0x88] sm:$0xf] }
 0x1e8   : > { %v1288_v14 = vrot.slane %v1286_v61, 7  ;;  %v1309_v1 = vsel %vm7084_vm11, %v1301_v17, %v1308_v7  ;;  %v1491_v39 = vsel %vm6883_vm3, %v1310_v2, %v1490_v10  ;;  %3774 = vmatprep.mubr.bf16.mxu1 %v1964_v42  ;;  %v1973_v22 = vshll.u32 %v7465_v62, 16  ;;  %v7508_v42 = vld [vmem:[#allocation2 + $0x88] sm:$0xf] }
 0x1e9   : > { %v832_v8 = vadd.f32 %v7414_v47, %v793_v60  ;;  %1489 = vst [vmem:[#allocation2 + $0xac] sm:$0xf] %v1309_v1  ;;  %1492 = vst [vmem:[#allocation2 + $0xb0] sm:$0x1] %v1491_v39  ;;  %v830_v15 = vadd.f32 %v7414_v47, %v791_v57  ;;  %v1966_v45 = vshrl.u32 %v7484_v58, 16  ;;  %v1968_v17 = vshll.u32 %v7484_v58, 16 }
 0x1ea   : > { %v1291_v44 = vor.u32 %v1289_v19, %v1288_v14  ;;  %v1293_v20 = vrot.slane %v1288_v14, 4  ;;  %v1975_v29 = vrot.slane %v1973_v22, 1  ;;  %v5476_v0 = vcombine.low %v1564_v18, %v7438_v3  ;;  %v1529_v60 = vld [vmem:[#allocation2 + $0x84] sm:$0xf] }
 0x1eb   : > { %v864_v11 = vmax.f32 %v832_v8, 0.0  ;;  %v862_v61 = vmax.f32 %v830_v15, 0.0  ;;  %v2130_v19 = vrot.slane %v7443_v34, 1  ;;  %v1970_v50 = vrot.slane %v1968_v17, 1  ;;  %v1535_v6 = vld [vmem:[#allocation2 + $0xa8] sm:$0xf] }
 0x1ec   : > { %v1292_v24 = vsel %vm7084_vm11, %v1284_v55, %v1291_v44  ;;  %v1484_v10 = vsel %vm6883_vm3, %v1293_v20, %v1483_v31  ;;  %v2129_v7 = vrot.slane %v5476_v0, 1  ;;  %v794_v2 = vmul.f32 %v7398_v16, %v7369_v26  ;;  %v7510_v34 = vld [vmem:[#allocation2 + $0x8c] ss:$0 sps:$4 sm:$0x11]   ;;  %v1565_v31 = vld [vmem:[#allocation2 + $0x78] sm:$0xe] }
 0x1ed   : > { %1482 = vst [vmem:[#allocation2 + $0xa0] sm:$0xf] %v1292_v24  ;;  %1485 = vst [vmem:[#allocation2 + $0xa4] sm:$0x1] %v1484_v10  ;;  %v5717_v38 = vpack.c.bf16 %v864_v11, %v864_v11  ;;  %v5715_v3 = vpack.c.bf16 %v862_v61, %v862_v61  ;;  %v7504_v14 = vcombine.low %v1591_v13, %v1592_v27  ;;  %v1500_v44 = vld [vmem:[#allocation2 + $0xc0] sm:$0xf] }
 0x1ee   : > { %3775 = vmatmul.mubr.bf16.gmra.mrb[36].mxu1 %v7449_v30  ;;  %v792_v55 = vmul.f32 %v7398_v16, %v7375_v32  ;;  %v1971_v1 = vor.u32 %v1970_v50, %v1966_v45  ;;  %v2131_v39 = vsel %vm2101_vm7, %v2129_v7, %v2130_v19  ;;  %v833_v30 = vadd.f32 %v7414_v47, %v794_v2  ;;  %v1493_v20 = vld [vmem:[#allocation2 + $0xb4] sm:$0xf]  ;;  %v1531_v24 = vld [vmem:[#allocation2 + $0x90] sm:$0xf] }
 0x1ef   : > { %v1329_v57 = vshrl.u32 %v5717_v38, 16  ;;  %v1332_v18 = vshll.u32 %v5717_v38, 16  ;;  %v1312_v26 = vshrl.u32 %v5715_v3, 16  ;;  %v1315_v8 = vshll.u32 %v5715_v3, 16  ;;  %3936 = vmatmul.mubr.bf16.gmra.mrb[68].mxu0 %v2131_v39  ;;  %v1593_v38 = vld [vmem:[#allocation2 + $0x90] sm:$0xf] }
 0x1f0   : > { %v1976_v32 = vsel %vm1844_vm6, %v1971_v1, %v1975_v29  ;;  %3943 = vmatprep.mubr.bf16.mxu0 %v7504_v14  ;;  %v831_v16 = vadd.f32 %v7414_v47, %v792_v55  ;;  %v7520_v15 = vcombine.low %v1529_v60, %v7508_v42  ;;  %v865_v13 = vmax.f32 %v833_v30, 0.0  ;;  %v7527_v29 = vld [vmem:[#allocation2 + $0x94] sm:$0xf]  ;;  %v7532_v50 = vld [vmem:[#allocation2 + $0x98] ss:$0 sps:$4 sm:$0x11]  }
 0x1f1   : > { %v7514_v22 = vrot.slane %v1329_v57, 7  ;;  %v7522_v45 = vrot.slane %v1312_v26, 7  ;;  %3782 = vmatprep.mubr.bf16.mxu1 %v1976_v32  ;;  %v1985_v11 = vshll.u32 %v7510_v34, 16  ;;  %v5477_v17 = vcombine.low %v1565_v31, %v7472_v59  ;;  %v1594_v1 = vld [vmem:[#allocation2 + $0x94] sm:$0xf] }
 0x1f2   : > { %v863_v27 = vmax.f32 %v831_v16, 0.0  ;;  %v5718_v47 = vpack.c.bf16 %v865_v13, %v865_v13  ;;  %v1978_v61 = vshrl.u32 %v7520_v15, 16  ;;  %v1980_v19 = vshll.u32 %v7520_v15, 16  ;;  %v1504_v31 = vld [vmem:[#allocation2 + $0xc8] sm:$0x1] }
 0x1f3   : > { %v1334_v0 = vor.u32 %v1332_v18, %v7514_v22  ;;  %v1317_v10 = vor.u32 %v1315_v8, %v7522_v45  ;;  %v1987_v2 = vrot.slane %v1985_v11, 1  ;;  %v2132_v60 = vrot.slane %v5477_v17, 1  ;;  %v1497_v16 = vld [vmem:[#allocation2 + $0xbc] sm:$0x1]  ;;  %v1566_v13 = vld [vmem:[#allocation2 + $0x84] sm:$0xe] }
 0x1f4   : > { %v5716_v59 = vpack.c.bf16 %v863_v27, %v863_v27  ;;  %v1337_v55 = vshrl.u32 %v5718_v47, 16  ;;  %v1340_v57 = vshll.u32 %v5718_v47, 16  ;;  %v1982_v18 = vrot.slane %v1980_v19, 1  ;;  %v7549_v27 = vld [vmem:[#allocation2 + $0xa4] ss:$0 sps:$4 sm:$0x11]  }
 0x1f5   : > { %v1501_v7 = vsel %vm7072_vm10, %v1334_v0, %v1500_v44  ;;  %v1494_v3 = vsel %vm7072_vm10, %v1317_v10, %v1493_v20  ;;  %v1335_v39 = vrot.slane %v7514_v22, 4  ;;  %v2133_v30 = vrot.slane %v7465_v62, 1  ;;  %v1533_v0 = vld [vmem:[#allocation2 + $0x9c] sm:$0xf] }
 0x1f6   : > { %1502 = vst [vmem:[#allocation2 + $0xc0] sm:$0xf] %v1501_v7  ;;  %3783 = vmatmul.mubr.bf16.gmra.mrb[40].mxu1 %v7484_v58  ;;  %1495 = vst [vmem:[#allocation2 + $0xb4] sm:$0xf] %v1494_v3  ;;  %v1320_v26 = vshrl.u32 %v5716_v59, 16  ;;  %v1323_v8 = vshll.u32 %v5716_v59, 16  ;;  %v1983_v9 = vor.u32 %v1982_v18, %v1978_v61  ;;  %v7543_v20 = vcombine.low %v1531_v24, %v7527_v29 }
 0x1f7   : > { %v1318_v44 = vrot.slane %v7522_v45, 4  ;;  %v1339_v32 = vrot.slane %v1337_v55, 7  ;;  %v2134_v11 = vsel %vm2101_vm7, %v2132_v60, %v2133_v30  ;;  %v7546_v17 = vcombine.low %v1593_v38, %v1594_v1  ;;  %v7555_v38 = vld [vmem:[#allocation2 + $0xa0] sm:$0xf]  ;;  %v1567_v1 = vld [vmem:[#allocation2 + $0x90] sm:$0xe] }
 0x1f8   : > { %v1322_v58 = vrot.slane %v1320_v26, 7  ;;  %v1997_v22 = vshll.u32 %v7532_v50, 16  ;;  %v1988_v45 = vsel %vm1844_vm6, %v1983_v9, %v1987_v2  ;;  %3944 = vmatmul.mubr.bf16.gmra.mrb[72].mxu0 %v2134_v11  ;;  %v1990_v24 = vshrl.u32 %v7543_v20, 16  ;;  %v7567_v26 = vpop.f32.mrb[0].mxu1 }
 0x1f9   : > { %v1342_v62 = vor.u32 %v1340_v57, %v1339_v32  ;;  %v1344_v10 = vrot.slane %v1339_v32, 4  ;;  %3790 = vmatprep.mubr.bf16.mxu1 %v1988_v45  ;;  %3951 = vmatprep.mubr.bf16.mxu0 %v7546_v17  ;;  %v1992_v19 = vshll.u32 %v7543_v20, 16  ;;  %v5478_v2 = vcombine.low %v1566_v13, %v7508_v42  ;;  %v1595_v42 = vld [vmem:[#allocation2 + $0x9c] sm:$0xf] }
 0x1fa   : > { %v1325_v47 = vor.u32 %v1323_v8, %v1322_v58  ;;  %v1327_v61 = vrot.slane %v1322_v58, 4  ;;  %v1999_v60 = vrot.slane %v1997_v22, 1  ;;  %v2136_v18 = vrot.slane %v7510_v34, 1  ;;  %v7581_v11 = vld [vmem:[#allocation2 + $0xb0] ss:$0 sps:$4 sm:$0x11]  }
 0x1fb   : > { %v1343_v7 = vsel %vm7084_vm11, %v1335_v39, %v1342_v62  ;;  %v1505_v59 = vsel %vm6883_vm3, %v1344_v10, %v1504_v31  ;;  %v1994_v57 = vrot.slane %v1992_v19, 1  ;;  %v2135_v39 = vrot.slane %v5478_v2, 1  ;;  %v1596_v31 = vld [vmem:[#allocation2 + $0xa0] sm:$0xf]  ;;  %v1568_v19 = vld [vmem:[#allocation2 + $0x9c] sm:$0xe] }
 0x1fc   : > { %1503 = vst [vmem:[#allocation2 + $0xc4] sm:$0xf] %v1343_v7  ;;  %1506 = vst [vmem:[#allocation2 + $0xc8] sm:$0x1] %v1505_v59  ;;  %v1326_v3 = vsel %vm7084_vm11, %v1318_v44, %v1325_v47  ;;  %v1498_v55 = vsel %vm6883_vm3, %v1327_v61, %v1497_v16  ;;  %v5448_v8 = vcombine.low %v1533_v0, %v7555_v38  ;;  %v2009_v23 = vshll.u32 %v7549_v27, 16  ;;  %v7574_v16 = vpop.f32.mrb[1].mxu1 }
 0x1fd   : > { %1496 = vst [vmem:[#allocation2 + $0xb8] sm:$0xf] %v1326_v3  ;;  %1499 = vst [vmem:[#allocation2 + $0xbc] sm:$0x1] %v1498_v55  ;;  %v1995_v30 = vor.u32 %v1994_v57, %v1990_v24  ;;  %v7572_v44 = vld [vmem:[#allocation2 + $0xac] sm:$0xf]  ;;  %v2137_v13 = vsel %vm2101_vm7, %v2135_v39, %v2136_v18  ;;  %v5479_v58 = vcombine.low %v1567_v1, %v7527_v29 }
 0x1fe   : > { %3791 = vmatmul.mubr.bf16.gmra.mrb[44].mxu1 %v7520_v15  ;;  %v2002_v32 = vshrl.u32 %v5448_v8, 16  ;;  %v2004_v34 = vshll.u32 %v5448_v8, 16  ;;  %v7578_v15 = vcombine.low %v1595_v42, %v1596_v31  ;;  %v2011_v0 = vrot.slane %v2009_v23, 1  ;;  %v7584_v10 = vpop.f32.mrb[2].mxu1  ;;  %v1597_v61 = vld [vmem:[#allocation2 + $0xa8] sm:$0xf] }
 0x1ff   : > { %v2000_v9 = vsel %vm1844_vm6, %v1995_v30, %v1999_v60  ;;  %v5449_v62 = vcombine.low %v1535_v6, %v7572_v44  ;;  %v7587_v45 = vpop.f32.mrb[3].mxu1  ;;  %v1537_v7 = vld [vmem:[#allocation2 + $0xb4] sm:$0xf]  ;;  %v2138_v29 = vrot.slane %v5479_v58, 1  ;;  %v2139_v59 = vrot.slane %v7532_v50, 1 }
 0x200   : > { %3798 = vmatprep.mubr.bf16.mxu1 %v2000_v9  ;;  %3952 = vmatmul.mubr.bf16.gmra.mrb[76].mxu0 %v2137_v13  ;;  %v2006_v22 = vrot.slane %v2004_v34, 1  ;;  %v1598_v60 = vld [vmem:[#allocation2 + $0xac] sm:$0xf]  ;;  %v2021_v18 = vshll.u32 %v7581_v11, 16  ;;  %v5480_v50 = vcombine.low %v1568_v19, %v7555_v38  ;;  %v1569_v6 = vld [vmem:[#allocation2 + $0xa8] sm:$0xe] }
 0x201   : > { %3959 = vmatprep.mubr.bf16.mxu0 %v7578_v15  ;;  %v2016_v24 = vshll.u32 %v5449_v62, 16  ;;  %v2014_v55 = vshrl.u32 %v5449_v62, 16  ;;  %v2140_v39 = vsel %vm2101_vm7, %v2138_v29, %v2139_v59  ;;  %v7599_v42 = vcombine.low %v1597_v61, %v1598_v60  ;;  %v1599_v9 = vld [vmem:[#allocation2 + $0xb4] sm:$0xf]  ;;  %v1619_v60 = vld [vmem:[#allocation2 + $0xc] sm:$0xe] }
 0x202   : > { %v2007_v47 = vor.u32 %v2006_v22, %v2002_v32  ;;  %v2023_v23 = vrot.slane %v2021_v18, 1  ;;  %v2141_v32 = vrot.slane %v5480_v50, 1  ;;  %v2142_v34 = vrot.slane %v7549_v27, 1  ;;  %v6575_v59 = vld [vmem:[#allocation2 + $0x14] ss:$0 sps:$4 sm:$0x11]  }
 0x203   : > { %v2018_v57 = vrot.slane %v2016_v24, 1  ;;  %v5481_v19 = vcombine.low %v1569_v6, %v7572_v44  ;;  %v6663_v18 = vld [vmem:[#allocation2 + $0x10] sm:$0xf]  ;;  %v1602_v44 = vld [vmem:[#allocation2 + $0xc4] sm:$0xf]  ;;  %v2433_v37 = vshll.u32 %v7504_v14, 16 }
 0x204   : > { %v7590_v2 = vld [vmem:[#allocation2 + $0xb8] sm:$0xf]  ;;  %v2012_v3 = vsel %vm1844_vm6, %v2007_v47, %v2011_v0  ;;  %v1637_v47 = vld [vmem:[#allocation2 + $0x1c] sm:$0xf]  ;;  %v2143_v61 = vsel %vm2101_vm7, %v2141_v32, %v2142_v34  ;;  %v2313_v32 = vshll.u32 %v7114_v35, 16 }
 0x205   : > { %v7596_v1 = vcombine.low %v1537_v7, %v7590_v2  ;;  %v2019_v31 = vor.u32 %v2018_v57, %v2014_v55  ;;  %v1600_v13 = vld [vmem:[#allocation2 + $0xb8] sm:$0xf]  ;;  %v2145_v55 = vrot.slane %v7581_v11, 1  ;;  %v1601_v57 = vld [vmem:[#allocation2 + $0xc0] sm:$0xf] }
 0x206   : > { %3799 = vmatmul.mubr.bf16.gmra.mrb[48].mxu1 %v7543_v20  ;;  %v7602_v20 = vld [vmem:[#allocation2 + $0xbc] ss:$0 sps:$4 sm:$0x11]   ;;  %v7611_v24 = vcombine.low %v1599_v9, %v1600_v13  ;;  %v1636_v7 = vld [vmem:[#allocation2 + $0x18] sm:$0xf]  ;;  %v7622_v9 = vcombine.low %v1601_v57, %v1602_v44 }
 0x207   : > { %3806 = vmatprep.mubr.bf16.mxu1 %v2012_v3  ;;  %v2028_v30 = vshll.u32 %v7596_v1, 16  ;;  %v2024_v58 = vsel %vm1844_vm6, %v2019_v31, %v2023_v23  ;;  %v2026_v38 = vshrl.u32 %v7596_v1, 16  ;;  %v2033_v0 = vshll.u32 %v7602_v20, 16  ;;  %v1570_v31 = vld [vmem:[#allocation2 + $0xb4] sm:$0xe] }
 0x208   : > { %3960 = vmatmul.mubr.bf16.gmra.mrb[80].mxu0 %v2140_v39  ;;  %v2144_v3 = vrot.slane %v5481_v19, 1  ;;  %v5515_v39 = vcombine.low %v1619_v60, %v6663_v18  ;;  %v6579_v6 = vld [vmem:[#allocation2 + $0x20] ss:$0 sps:$4 sm:$0x11]   ;;  %v5482_v11 = vcombine.low %v1570_v31, %v7590_v2  ;;  %v1638_v13 = vld [vmem:[#allocation2 + $0x24] sm:$0xf] }
 0x209   : > { %3967 = vmatprep.mubr.bf16.mxu0 %v7599_v42  ;;  %v2030_v22 = vrot.slane %v2028_v30, 1  ;;  %v2035_v29 = vrot.slane %v2033_v0, 1  ;;  %v1639_v30 = vld [vmem:[#allocation2 + $0x28] sm:$0xf]  ;;  %v1620_v0 = vld [vmem:[#allocation2 + $0x18] sm:$0xe] }
 0x20a   : > { %v2146_v34 = vsel %vm2101_vm7, %v2144_v3, %v2145_v55  ;;  %v2315_v19 = vrot.slane %v2313_v32, 1  ;;  %v2148_v60 = vrot.slane %v7602_v20, 1  ;;  %v6583_v55 = vld [vmem:[#allocation2 + $0x20] ss:$0 sps:$4 sm:$0x11]   ;;  %v2311_v18 = vshrl.u32 %v7114_v35, 16 }
 0x20b   : > { %v2031_v27 = vor.u32 %v2030_v22, %v2026_v38  ;;  %v7625_v22 = vcombine.low %v1638_v13, %v1639_v30  ;;  %v6585_v31 = vld [vmem:[#allocation2 + $0x2c] ss:$0 sps:$4 sm:$0x11]   ;;  %v1621_v13 = vld [vmem:[#allocation2 + $0x24] sm:$0xe] }
 0x20c   : > { %v2316_v30 = vor.u32 %v2315_v19, %v2311_v18  ;;  %v7653_v18 = vld [vmem:[#allocation2 + $0x40] sm:$0xf] }
 0x20d   : > { %v2036_v50 = vsel %vm1844_vm6, %v2031_v27, %v2035_v29  ;;  %v2147_v29 = vrot.slane %v5482_v11, 1  ;;  %v2789_v57 = vshll.u32 %v7625_v22, 16 }
 0x20e   : > { %3807 = vmatmul.mubr.bf16.gmra.mrb[52].mxu1 %v5448_v8  ;;  %v7614_v8 = vcombine.low %v1636_v7, %v1637_v47  ;;  %v6664_v7 = vld [vmem:[#allocation2 + $0x1c] sm:$0xf] }
 0x20f   : > { %3814 = vmatprep.mubr.bf16.mxu1 %v2024_v58  ;;  %v2567_v58 = vrot.slane %v6575_v59, 1  ;;  %v5516_v27 = vcombine.low %v1620_v0, %v6664_v7  ;;  %v2149_v20 = vsel %vm2101_vm7, %v2147_v29, %v2148_v60  ;;  %v2791_v11 = vrot.slane %v2789_v57, 1  ;;  %v6665_v0 = vld [vmem:[#allocation2 + $0x28] sm:$0xf] }
 0x210   : > { %3968 = vmatmul.mubr.bf16.gmra.mrb[84].mxu0 %v2143_v61  ;;  %v2777_v23 = vshll.u32 %v7614_v8, 16  ;;  %v2775_v47 = vshrl.u32 %v7614_v8, 16  ;;  %v2782_v61 = vshll.u32 %v6579_v6, 16  ;;  %v1640_v6 = vld [vmem:[#allocation2 + $0x30] sm:$0xf]  ;;  %v2330_v57 = vshll.u32 %v6583_v55, 16 }
 0x211   : > { %3975 = vmatprep.mubr.bf16.mxu0 %v7611_v24  ;;  %v6586_v29 = vld [vmem:[#allocation2 + $0x2c] ss:$0 sps:$4 sm:$0x11]  }
 0x212   : > { %v2779_v38 = vrot.slane %v2777_v23, 1  ;;  %v2784_v44 = vrot.slane %v2782_v61, 1  ;;  %v2325_v23 = vshll.u32 %v7123_v52, 16 }
 0x214   : > { %v2780_v3 = vor.u32 %v2779_v38, %v2775_v47  ;;  %v6589_v38 = vld [vmem:[%s8673_s4 + $0x208] sm:$0xff]   ;;  %v5517_v47 = vcombine.low %v1621_v13, %v6665_v0  ;;  %v2327_v19 = vrot.slane %v2325_v23, 1  ;;  %v2337_v23 = vshll.u32 %v7204_v21, 16 }
 0x216   : > { %3815 = vmatmul.mubr.bf16.gmra.mrb[56].mxu1 %v5449_v62  ;;  %v2566_v62 = vrot.slane %v5515_v39, 1  ;;  %v2318_v39 = vshll.u32 %v6575_v59, 16  ;;  %v2785_v32 = vsel %vm1844_vm6, %v2780_v3, %v2784_v44  ;;  %v2323_v3 = vshrl.u32 %v7123_v52, 16  ;;  %v7655_v44 = vld [vmem:[#allocation2 + $0x38] ss:$0 sps:$4 sm:$0x11]  }
 0x217   : > { %3822 = vmatprep.mubr.bf16.mxu1 %v2036_v50  ;;  %v7634_v50 = vld [vmem:[#allocation2 + $0x34] sm:$0xf]  ;;  %v2806_v13 = vshll.u32 %v7655_v44, 16 }
 0x218   : > { %3976 = vmatmul.mubr.bf16.gmra.mrb[88].mxu0 %v2146_v34  ;;  %v2568_v2 = vsel %vm2101_vm7, %v2566_v62, %v2567_v58  ;;  %v2570_v34 = vrot.slane %v6583_v55, 1  ;;  %v7640_v35 = vcombine.low %v1640_v6, %v7634_v50  ;;  %v2320_v59 = vrot.slane %v2318_v39, 1 }
 0x219   : > { %3983 = vmatprep.mubr.bf16.mxu0 %v7622_v9  ;;  %v2787_v62 = vshrl.u32 %v7625_v22, 16  ;;  %v2794_v58 = vshll.u32 %v6585_v31, 16  ;;  %v6596_v31 = vld [vmem:[%s8673_s4 + $0x210] sm:$0xff]   ;;  %v2573_v55 = vrot.slane %v6586_v29, 1 }
 0x21a   : > { %v2321_v61 = vsel %vm1844_vm6, %v2316_v30, %v2320_v59  ;;  %v2801_v60 = vshll.u32 %v7640_v35, 16  ;;  %v2572_v30 = vrot.slane %v5517_v47, 1  ;;  %v2799_v59 = vshrl.u32 %v7640_v35, 16 }
 0x21b   : > { %v2796_v39 = vrot.slane %v2794_v58, 1  ;;  %v2339_v47 = vrot.slane %v2337_v23, 1  ;;  %v2349_v23 = vshll.u32 %v7249_v12, 16 }
 0x21c   : > { %v2803_v6 = vrot.slane %v2801_v60, 1  ;;  %v2342_v60 = vshll.u32 %v6586_v29, 16 }
 0x21e   : > { %3823 = vmatmul.mubr.bf16.gmra.mrb[60].mxu1 %v7596_v1  ;;  %v2569_v1 = vrot.slane %v5516_v27, 1  ;;  %v2792_v27 = vor.u32 %v2791_v11, %v2787_v62  ;;  %v1622_v11 = vld [vmem:[#allocation2 + $0x30] sm:$0xe]  ;;  %v6667_v62 = vld [vmem:[#allocation2 + $0x34] sm:$0xf] }
 0x21f   : > { %4024 = vmatprep.mubr.bf16.mxu1 %v2568_v2  ;;  %v6666_v2 = vld [vmem:[%s8673_s4 + $0x200] sm:$0xff]   ;;  %v5518_v58 = vcombine.low %v1622_v11, %v6667_v62 }
 0x220   : > { %3984 = vmatmul.mubr.bf16.gmra.mrb[92].mxu0 %v2149_v20  ;;  %v2571_v7 = vsel %vm2101_vm7, %v2569_v1, %v2570_v34  ;;  %v2328_v20 = vor.u32 %v2327_v19, %v2323_v3  ;;  %v1642_v1 = vld [vmem:[#allocation2 + $0x3c] sm:$0xf]  ;;  %v2797_v52 = vsel %vm1844_vm6, %v2792_v27, %v2796_v39  ;;  %v2332_v34 = vrot.slane %v2330_v57, 1  ;;  %v7677_v57 = vld [vmem:[#allocation2 + $0x44] ss:$0 sps:$4 sm:$0x11]  }
 0x221   : > { %4185 = vmatprep.mubr.bf16.mxu0 %v2785_v32  ;;  %v7664_v32 = vcombine.low %v1642_v1, %v7653_v18  ;;  %v2804_v19 = vor.u32 %v2803_v6, %v2799_v59  ;;  %v2335_v27 = vshrl.u32 %v7204_v21, 16  ;;  %v2808_v3 = vrot.slane %v2806_v13, 1  ;;  %v6610_v39 = vld [vmem:[%s8673_s4 + $0x220] sm:$0xff]   ;;  %v1644_v1 = vld [vmem:[#allocation2 + $0x48] sm:$0xf] }
 0x222   : > { %v2333_v0 = vsel %vm1844_vm6, %v2328_v20, %v2332_v34  ;;  %v1623_v6 = vld [vmem:[#allocation2 + $0x3c] sm:$0xe]  ;;  %v2818_v11 = vshll.u32 %v7677_v57, 16  ;;  %v6668_v59 = vld [vmem:[#allocation2 + $0x40] sm:$0xf] }
 0x223   : > { %v2340_v20 = vor.u32 %v2339_v47, %v2335_v27  ;;  %v2809_v21 = vsel %vm1844_vm6, %v2804_v19, %v2808_v3  ;;  %v2811_v34 = vshrl.u32 %v7664_v32, 16  ;;  %v5519_v13 = vcombine.low %v1623_v6, %v6668_v59  ;;  %v7699_v27 = vld [vmem:[#allocation2 + $0x58] sm:$0xf]  ;;  %v7701_v3 = vld [vmem:[#allocation2 + $0x50] ss:$0 sps:$4 sm:$0x11]  }
 0x224   : > { %v2347_v19 = vshrl.u32 %v7249_v12, 16  ;;  %v2373_v6 = vshll.u32 %v7321_v4, 16  ;;  %v6631_v59 = vld [vmem:[%s8673_s4 + $0x238] sm:$0xff]  }
 0x225   : > { %v2578_v12 = vrot.slane %v5519_v13, 1  ;;  %v6669_v13 = vld [vmem:[#allocation2 + $0x4c] sm:$0xf] }
 0x226   : > { %4025 = vmatmul.mubr.bf16.vlgmr.msra.gmra.mrb[64].mxu1 %v2321_v61  ;;  %v2574_v61 = vsel %vm2101_vm7, %v2572_v30, %v2573_v55  ;;  %v2575_v30 = vrot.slane %v5518_v58, 1  ;;  %v2344_v55 = vrot.slane %v2342_v60, 1  ;;  %v2351_v58 = vrot.slane %v2349_v23, 1 }
 0x227   : > { %6288 = vmatpush3.bf16.msra.mxu1 %v6666_v2  ;;  %4032 = vmatprep.mubr.bf16.mxu1 %v2571_v7  ;;  %v2813_v7 = vshll.u32 %v7664_v32, 16  ;;  %v7675_v2 = vld [vmem:[#allocation2 + $0x4c] sm:$0xf]  ;;  %v2820_v60 = vrot.slane %v2818_v11, 1  ;;  %v7705_v23 = vadd.f32 %v7574_v16, %v7567_v26  ;;  %v7719_v26 = vadd.f32 %v7587_v45, %v7584_v10  ;;  %v1624_v16 = vld [vmem:[#allocation2 + $0x48] sm:$0xe] }
 0x228   : > { %6289 = vmatprep.subr.bf16.mxu1 %v6589_v38  ;;  %4186 = vmatmul.mubr.bf16.vlgmr.msra.gmra.mrb[96].mxu0 %v7614_v8  ;;  %v6603_v8 = vld [vmem:[%s8673_s4 + $0x218] sm:$0xff]   ;;  %v2345_v62 = vsel %vm1844_vm6, %v2340_v20, %v2344_v55  ;;  %v6624_v20 = vld [vmem:[%s8673_s4 + $0x230] sm:$0xff]   ;;  %v7724_v11 = vld [vmem:[#allocation2 + $0x64] sm:$0xf]  ;;  %v5520_v10 = vcombine.low %v1624_v16, %v6669_v13 }
 0x229   : > { %4193 = vmatprep.mubr.bf16.mxu0 %v2797_v52  ;;  %v2815_v52 = vrot.slane %v2813_v7, 1  ;;  %v7729_v45 = vld [vmem:[#allocation2 + $0x54] sm:$0xe]  ;;  %v1626_v16 = vld [vmem:[#allocation2 + $0x60] sm:$0xe] }
 0x22b   : > { %6290 = vmatpush3.bf16.msra.mxu1 %v6589_v38  ;;  %v6590_v38 = vld [vmem:[#allocation2 + $0x38] ss:$0 sps:$4 sm:$0x11]   ;;  %v2816_v47 = vor.u32 %v2815_v52, %v2811_v34 }
 0x22c   : > { %6291 = vmatprep.subr.bf16.mxu1 %v6596_v31  ;;  %v2576_v29 = vrot.slane %v6590_v38, 1  ;;  %v2354_v7 = vshll.u32 %v6590_v38, 16 }
 0x22e   : > { %4033 = vmatmul.mubr.bf16.gmra.mrb[68].mxu1 %v2333_v0  ;;  %v7694_v0 = vld [vmem:[#allocation2 + $0x44] ss:$0 sps:$4 sm:$0x11]   ;;  %v2356_v55 = vrot.slane %v2354_v7, 1  ;;  %v1648_v7 = vld [vmem:[#allocation2 + $0x60] sm:$0xf] }
 0x22f   : > { %4040 = vmatprep.mubr.bf16.mxu1 %v2574_v61  ;;  %6292 = vmatpush3.bf16.msra.mxu1 %v6596_v31  ;;  %v7686_v31 = vcombine.low %v1644_v1, %v7675_v2  ;;  %v2352_v1 = vor.u32 %v2351_v58, %v2347_v19  ;;  %v2579_v38 = vrot.slane %v7694_v0, 1  ;;  %v6597_v58 = vld [vmem:[#allocation2 + $0x50] ss:$0 sps:$4 sm:$0x11]  }
 0x230   : > { %6293 = vmatprep.subr.bf16.mxu1 %v6603_v8  ;;  %4194 = vmatmul.mubr.bf16.gmra.mrb[100].mxu0 %v7625_v22  ;;  %v6617_v22 = vld [vmem:[%s8673_s4 + $0x228] sm:$0xff]  }
 0x231   : > { %4201 = vmatprep.mubr.bf16.mxu0 %v2809_v21  ;;  %v2825_v61 = vshll.u32 %v7686_v31, 16  ;;  %v1646_v21 = vld [vmem:[#allocation2 + $0x54] sm:$0xf]  ;;  %v2823_v34 = vshrl.u32 %v7686_v31, 16 }
 0x232   : > { %v7715_v52 = vcombine.low %v1646_v21, %v7699_v27  ;;  %v2366_v21 = vshll.u32 %v7694_v0, 16 }
 0x233   : > { %6294 = vmatpush3.bf16.msra.mxu1 %v6603_v8  ;;  %v2577_v8 = vsel %vm2101_vm7, %v2575_v30, %v2576_v29  ;;  %v2361_v30 = vshll.u32 %v7303_v40, 16  ;;  %v2827_v29 = vrot.slane %v2825_v61, 1  ;;  %v7733_v61 = vld [vmem:[#allocation2 + $0x5c] ss:$0 sps:$4 sm:$0x11]  }
 0x234   : > { %6295 = vmatprep.subr.bf16.mxu1 %v6610_v39  ;;  %v2837_v19 = vshll.u32 %v7715_v52, 16  ;;  %v2842_v54 = vshll.u32 %v7733_v61, 16 }
 0x236   : > { %4041 = vmatmul.mubr.bf16.gmra.mrb[72].mxu1 %v2345_v62  ;;  %v2357_v62 = vsel %vm1844_vm6, %v2352_v1, %v2356_v55  ;;  %v1650_v1 = vld [vmem:[#allocation2 + $0x6c] sm:$0xf]  ;;  %v2839_v56 = vrot.slane %v2837_v19, 1  ;;  %v2835_v19 = vshrl.u32 %v7715_v52, 16 }
 0x237   : > { %4048 = vmatprep.mubr.bf16.mxu1 %v2577_v8  ;;  %6296 = vmatpush3.bf16.msra.mxu1 %v6610_v39  ;;  %v2821_v39 = vsel %vm1844_vm6, %v2816_v47, %v2820_v60  ;;  %v2580_v8 = vsel %vm2101_vm7, %v2578_v12, %v2579_v38  ;;  %v2828_v47 = vor.u32 %v2827_v29, %v2823_v34  ;;  %v2359_v60 = vshrl.u32 %v7303_v40, 16  ;;  %v6670_v38 = vld [vmem:[#allocation2 + $0x58] sm:$0xf]  ;;  %v6671_v34 = vld [vmem:[#allocation2 + $0x64] sm:$0xf] }
 0x238   : > { %6297 = vmatprep.subr.bf16.mxu1 %v6617_v22  ;;  %4202 = vmatmul.mubr.bf16.gmra.mrb[104].mxu0 %v7640_v35  ;;  %v2830_v35 = vshll.u32 %v7701_v3, 16  ;;  %v2385_v12 = vshll.u32 %v7377_v48, 16  ;;  %v5521_v29 = vcombine.low %v7729_v45, %v6670_v38  ;;  %v5522_v13 = vcombine.low %v1626_v16, %v6671_v34  ;;  %v1627_v40 = vld [vmem:[#allocation2 + $0x6c] sm:$0xe] }
 0x239   : > { %4209 = vmatprep.mubr.bf16.mxu0 %v2821_v39  ;;  %v7739_v39 = vcombine.low %v1648_v7, %v7724_v11  ;;  %v2582_v7 = vrot.slane %v6597_v58, 1  ;;  %v7750_v45 = vld [vmem:[#allocation2 + $0x68] ss:$0 sps:$4 sm:$0x11]   ;;  %v2368_v38 = vrot.slane %v2366_v21, 1  ;;  %v2375_v16 = vrot.slane %v2373_v6, 1 }
 0x23a   : > { %v2832_v55 = vrot.slane %v2830_v35, 1  ;;  %v2378_v34 = vshll.u32 %v6597_v58, 16  ;;  %v2371_v6 = vshrl.u32 %v7321_v4, 16  ;;  %v2387_v58 = vrot.slane %v2385_v12, 1 }
 0x23b   : > { %6298 = vmatpush3.bf16.msra.mxu1 %v6617_v22  ;;  %v2363_v22 = vrot.slane %v2361_v30, 1  ;;  %v7741_v30 = vld [vmem:[#allocation2 + $0x70] sm:$0xf]  ;;  %v7764_v21 = vld [vmem:[#allocation2 + $0x74] ss:$0 sps:$4 sm:$0x11]  }
 0x23c   : > { %6299 = vmatprep.subr.bf16.mxu1 %v6624_v20  ;;  %v7753_v35 = vcombine.low %v1650_v1, %v7741_v30  ;;  %v2376_v49 = vor.u32 %v2375_v16, %v2371_v6  ;;  %v2380_v51 = vrot.slane %v2378_v34, 1  ;;  %v2383_v1 = vshrl.u32 %v7377_v48, 16 }
 0x23d   : > { %v2364_v0 = vor.u32 %v2363_v22, %v2359_v60  ;;  %v6604_v60 = vld [vmem:[#allocation2 + $0x68] ss:$0 sps:$4 sm:$0x11]   ;;  %v2844_v22 = vrot.slane %v2842_v54, 1  ;;  %v2584_v4 = vrot.slane %v5521_v29, 1  ;;  %v2585_v12 = vrot.slane %v6600_v53, 1 }
 0x23e   : > { %4049 = vmatmul.mubr.bf16.gmra.mrb[76].mxu1 %v2357_v62  ;;  %v7745_v62 = vld [vmem:[#allocation2 + $0x78] sm:$0xe]  ;;  %v2847_v54 = vshrl.u32 %v7739_v39, 16  ;;  %v2588_v34 = vrot.slane %v6604_v60, 1 }
 0x23f   : > { %4056 = vmatprep.mubr.bf16.mxu1 %v2580_v8  ;;  %6300 = vmatpush3.bf16.msra.mxu1 %v6624_v20  ;;  %v2581_v8 = vrot.slane %v5520_v10, 1  ;;  %v2833_v20 = vsel %vm1844_vm6, %v2828_v47, %v2832_v55  ;;  %v2849_v10 = vshll.u32 %v7739_v39, 16  ;;  %v5523_v47 = vcombine.low %v1627_v40, %v7426_v5  ;;  %v1652_v40 = vld [vmem:[#allocation2 + $0x78] sm:$0xf] }
 0x240   : > { %6301 = vmatprep.subr.bf16.mxu1 %v6631_v59  ;;  %4210 = vmatmul.mubr.bf16.gmra.mrb[108].mxu0 %v7664_v32  ;;  %v2397_v32 = vshll.u32 %v7391_v43, 16  ;;  %v2369_v55 = vsel %vm1844_vm6, %v2364_v0, %v2368_v38  ;;  %v2861_v5 = vshll.u32 %v7753_v35, 16  ;;  %v7769_v0 = vld [vmem:[#allocation2 + $0x74] ss:$0 sps:$4 sm:$0x11]   ;;  %v2854_v38 = vshll.u32 %v7750_v45, 16 }
 0x241   : > { %4217 = vmatprep.mubr.bf16.mxu0 %v2833_v20  ;;  %v2840_v20 = vor.u32 %v2839_v56, %v2835_v19  ;;  %v2851_v46 = vrot.slane %v2849_v10, 1  ;;  %v2388_v56 = vor.u32 %v2387_v58, %v2383_v1  ;;  %v2866_v10 = vshll.u32 %v7764_v21, 16 }
 0x242   : > { %v2863_v48 = vrot.slane %v2861_v5, 1  ;;  %v2395_v19 = vshrl.u32 %v7391_v43, 16  ;;  %v7780_v6 = vcombine.low %v1652_v40, %v7772_v41  ;;  %v2381_v1 = vsel %vm1844_vm6, %v2376_v49, %v2380_v51  ;;  %v1654_v49 = vld [vmem:[#allocation2 + $0x84] sm:$0xf]  ;;  %v1686_v51 = vld [vmem:[#allocation2 + $0x30] sm:$0xe] }
 0x243   : > { %6302 = vmatpush3.bf16.msra.mxu1 %v6631_v59  ;;  %v2583_v59 = vsel %vm2101_vm7, %v2581_v8, %v2582_v7  ;;  %v2587_v8 = vrot.slane %v5522_v13, 1  ;;  %v2399_v7 = vrot.slane %v2397_v32, 1  ;;  %v2845_v16 = vsel %vm1844_vm6, %v2840_v20, %v2844_v22 }
 0x244   : > { %v2852_v29 = vor.u32 %v2851_v46, %v2847_v54  ;;  %v2859_v32 = vshrl.u32 %v7753_v35, 16  ;;  %v2591_v22 = vrot.slane %v7769_v0, 1  ;;  %v2586_v58 = vsel %vm2101_vm7, %v2584_v4, %v2585_v12 }
 0x245   : > { %v2856_v20 = vrot.slane %v2854_v38, 1  ;;  %v2400_v46 = vor.u32 %v2399_v7, %v2395_v19  ;;  %v2868_v40 = vrot.slane %v2866_v10, 1  ;;  %v8721_v12 = vshll.u32 %v7436_v25, 16 }
 0x246   : > { %4057 = vmatmul.mubr.bf16.gmra.mrb[80].mxu1 %v2369_v55  ;;  %v2390_v55 = vshll.u32 %v6600_v53, 16  ;;  %v2402_v53 = vshll.u32 %v6604_v60, 16  ;;  %v2589_v60 = vsel %vm2101_vm7, %v2587_v8, %v2588_v34  ;;  %v2864_v5 = vor.u32 %v2863_v48, %v2859_v32  ;;  %v1687_v34 = vld [vmem:[#allocation2 + $0x3c] sm:$0xe] }
 0x247   : > { %4064 = vmatprep.mubr.bf16.mxu1 %v2583_v59  ;;  %v7782_v59 = vld [vmem:[#allocation2 + $0x80] ss:$0 sps:$4 sm:$0x11]   ;;  %v7798_v38 = vrot.slane %v8721_v12, 1  ;;  %v5565_v8 = vcombine.low %v1686_v51, %v7634_v50  ;;  %v3037_v7 = vrot.slane %v7655_v44, 1  ;;  %v2871_v10 = vshrl.u32 %v7780_v6, 16 }
 0x248   : > { %4218 = vmatmul.mubr.bf16.gmra.mrb[112].mxu0 %v7686_v31  ;;  %v2392_v13 = vrot.slane %v2390_v55, 1  ;;  %v2590_v31 = vrot.slane %v5523_v47, 1  ;;  %v2857_v55 = vsel %vm1844_vm6, %v2852_v29, %v2856_v20  ;;  %v2404_v54 = vrot.slane %v2402_v53, 1  ;;  %v1688_v53 = vld [vmem:[#allocation2 + $0x48] sm:$0xe] }
 0x249   : > { %4225 = vmatprep.mubr.bf16.mxu0 %v2845_v16  ;;  %v2873_v47 = vshll.u32 %v7780_v6, 16  ;;  %v2878_v16 = vshll.u32 %v7782_v59, 16  ;;  %v5566_v29 = vcombine.low %v1687_v34, %v7653_v18  ;;  %v3040_v19 = vrot.slane %v7677_v57, 1  ;;  %v7816_v18 = vld [vmem:[#allocation2 + $0x98] ss:$0 sps:$4 sm:$0x11]  }
 0x24a   : > { %v2393_v43 = vsel %vm1844_vm6, %v2388_v56, %v2392_v13  ;;  %v7794_v4 = vsel %vm2101_vm7, %v2590_v31, %v2591_v22  ;;  %v1655_v56 = vld [vmem:[#allocation2 + $0x88] sm:$0xf]  ;;  %v7803_v48 = vsel %vm1844_vm6, %v2400_v46, %v2404_v54  ;;  %v1689_v13 = vld [vmem:[#allocation2 + $0x54] sm:$0xe]  ;;  %v2869_v32 = vsel %vm1844_vm6, %v2864_v5, %v2868_v40  ;;  %v1692_v5 = vld [vmem:[#allocation2 + $0x78] sm:$0xe] }
 0x24b   : > { %v7810_v31 = vld [vmem:[#allocation2 + $0x8c] ss:$0 sps:$4 sm:$0x11]   ;;  %v3036_v50 = vrot.slane %v5565_v8, 1  ;;  %v5567_v44 = vcombine.low %v1688_v53, %v7675_v2  ;;  %v3043_v22 = vrot.slane %v7701_v3, 1  ;;  %v7814_v20 = vrot.slane %v2873_v47, 1 }
 0x24c   : > { %v3039_v57 = vrot.slane %v5566_v29, 1  ;;  %v5568_v46 = vcombine.low %v1689_v13, %v7699_v27  ;;  %v7820_v40 = vcombine.low %v1654_v49, %v1655_v56  ;;  %v7822_v54 = vld [vmem:[#allocation2 + $0xa4] ss:$0 sps:$4 sm:$0x11]   ;;  %v1693_v47 = vld [vmem:[#allocation2 + $0x84] sm:$0xe]  ;;  %v5571_v53 = vcombine.low %v1692_v5, %v7772_v41 }
 0x24d   : > { %v7825_v2 = vsel %vm2101_vm7, %v3036_v50, %v3037_v7  ;;  %v3042_v3 = vrot.slane %v5567_v44, 1  ;;  %v7828_v51 = vld [vmem:[#allocation2 + $0xb0] ss:$0 sps:$4 sm:$0x11]   ;;  %v1694_v8 = vld [vmem:[#allocation2 + $0x90] sm:$0xe]  ;;  %v5572_v44 = vcombine.low %v1693_v47, %v1655_v56 }
 0x24e   : > { %4065 = vmatmul.mubr.bf16.gmra.mrb[84].mxu1 %v2381_v1  ;;  %v1690_v1 = vld [vmem:[#allocation2 + $0x60] sm:$0xe]  ;;  %v7831_v12 = vsel %vm2101_vm7, %v3039_v57, %v3040_v19  ;;  %v3045_v27 = vrot.slane %v5568_v46, 1  ;;  %v7835_v34 = vld [vmem:[#allocation2 + $0xbc] ss:$0 sps:$4 sm:$0x11]  }
 0x24f   : > { %4072 = vmatprep.mubr.bf16.mxu1 %v2586_v58  ;;  %v1691_v58 = vld [vmem:[#allocation2 + $0x6c] sm:$0xe]  ;;  %v7838_v7 = vsel %vm2101_vm7, %v3042_v3, %v3043_v22  ;;  %v1695_v13 = vld [vmem:[#allocation2 + $0x9c] sm:$0xe]  ;;  %v1657_v19 = vld [vmem:[#allocation2 + $0x94] sm:$0xf] }
 0x250   : > { %4226 = vmatmul.mubr.bf16.gmra.mrb[116].mxu0 %v7715_v52  ;;  %v3046_v52 = vrot.slane %v7733_v61, 1  ;;  %v3049_v61 = vrot.slane %v7750_v45, 1  ;;  %v5570_v49 = vcombine.low %v1691_v58, %v7741_v30  ;;  %v7842_v50 = vld [vmem:[#allocation2 + $0xc8] ss:$0 sps:$4 sm:$0x11]   ;;  %v3058_v41 = vrot.slane %v7810_v31, 1 }
 0x251   : > { %4233 = vmatprep.mubr.bf16.mxu0 %v2857_v55  ;;  %v5569_v55 = vcombine.low %v1690_v1, %v7724_v11  ;;  %v3052_v11 = vrot.slane %v7764_v21, 1  ;;  %v1696_v1 = vld [vmem:[#allocation2 + $0xa8] sm:$0xe]  ;;  %v7848_v22 = vld [vmem:[#allocation2 + $0xa0] sm:$0xf]  ;;  %v3054_v21 = vrot.slane %v5571_v53, 1 }
 0x252   : > { %v7845_v45 = vsel %vm2101_vm7, %v3045_v27, %v3046_v52  ;;  %v3051_v30 = vrot.slane %v5570_v49, 1  ;;  %v1697_v57 = vld [vmem:[#allocation2 + $0xb4] sm:$0xe]  ;;  %v7854_v46 = vld [vmem:[#allocation2 + $0xac] sm:$0xf]  ;;  %v3057_v5 = vrot.slane %v5572_v44, 1  ;;  %v5574_v56 = vcombine.low %v1695_v13, %v7848_v22 }
 0x253   : > { %v3048_v29 = vrot.slane %v5569_v55, 1  ;;  %v3061_v3 = vrot.slane %v7816_v18, 1  ;;  %v1698_v55 = vld [vmem:[#allocation2 + $0xc0] sm:$0xe]  ;;  %v7862_v47 = vld [vmem:[#allocation2 + $0xb8] sm:$0xf] }
 0x254   : > { %v7857_v52 = vsel %vm2101_vm7, %v3051_v30, %v3052_v11  ;;  %v3064_v49 = vrot.slane %v7822_v54, 1  ;;  %v7872_v11 = vsel %vm2101_vm7, %v3057_v5, %v3058_v41  ;;  %v3063_v53 = vrot.slane %v5574_v56, 1 }
 0x255   : > { %v7851_v58 = vsel %vm2101_vm7, %v3048_v29, %v3049_v61  ;;  %v7869_v29 = vld [vmem:[#allocation2 + $0xc4] sm:$0xf]  ;;  %v3067_v13 = vrot.slane %v7828_v51, 1  ;;  %v3070_v44 = vrot.slane %v7835_v34, 1  ;;  %v3073_v5 = vrot.slane %v7842_v50, 1 }
 0x256   : > { %4073 = vmatmul.mubr.bf16.gmra.mrb[88].mxu1 %v2393_v43  ;;  %v3055_v43 = vrot.slane %v7782_v59, 1  ;;  %v7884_v41 = vsel %vm2101_vm7, %v3063_v53, %v3064_v49  ;;  %v1656_v49 = vld [vmem:[#allocation2 + $0x90] sm:$0xf]  ;;  %v8722_v53 = vcombine.low %v7745_v62, %v7461_v63  ;;  %v1699_v62 = vld [vmem:[#allocation2 + $0xcc] sm:$0xe] }
 0x257   : > { %4080 = vmatprep.mubr.bf16.mxu1 %v2589_v60  ;;  %v5573_v60 = vcombine.low %v1694_v8, %v1657_v19  ;;  %v5575_v8 = vcombine.low %v1696_v1, %v7854_v46  ;;  %v6611_v1 = vld [vmem:[#allocation2 + $0x80] ss:$0 sps:$4 sm:$0x11]  }
 0x258   : > { %4234 = vmatmul.mubr.bf16.gmra.mrb[120].mxu0 %v7739_v39  ;;  %v7865_v27 = vsel %vm2101_vm7, %v3054_v21, %v3055_v43  ;;  %v5576_v39 = vcombine.low %v1697_v57, %v7862_v47  ;;  %v5577_v21 = vcombine.low %v1698_v55, %v7869_v29  ;;  %v2876_v57 = vor.u32 %v7814_v20, %v2871_v10 }
 0x259   : > { %v3060_v61 = vrot.slane %v5573_v60, 1  ;;  %4241 = vmatprep.mubr.bf16.mxu0 %v2869_v32  ;;  %v3066_v43 = vrot.slane %v5575_v8, 1  ;;  %v2880_v32 = vrot.slane %v2878_v16, 1  ;;  %v2421_v16 = vshll.u32 %v7470_v36, 16  ;;  %v1629_v8 = vld [vmem:[#allocation2 + $0x84] sm:$0xe] }
 0x25a   : > { %v3069_v60 = vrot.slane %v5576_v39, 1  ;;  %v3072_v59 = vrot.slane %v5577_v21, 1  ;;  %v2407_v55 = vshrl.u32 %v7436_v25, 16  ;;  %v2594_v39 = vrot.slane %v6611_v1, 1  ;;  %v7910_v25 = vld [vmem:[#allocation2 + $0xd0] sm:$0xf] }
 0x25b   : > { %v7877_v30 = vsel %vm2101_vm7, %v3060_v61, %v3061_v3  ;;  %v2885_v3 = vshll.u32 %v7820_v40, 16  ;;  %v7893_v56 = vsel %vm2101_vm7, %v3066_v43, %v3067_v13  ;;  %v2414_v61 = vshll.u32 %v7769_v0, 16 }
 0x25c   : > { %v7903_v10 = vsel %vm2101_vm7, %v3072_v59, %v3073_v5  ;;  %v2412_v20 = vor.u32 %v7798_v38, %v2407_v55  ;;  %v2593_v13 = vrot.slane %v8722_v53, 1  ;;  %v2881_v0 = vsel %vm1844_vm6, %v2876_v57, %v2880_v32  ;;  %v6672_v5 = vld [vmem:[#allocation2 + $0x88] sm:$0xf] }
 0x25d   : > { %v2883_v43 = vshrl.u32 %v7820_v40, 16  ;;  %v7915_v21 = vcombine.low %v1656_v49, %v1657_v19  ;;  %v2416_v38 = vrot.slane %v2414_v61, 1  ;;  %v2423_v63 = vrot.slane %v2421_v16, 1  ;;  %v6614_v49 = vld [vmem:[#allocation2 + $0x8c] ss:$0 sps:$4 sm:$0x11]  }
 0x25e   : > { %4081 = vmatmul.mubr.bf16.gmra.mrb[92].mxu1 %v7803_v48  ;;  %v7900_v48 = vsel %vm2101_vm7, %v3069_v60, %v3070_v44  ;;  %v2887_v44 = vrot.slane %v2885_v3, 1  ;;  %v7917_v60 = vld [vmem:[#allocation2 + $0xd4] ss:$0 sps:$4 sm:$0x11]   ;;  %v2426_v59 = vshll.u32 %v6611_v1, 16  ;;  %v5578_v57 = vcombine.low %v1699_v62, %v7910_v25 }
 0x25f   : > { %4088 = vmatprep.mubr.bf16.mxu1 %v7794_v4  ;;  %v2890_v4 = vshll.u32 %v7810_v31, 16  ;;  %v7922_v31 = vld [vmem:[%s8679_s10] sm:$0xff]   ;;  %v3076_v19 = vrot.slane %v7917_v60, 1  ;;  %v2417_v3 = vsel %vm1844_vm6, %v2412_v20, %v2416_v38  ;;  %v2595_v55 = vsel %vm2101_vm7, %v2593_v13, %v2594_v39  ;;  %v1658_v38 = vld [vmem:[#allocation2 + $0x9c] sm:$0xf] }
 0x260   : > { %4242 = vmatmul.mubr.bf16.gmra.mrb[124].mxu0 %v7753_v35  ;;  %v5525_v35 = vcombine.low %v1629_v8, %v6672_v5  ;;  %v2419_v16 = vshrl.u32 %v7470_v36, 16  ;;  %6419 = vmatprep.subr.bf16.mxu1 %v7922_v31  ;;  %v2897_v1 = vshll.u32 %v7915_v21, 16  ;;  %v3075_v62 = vrot.slane %v5578_v57, 1 }
 0x261   : > { %4249 = vmatprep.mubr.bf16.mxu0 %v2881_v0  ;;  %v2892_v61 = vrot.slane %v2890_v4, 1  ;;  %v2888_v0 = vor.u32 %v2887_v44, %v2883_v43  ;;  %v2428_v39 = vrot.slane %v2426_v59, 1  ;;  %v2597_v44 = vrot.slane %v6614_v49, 1 }
 0x262   : > { %v2424_v20 = vor.u32 %v2423_v63, %v2419_v16  ;;  %v7936_v33 = vsel %vm2101_vm7, %v3075_v62, %v3076_v19  ;;  %v2596_v43 = vrot.slane %v5525_v35, 1  ;;  %v2902_v57 = vshll.u32 %v7816_v18, 16  ;;  %v6673_v16 = vld [vmem:[#allocation2 + $0x94] sm:$0xf] }
 0x263   : > { %v2893_v63 = vsel %vm1844_vm6, %v2888_v0, %v2892_v61  ;;  %v7943_v59 = vcombine.low %v1658_v38, %v7848_v22  ;;  %v2431_v35 = vshrl.u32 %v7504_v14, 16  ;;  %v2435_v19 = vrot.slane %v2433_v37, 1  ;;  %v1631_v14 = vld [vmem:[#allocation2 + $0x9c] sm:$0xe] }
 0x264   : > { %v2429_v18 = vsel %vm1844_vm6, %v2424_v20, %v2428_v39  ;;  %v2904_v0 = vrot.slane %v2902_v57, 1  ;;  %v2914_v20 = vshll.u32 %v7822_v54, 16  ;;  %v6674_v57 = vld [vmem:[#allocation2 + $0xa0] sm:$0xf] }
 0x265   : > { %v2909_v22 = vshll.u32 %v7943_v59, 16  ;;  %v2436_v62 = vor.u32 %v2435_v19, %v2431_v35  ;;  %v2907_v39 = vshrl.u32 %v7943_v59, 16 }
 0x266   : > { %v5865_v32 = vpop.f32.mrb[32].mxu0  ;;  %4089 = vmatmul.mubr.bf16.gmra.mrb[96].mxu1 %v2417_v3  ;;  %v1630_v3 = vld [vmem:[#allocation2 + $0x90] sm:$0xe] }
 0x267   : > { %v5866_v53 = vpop.f32.mrb[33].mxu0  ;;  %4096 = vmatprep.mubr.bf16.mxu1 %v2595_v55  ;;  %v2899_v55 = vrot.slane %v2897_v1, 1  ;;  %v2445_v1 = vshll.u32 %v7546_v17, 16 }
 0x268   : > { %v5867_v8 = vadd.f32 %v5866_v53, %v5865_v32  ;;  %v5868_v5 = vpop.f32.mrb[34].mxu0  ;;  %v2895_v32 = vshrl.u32 %v7915_v21, 16  ;;  %4250 = vmatmul.mubr.bf16.gmra.mrb[128].mxu0 %v7780_v6  ;;  %v5526_v53 = vcombine.low %v1630_v3, %v6673_v16  ;;  %v2598_v6 = vsel %vm2101_vm7, %v2596_v43, %v2597_v44 }
 0x269   : > { %v5869_v13 = vpop.f32.mrb[35].mxu0  ;;  %4257 = vmatprep.mubr.bf16.mxu0 %v2893_v63  ;;  %v5527_v3 = vcombine.low %v1631_v14, %v6674_v57  ;;  %v2443_v63 = vshrl.u32 %v7546_v17, 16  ;;  %v2457_v17 = vshll.u32 %v7578_v15, 16 }
 0x26a   : > { %v7933_v36 = vadd.f32 %v5867_v8, %v7705_v23  ;;  %v5870_v4 = vadd.f32 %v5869_v13, %v5868_v5  ;;  %v2438_v8 = vshll.u32 %v6614_v49, 16  ;;  %v6618_v5 = vld [vmem:[#allocation2 + $0x98] ss:$0 sps:$4 sm:$0x11]   ;;  %v2900_v61 = vor.u32 %v2899_v55, %v2895_v32 }
 0x26b   : > { %v2599_v38 = vrot.slane %v5526_v53, 1  ;;  %v2600_v13 = vrot.slane %v6618_v5, 1  ;;  %v2447_v55 = vrot.slane %v2445_v1, 1  ;;  %v2450_v16 = vshll.u32 %v6618_v5, 16 }
 0x26c   : > { %v7946_v23 = vadd.f32 %v5870_v4, %v7719_v26  ;;  %v1660_v26 = vld [vmem:[#allocation2 + $0xa8] sm:$0xf]  ;;  %v2440_v37 = vrot.slane %v2438_v8, 1  ;;  %v2905_v49 = vsel %vm1844_vm6, %v2900_v61, %v2904_v0  ;;  %v2911_v4 = vrot.slane %v2909_v22, 1  ;;  %v1662_v22 = vld [vmem:[#allocation2 + $0xb4] sm:$0xf] }
 0x26d   : > { %v7958_v43 = vcombine.low %v1660_v26, %v7854_v46  ;;  %v2601_v19 = vsel %vm2101_vm7, %v2599_v38, %v2600_v13  ;;  %v6621_v53 = vld [vmem:[#allocation2 + $0xa4] ss:$0 sps:$4 sm:$0x11]   ;;  %v2916_v8 = vrot.slane %v2914_v20, 1  ;;  %v2448_v26 = vor.u32 %v2447_v55, %v2443_v63 }
 0x26e   : > { %4097 = vmatmul.mubr.bf16.gmra.mrb[100].mxu1 %v2429_v18  ;;  %v2912_v46 = vor.u32 %v2911_v4, %v2907_v39  ;;  %v2602_v1 = vrot.slane %v5527_v3, 1  ;;  %v2926_v5 = vshll.u32 %v7828_v51, 16  ;;  %v2455_v55 = vshrl.u32 %v7578_v15, 16 }
 0x26f   : > { %4104 = vmatprep.mubr.bf16.mxu1 %v2598_v6  ;;  %v2921_v6 = vshll.u32 %v7958_v43, 16  ;;  %v2919_v39 = vshrl.u32 %v7958_v43, 16 }
 0x270   : > { %4258 = vmatmul.mubr.bf16.gmra.mrb[132].mxu0 %v7820_v40  ;;  %v2441_v40 = vsel %vm1844_vm6, %v2436_v62, %v2440_v37  ;;  %v2452_v62 = vrot.slane %v2450_v16, 1  ;;  %v2603_v37 = vrot.slane %v6621_v53, 1  ;;  %v2917_v20 = vsel %vm1844_vm6, %v2912_v46, %v2916_v8  ;;  %v6675_v16 = vld [vmem:[#allocation2 + $0xac] sm:$0xf] }
 0x271   : > { %4265 = vmatprep.mubr.bf16.mxu0 %v2905_v49  ;;  %v1632_v49 = vld [vmem:[#allocation2 + $0xa8] sm:$0xe]  ;;  %v2923_v4 = vrot.slane %v2921_v6, 1  ;;  %v6625_v6 = vld [vmem:[#allocation2 + $0xb0] ss:$0 sps:$4 sm:$0x11]  }
 0x272   : > { %v2453_v46 = vsel %vm1844_vm6, %v2448_v26, %v2452_v62  ;;  %v2604_v8 = vsel %vm2101_vm7, %v2602_v1, %v2603_v37  ;;  %v1633_v62 = vld [vmem:[#allocation2 + $0xb4] sm:$0xe]  ;;  %v2938_v37 = vshll.u32 %v7835_v34, 16 }
 0x273   : > { %v5759_v44 = vpop.f32.mrb[4].mxu1 }
 0x274   : > { %v5760_v32 = vpop.f32.mrb[5].mxu1 }
 0x275   : > { %v5761_v35 = vadd.f32 %v5760_v32, %v5759_v44  ;;  %v5762_v54 = vpop.f32.mrb[6].mxu1  ;;  %v7970_v32 = vcombine.low %v1662_v22, %v7862_v47  ;;  %v2928_v22 = vrot.slane %v2926_v5, 1 }
 0x276   : > { %v5763_v18 = vpop.f32.mrb[7].mxu1  ;;  %4105 = vmatmul.mubr.bf16.gmra.mrb[104].mxu1 %v2441_v40  ;;  %v2462_v40 = vshll.u32 %v6621_v53, 16 }
 0x277   : > { %v5764_v61 = vadd.f32 %v5763_v18, %v5762_v54  ;;  %4112 = vmatprep.mubr.bf16.mxu1 %v2601_v19  ;;  %v2459_v54 = vrot.slane %v2457_v17, 1  ;;  %v5528_v18 = vcombine.low %v1632_v49, %v6675_v16  ;;  %v1664_v17 = vld [vmem:[#allocation2 + $0xc0] sm:$0xf] }
 0x278   : > { %v5871_v0 = vpop.f32.mrb[36].mxu0  ;;  %4266 = vmatmul.mubr.bf16.gmra.mrb[136].mxu0 %v7915_v21  ;;  %v2464_v49 = vrot.slane %v2462_v40, 1 }
 0x279   : > { %v5872_v14 = vpop.f32.mrb[37].mxu0  ;;  %4273 = vmatprep.mubr.bf16.mxu0 %v2917_v20  ;;  %v2605_v1 = vrot.slane %v5528_v18, 1 }
 0x27a   : > { %v5873_v38 = vadd.f32 %v5872_v14, %v5871_v0  ;;  %v5874_v13 = vpop.f32.mrb[38].mxu0  ;;  %v2933_v14 = vshll.u32 %v7970_v32, 16 }
 0x27b   : > { %v5875_v44 = vpop.f32.mrb[39].mxu0  ;;  %v5765_v57 = vpop.f32.mrb[8].mxu1 }
 0x27c   : > { %v7972_v3 = vadd.f32 %v5873_v38, %v5761_v35  ;;  %v5876_v63 = vadd.f32 %v5875_v44, %v5874_v13  ;;  %v5766_v51 = vpop.f32.mrb[9].mxu1  ;;  %v2924_v35 = vor.u32 %v2923_v4, %v2919_v39  ;;  %v2469_v38 = vshll.u32 %v7599_v42, 16 }
 0x27d   : > { %v5767_v21 = vadd.f32 %v5766_v51, %v5765_v57  ;;  %v5768_v19 = vpop.f32.mrb[10].mxu1  ;;  %v2460_v13 = vor.u32 %v2459_v54, %v2455_v55  ;;  %v2931_v39 = vshrl.u32 %v7970_v32, 16  ;;  %v2935_v4 = vrot.slane %v2933_v14, 1  ;;  %v6676_v54 = vld [vmem:[#allocation2 + $0xb8] sm:$0xf] }
 0x27e   : > { %v7977_v47 = vadd.f32 %v5876_v63, %v5764_v61  ;;  %v5769_v0 = vpop.f32.mrb[11].mxu1  ;;  %4113 = vmatmul.mubr.bf16.gmra.mrb[108].mxu1 %v2453_v46  ;;  %v2606_v61 = vrot.slane %v6625_v6, 1  ;;  %v2929_v5 = vsel %vm1844_vm6, %v2924_v35, %v2928_v22  ;;  %v7986_v63 = vcombine.low %v1664_v17, %v7869_v29  ;;  %v1634_v14 = vld [vmem:[#allocation2 + $0xc0] sm:$0xe] }
 0x27f   : > { %v5770_v15 = vadd.f32 %v5769_v0, %v5768_v19  ;;  %4120 = vmatprep.mubr.bf16.mxu1 %v2604_v8  ;;  %v5529_v40 = vcombine.low %v1633_v62, %v6676_v54  ;;  %v2465_v34 = vsel %vm1844_vm6, %v2460_v13, %v2464_v49  ;;  %v6628_v19 = vld [vmem:[#allocation2 + $0xbc] ss:$0 sps:$4 sm:$0x11]   ;;  %v2471_v18 = vrot.slane %v2469_v38, 1  ;;  %v1666_v8 = vld [vmem:[#allocation2 + $0xcc] sm:$0xf] }
 0x280   : > { %v5877_v53 = vpop.f32.mrb[40].mxu0  ;;  %4274 = vmatmul.mubr.bf16.gmra.mrb[140].mxu0 %v7943_v59  ;;  %v2467_v59 = vshrl.u32 %v7599_v42, 16  ;;  %v2474_v46 = vshll.u32 %v6625_v6, 16  ;;  %v2607_v29 = vsel %vm2101_vm7, %v2605_v1, %v2606_v61  ;;  %v2936_v0 = vor.u32 %v2935_v4, %v2931_v39  ;;  %v6653_v13 = vld [vmem:[%s8676_s7] sm:$0xff]  }
 0x281   : > { %v5878_v26 = vpop.f32.mrb[41].mxu0  ;;  %4281 = vmatprep.mubr.bf16.mxu0 %v2929_v5  ;;  %v2940_v35 = vrot.slane %v2938_v37, 1  ;;  %v2481_v22 = vshll.u32 %v7611_v24, 16  ;;  %v2608_v42 = vrot.slane %v5529_v40, 1  ;;  %v2609_v38 = vrot.slane %v6628_v19, 1  ;;  %6335 = vmatprep.subr.bf16.mxu0 %v6653_v13 }
 0x282   : > { %v5879_v20 = vadd.f32 %v5878_v26, %v5877_v53  ;;  %v5880_v44 = vpop.f32.mrb[42].mxu0  ;;  %v7998_v53 = vcombine.low %v1666_v8, %v7910_v25  ;;  %v2476_v17 = vrot.slane %v2474_v46, 1  ;;  %v2943_v26 = vshrl.u32 %v7986_v63, 16  ;;  %6336 = vmatpush3.bf16.msra.mxu0 %v6653_v13 }
 0x283   : > { %v5881_v57 = vpop.f32.mrb[43].mxu0  ;;  %v2941_v49 = vsel %vm1844_vm6, %v2936_v0, %v2940_v35  ;;  %v2950_v1 = vshll.u32 %v7842_v50, 16  ;;  %v2479_v4 = vshrl.u32 %v7611_v24, 16  ;;  %v2483_v40 = vrot.slane %v2481_v22, 1 }
 0x284   : > { %v7988_v51 = vadd.f32 %v5879_v20, %v5767_v21  ;;  %v5882_v55 = vadd.f32 %v5881_v57, %v5880_v44  ;;  %v2945_v21 = vshll.u32 %v7986_v63, 16  ;;  %v6677_v20 = vld [vmem:[#allocation2 + $0xc4] sm:$0xf]  ;;  %v2486_v50 = vshll.u32 %v6628_v19, 16 }
 0x285   : > { %v5530_v44 = vcombine.low %v1634_v14, %v6677_v20  ;;  %v2962_v24 = vshll.u32 %v7917_v60, 16  ;;  %v2955_v14 = vshrl.u32 %v7998_v53, 16  ;;  %v2493_v19 = vshll.u32 %v7622_v9, 16 }
 0x286   : > { %v7991_v16 = vadd.f32 %v5882_v55, %v5770_v15  ;;  %4121 = vmatmul.mubr.bf16.gmra.mrb[112].mxu1 %v2465_v34  ;;  %v2472_v15 = vor.u32 %v2471_v18, %v2467_v59  ;;  %v2947_v62 = vrot.slane %v2945_v21, 1  ;;  %v2610_v34 = vsel %vm2101_vm7, %v2608_v42, %v2609_v38 }
 0x287   : > { %4128 = vmatprep.mubr.bf16.mxu1 %v2607_v29  ;;  %v2952_v18 = vrot.slane %v2950_v1, 1  ;;  %v6632_v29 = vld [vmem:[#allocation2 + $0xc8] ss:$0 sps:$4 sm:$0x11]   ;;  %v2484_v22 = vor.u32 %v2483_v40, %v2479_v4  ;;  %v2611_v13 = vrot.slane %v5530_v44, 1  ;;  %v2964_v20 = vrot.slane %v2962_v24, 1 }
 0x288   : > { %4282 = vmatmul.mubr.bf16.gmra.mrb[144].mxu0 %v7958_v43  ;;  %v2957_v43 = vshll.u32 %v7998_v53, 16  ;;  %v2477_v57 = vsel %vm1844_vm6, %v2472_v15, %v2476_v17  ;;  %v2948_v59 = vor.u32 %v2947_v62, %v2943_v26  ;;  %v2488_v17 = vrot.slane %v2486_v50, 1  ;;  %v6678_v40 = vld [vmem:[#allocation2 + $0x1c] sm:$0xf] }
 0x289   : > { %v5771_v6 = vpop.f32.mrb[12].mxu1  ;;  %4289 = vmatprep.mubr.bf16.mxu0 %v2941_v49  ;;  %v2612_v49 = vrot.slane %v6632_v29, 1  ;;  %v2495_v4 = vrot.slane %v2493_v19, 1 }
 0x28a   : > { %v5772_v25 = vpop.f32.mrb[13].mxu1  ;;  %v2959_v15 = vrot.slane %v2957_v43, 1  ;;  %v2953_v38 = vsel %vm1844_vm6, %v2948_v59, %v2952_v18  ;;  %v2498_v43 = vshll.u32 %v6632_v29, 16  ;;  %v6654_v29 = vld [vmem:[%s8676_s7 + $0x8] sm:$0xff]  }
 0x28b   : > { %v5773_v61 = vadd.f32 %v5772_v25, %v5771_v6  ;;  %v5774_v37 = vpop.f32.mrb[14].mxu1  ;;  %v2613_v44 = vsel %vm2101_vm7, %v2611_v13, %v2612_v49  ;;  %6337 = vmatprep.subr.bf16.mxu0 %v6654_v29  ;;  %v6680_v13 = vld [vmem:[#allocation2 + $0x28] sm:$0xf] }
 0x28c   : > { %v5775_v39 = vpop.f32.mrb[15].mxu1  ;;  %6338 = vmatpush3.bf16.msra.mxu0 %v6654_v29  ;;  %v6655_v29 = vld [vmem:[%s8676_s7 + $0x10] sm:$0xff]  }
 0x28d   : > { %v5883_v5 = vpop.f32.mrb[44].mxu0  ;;  %v5776_v54 = vadd.f32 %v5775_v39, %v5774_v37  ;;  %v2960_v37 = vor.u32 %v2959_v15, %v2955_v14  ;;  %6339 = vmatprep.subr.bf16.mxu0 %v6655_v29 }
 0x28e   : > { %v5884_v55 = vpop.f32.mrb[45].mxu0  ;;  %4129 = vmatmul.mubr.bf16.gmra.mrb[116].mxu1 %v2477_v57  ;;  %v1684_v57 = vld [vmem:[#allocation2 + $0x18] sm:$0xe] }
 0x28f   : > { %v5885_v46 = vadd.f32 %v5884_v55, %v5883_v5  ;;  %v5886_v8 = vpop.f32.mrb[46].mxu0  ;;  %4136 = vmatprep.mubr.bf16.mxu1 %v2610_v34  ;;  %v2489_v5 = vsel %vm1844_vm6, %v2484_v22, %v2488_v17  ;;  %v5563_v50 = vcombine.low %v1684_v57, %v6678_v40  ;;  %v2965_v18 = vsel %vm1844_vm6, %v2960_v37, %v2964_v20  ;;  %v1685_v22 = vld [vmem:[#allocation2 + $0x24] sm:$0xe]  ;;  %v6681_v20 = vld [vmem:[#allocation2 + $0x2c] ss:$0 sps:$4 sm:$0x11]  }
 0x290   : > { %v5887_v0 = vpop.f32.mrb[47].mxu0  ;;  %4290 = vmatmul.mubr.bf16.gmra.mrb[148].mxu0 %v7970_v32  ;;  %v5564_v49 = vcombine.low %v1685_v22, %v6680_v13  ;;  %v8040_v57 = vld [vmem:[%s8679_s10 + $0x8] sm:$0xff]  }
 0x291   : > { %v8012_v35 = vadd.f32 %v5885_v46, %v5773_v61  ;;  %v5888_v21 = vadd.f32 %v5887_v0, %v5886_v8  ;;  %v5777_v42 = vpop.f32.mrb[16].mxu1  ;;  %4297 = vmatprep.mubr.bf16.mxu0 %v2953_v38  ;;  %v2491_v61 = vshrl.u32 %v7622_v9, 16  ;;  %v2500_v8 = vrot.slane %v2498_v43, 1  ;;  %6340 = vmatpush3.bf16.msra.mxu0 %v6655_v29 }
 0x292   : > { %v5778_v60 = vpop.f32.mrb[17].mxu1  ;;  %v3030_v24 = vrot.slane %v5563_v50, 1  ;;  %v3033_v37 = vrot.slane %v5564_v49, 1 }
 0x293   : > { %v8018_v6 = vadd.f32 %v5888_v21, %v5776_v54  ;;  %v5779_v26 = vadd.f32 %v5778_v60, %v5777_v42  ;;  %v5780_v62 = vpop.f32.mrb[18].mxu1  ;;  %v2496_v46 = vor.u32 %v2495_v4, %v2491_v61  ;;  %v6679_v21 = vld [vmem:[#allocation2 + $0x20] ss:$0 sps:$4 sm:$0x11]  }
 0x294   : > { %v5781_v25 = vpop.f32.mrb[19].mxu1  ;;  %v3031_v14 = vrot.slane %v6679_v21, 1 }
 0x295   : > { %v5889_v1 = vpop.f32.mrb[48].mxu0  ;;  %v5782_v32 = vadd.f32 %v5781_v25, %v5780_v62  ;;  %v2501_v17 = vsel %vm1844_vm6, %v2496_v46, %v2500_v8 }
 0x296   : > { %v5890_v39 = vpop.f32.mrb[49].mxu0  ;;  %4137 = vmatmul.mubr.bf16.gmra.mrb[120].mxu1 %v2489_v5  ;;  %v3034_v5 = vrot.slane %v6681_v20, 1 }
 0x297   : > { %v5891_v55 = vadd.f32 %v5890_v39, %v5889_v1  ;;  %v5892_v54 = vpop.f32.mrb[50].mxu0  ;;  %4144 = vmatprep.mubr.bf16.mxu1 %v2613_v44 }
 0x298   : > { %v5893_v34 = vpop.f32.mrb[51].mxu0  ;;  %4298 = vmatmul.mubr.bf16.gmra.mrb[152].mxu0 %v7986_v63  ;;  %v3032_v63 = vsel %vm2101_vm7, %v3030_v24, %v3031_v14 }
 0x299   : > { %v8023_v59 = vadd.f32 %v5891_v55, %v5779_v26  ;;  %v5894_v9 = vadd.f32 %v5893_v34, %v5892_v54  ;;  %4305 = vmatprep.mubr.bf16.mxu0 %v2965_v18  ;;  %v3035_v55 = vsel %vm2101_vm7, %v3033_v37, %v3034_v5 }
 0x29b   : > { %v8030_v0 = vadd.f32 %v5894_v9, %v5782_v32  ;;  %v5783_v15 = vpop.f32.mrb[20].mxu1 }
 0x29c   : > { %v5784_v19 = vpop.f32.mrb[21].mxu1 }
 0x29d   : > { %v5785_v42 = vadd.f32 %v5784_v19, %v5783_v15  ;;  %v5786_v38 = vpop.f32.mrb[22].mxu1 }
 0x29e   : > { %4145 = vmatmul.mubr.bf16.gmra.mrb[124].mxu1 %v2501_v17  ;;  %v5787_v60 = vpop.f32.mrb[23].mxu1 }
 0x29f   : > { %6303 = vmatprep.mubr.bf16.mxu1 %v3032_v63  ;;  %v5788_v62 = vadd.f32 %v5787_v60, %v5786_v38 }
 0x2a0   : > { %v5895_v26 = vpop.f32.mrb[52].mxu0  ;;  %4306 = vmatmul.mubr.bf16.gmra.mrb[156].mxu0 %v7998_v53 }
 0x2a1   : > { %v5896_v1 = vpop.f32.mrb[53].mxu0 }
 0x2a2   : > { %v5897_v25 = vadd.f32 %v5896_v1, %v5895_v26  ;;  %v5898_v61 = vpop.f32.mrb[54].mxu0 }
 0x2a3   : > { %v5899_v39 = vpop.f32.mrb[55].mxu0 }
 0x2a4   : > { %v8035_v32 = vadd.f32 %v5897_v25, %v5785_v42  ;;  %v5900_v4 = vadd.f32 %v5899_v39, %v5898_v61  ;;  %v5789_v43 = vpop.f32.mrb[24].mxu1 }
 0x2a5   : > { %v5790_v54 = vpop.f32.mrb[25].mxu1 }
 0x2a6   : > { %v8042_v44 = vadd.f32 %v5900_v4, %v5788_v62  ;;  %6304 = vmatmul.mubr.bf16.vlgmr.msra.gmra.mrb[128].mxu1 %v3035_v55  ;;  %v5791_v40 = vadd.f32 %v5790_v54, %v5789_v43  ;;  %v5792_v50 = vpop.f32.mrb[26].mxu1 }
 0x2a7   : > { %6307 = vmatprep.mubr.bf16.mxu1 %v7825_v2  ;;  %v5793_v34 = vpop.f32.mrb[27].mxu1  ;;  %6421 = vmatpush3.bf16.msra.mxu1 %v7922_v31 }
 0x2a8   : > { %v5901_v53 = vpop.f32.mrb[56].mxu0  ;;  %v5794_v18 = vadd.f32 %v5793_v34, %v5792_v50  ;;  %6420 = vmatprep.subr.bf16.mxu1 %v8040_v57 }
 0x2a9   : > { %v5902_v9 = vpop.f32.mrb[57].mxu0 }
 0x2aa   : > { %v5903_v46 = vadd.f32 %v5902_v9, %v5901_v53  ;;  %v5904_v8 = vpop.f32.mrb[58].mxu0 }
 0x2ab   : > { %v5905_v24 = vpop.f32.mrb[59].mxu0  ;;  %6422 = vmatpush3.bf16.msra.mxu1 %v8040_v57 }
 0x2ac   : > { %v8051_v21 = vadd.f32 %v5903_v46, %v5791_v40  ;;  %v5906_v14 = vadd.f32 %v5905_v24, %v5904_v8 }
 0x2ae   : > { %v8054_v2 = vadd.f32 %v5906_v14, %v5794_v18  ;;  %6308 = vmatmul.mubr.bf16.gmra.mrb[132].mxu1 %v7831_v12 }
 0x2af   : > { %6311 = vmatprep.mubr.bf16.mxu1 %v7838_v7  ;;  %v6656_v7 = vld [vmem:[%s8676_s7 + $0x18] sm:$0xff]  }
 0x2b0   : > { %v5907_v15 = vpop.f32.mrb[60].mxu0  ;;  %6341 = vmatprep.subr.bf16.mxu0 %v6656_v7 }
 0x2b1   : > { %v5795_v19 = vpop.f32.mrb[28].mxu1  ;;  %v5908_v22 = vpop.f32.mrb[61].mxu0  ;;  %6342 = vmatpush3.bf16.msra.mxu0 %v6656_v7 }
 0x2b2   : > { %v5796_v17 = vpop.f32.mrb[29].mxu1  ;;  %v5909_v42 = vadd.f32 %v5908_v22, %v5907_v15  ;;  %v5910_v38 = vpop.f32.mrb[62].mxu0 }
 0x2b3   : > { %v5797_v13 = vadd.f32 %v5796_v17, %v5795_v19  ;;  %v5798_v49 = vpop.f32.mrb[30].mxu1  ;;  %v5911_v63 = vpop.f32.mrb[63].mxu0 }
 0x2b4   : > { %v5799_v60 = vpop.f32.mrb[31].mxu1  ;;  %v5912_v26 = vadd.f32 %v5911_v63, %v5910_v38 }
 0x2b5   : > { %v8058_v62 = vadd.f32 %v5909_v42, %v5797_v13  ;;  %v5800_v1 = vadd.f32 %v5799_v60, %v5798_v49  ;;  %v6657_v42 = vld [vmem:[%s8676_s7 + $0x20] sm:$0xff]  }
 0x2b6   : > { %6312 = vmatmul.mubr.bf16.gmra.mrb[136].mxu1 %v7845_v45  ;;  %6343 = vmatprep.subr.bf16.mxu0 %v6657_v42 }
 0x2b7   : > { %v8061_v25 = vadd.f32 %v5912_v26, %v5800_v1  ;;  %6315 = vmatprep.mubr.bf16.mxu1 %v7851_v58  ;;  %6344 = vmatpush3.bf16.msra.mxu0 %v6657_v42 }
 0x2b9   : > { %v5801_v12 = vpop.f32.mrb[32].mxu1  ;;  %v5913_v37 = vpop.f32.mrb[64].mxu0 }
 0x2ba   : > { %v5802_v61 = vpop.f32.mrb[33].mxu1  ;;  %v5914_v39 = vpop.f32.mrb[65].mxu0 }
 0x2bb   : > { %v5803_v20 = vadd.f32 %v5802_v61, %v5801_v12  ;;  %v5804_v5 = vpop.f32.mrb[34].mxu1  ;;  %v5915_v4 = vadd.f32 %v5914_v39, %v5913_v37  ;;  %v5916_v55 = vpop.f32.mrb[66].mxu0 }
 0x2bc   : > { %v5805_v43 = vpop.f32.mrb[35].mxu1  ;;  %v5917_v54 = vpop.f32.mrb[67].mxu0 }
 0x2bd   : > { %v5806_v45 = vadd.f32 %v5805_v43, %v5804_v5  ;;  %v8067_v40 = vadd.f32 %v5915_v4, %v5803_v20  ;;  %v5918_v58 = vadd.f32 %v5917_v54, %v5916_v55 }
 0x2be   : > { %6316 = vmatmul.mubr.bf16.gmra.mrb[140].mxu1 %v7857_v52 }
 0x2bf   : > { %6319 = vmatprep.mubr.bf16.mxu1 %v7865_v27  ;;  %v8071_v50 = vadd.f32 %v5918_v58, %v5806_v45 }
 0x2c1   : > { %v5807_v53 = vpop.f32.mrb[36].mxu1 }
 0x2c2   : > { %v5808_v34 = vpop.f32.mrb[37].mxu1  ;;  %v5919_v18 = vpop.f32.mrb[68].mxu0 }
 0x2c3   : > { %v5809_v9 = vadd.f32 %v5808_v34, %v5807_v53  ;;  %v5810_v46 = vpop.f32.mrb[38].mxu1  ;;  %v5920_v8 = vpop.f32.mrb[69].mxu0 }
 0x2c4   : > { %v5811_v29 = vpop.f32.mrb[39].mxu1  ;;  %v5921_v24 = vadd.f32 %v5920_v8, %v5919_v18  ;;  %v5922_v15 = vpop.f32.mrb[70].mxu0  ;;  %v6658_v18 = vld [vmem:[%s8676_s7 + $0x28] sm:$0xff]  }
 0x2c5   : > { %v5812_v14 = vadd.f32 %v5811_v29, %v5810_v46  ;;  %v5923_v19 = vpop.f32.mrb[71].mxu0  ;;  %6345 = vmatprep.subr.bf16.mxu0 %v6658_v18 }
 0x2c6   : > { %6320 = vmatmul.mubr.bf16.gmra.mrb[144].mxu1 %v7872_v11  ;;  %v8074_v22 = vadd.f32 %v5921_v24, %v5809_v9  ;;  %v5924_v52 = vadd.f32 %v5923_v19, %v5922_v15  ;;  %6346 = vmatpush3.bf16.msra.mxu0 %v6658_v18 }
 0x2c7   : > { %6323 = vmatprep.mubr.bf16.mxu1 %v7877_v30 }
 0x2c8   : > { %v8077_v27 = vadd.f32 %v5924_v52, %v5812_v14 }
 0x2c9   : > { %v5813_v17 = vpop.f32.mrb[40].mxu1 }
 0x2ca   : > { %v5814_v38 = vpop.f32.mrb[41].mxu1 }
 0x2cb   : > { %v5815_v13 = vadd.f32 %v5814_v38, %v5813_v17  ;;  %v5816_v49 = vpop.f32.mrb[42].mxu1  ;;  %v5925_v60 = vpop.f32.mrb[72].mxu0 }
 0x2cc   : > { %v5817_v63 = vpop.f32.mrb[43].mxu1  ;;  %v5926_v26 = vpop.f32.mrb[73].mxu0 }
 0x2cd   : > { %v5818_v11 = vadd.f32 %v5817_v63, %v5816_v49  ;;  %v5927_v1 = vadd.f32 %v5926_v26, %v5925_v60  ;;  %v5928_v30 = vpop.f32.mrb[74].mxu0 }
 0x2ce   : > { %6324 = vmatmul.mubr.bf16.gmra.mrb[148].mxu1 %v7884_v41  ;;  %v5929_v12 = vpop.f32.mrb[75].mxu0 }
 0x2cf   : > { %6327 = vmatprep.mubr.bf16.mxu1 %v7893_v56  ;;  %v8084_v7 = vadd.f32 %v5927_v1, %v5815_v13  ;;  %v5930_v61 = vadd.f32 %v5929_v12, %v5928_v30 }
 0x2d1   : > { %v5819_v37 = vpop.f32.mrb[44].mxu1  ;;  %v8086_v5 = vadd.f32 %v5930_v61, %v5818_v11 }
 0x2d2   : > { %v5820_v20 = vpop.f32.mrb[45].mxu1 }
 0x2d3   : > { %v5821_v39 = vadd.f32 %v5820_v20, %v5819_v37  ;;  %v5822_v4 = vpop.f32.mrb[46].mxu1  ;;  %v5931_v55 = vpop.f32.mrb[76].mxu0 }
 0x2d4   : > { %v5823_v43 = vpop.f32.mrb[47].mxu1  ;;  %v5932_v54 = vpop.f32.mrb[77].mxu0 }
 0x2d5   : > { %v5824_v45 = vadd.f32 %v5823_v43, %v5822_v4  ;;  %v5933_v41 = vadd.f32 %v5932_v54, %v5931_v55  ;;  %v5934_v58 = vpop.f32.mrb[78].mxu0  ;;  %v6659_v55 = vld [vmem:[%s8676_s7 + $0x30] sm:$0xff]  }
 0x2d6   : > { %6328 = vmatmul.mubr.bf16.gmra.mrb[152].mxu1 %v7900_v48  ;;  %v5935_v56 = vpop.f32.mrb[79].mxu0  ;;  %6347 = vmatprep.subr.bf16.mxu0 %v6659_v55 }
 0x2d7   : > { %6331 = vmatprep.mubr.bf16.mxu1 %v7903_v10  ;;  %v8090_v53 = vadd.f32 %v5933_v41, %v5821_v39  ;;  %v5936_v34 = vadd.f32 %v5935_v56, %v5934_v58  ;;  %6348 = vmatpush3.bf16.msra.mxu0 %v6659_v55 }
 0x2d9   : > { %v5825_v9 = vpop.f32.mrb[48].mxu1  ;;  %v8095_v8 = vadd.f32 %v5936_v34, %v5824_v45 }
 0x2da   : > { %v5826_v46 = vpop.f32.mrb[49].mxu1 }
 0x2db   : > { %v5827_v29 = vadd.f32 %v5826_v46, %v5825_v9  ;;  %v5828_v24 = vpop.f32.mrb[50].mxu1  ;;  %v5937_v14 = vpop.f32.mrb[80].mxu0  ;;  %v8725_v46 = vld [vmem:[#allocation7_spill] sm:$0xff] }
 0x2dc   : > { %v5829_v48 = vpop.f32.mrb[51].mxu1  ;;  %v5938_v10 = vpop.f32.mrb[81].mxu0 }
 0x2dd   : > { %v5830_v15 = vadd.f32 %v5829_v48, %v5828_v24  ;;  %v5939_v19 = vadd.f32 %v5938_v10, %v5937_v14  ;;  %v5940_v52 = vpop.f32.mrb[82].mxu0  ;;  %v8726_v48 = vld [vmem:[#allocation8_spill] sm:$0xff] }
 0x2de   : > { %6332 = vmatmul.mubr.bf16.gmra.mrb[156].mxu1 %v7936_v33  ;;  %v5941_v17 = vpop.f32.mrb[83].mxu0  ;;  %v8723_v33 = vld [vmem:[#allocation5_spill] sm:$0xff] }
 0x2df   : > { %6391 = vmatprep.mubr.msk.bf16.mxu1 %vm546_vm0, %v6808_v28  ;;  %v8100_v42 = vadd.f32 %v5939_v19, %v5827_v29  ;;  %v5942_v38 = vadd.f32 %v5941_v17, %v5940_v52  ;;  %v8724_v28 = vld [vmem:[#allocation6_spill] sm:$0xff] }
 0x2e1   : > { %v5831_v13 = vpop.f32.mrb[52].mxu1  ;;  %v8102_v63 = vadd.f32 %v5942_v38, %v5830_v15 }
 0x2e2   : > { %v5832_v49 = vpop.f32.mrb[53].mxu1 }
 0x2e3   : > { %v5833_v60 = vadd.f32 %v5832_v49, %v5831_v13  ;;  %v5834_v11 = vpop.f32.mrb[54].mxu1  ;;  %v5943_v1 = vpop.f32.mrb[84].mxu0 }
 0x2e4   : > { %v5835_v26 = vpop.f32.mrb[55].mxu1  ;;  %v5944_v12 = vpop.f32.mrb[85].mxu0 }
 0x2e5   : > { %v5836_v30 = vadd.f32 %v5835_v26, %v5834_v11  ;;  %v5945_v61 = vadd.f32 %v5944_v12, %v5943_v1  ;;  %v5946_v37 = vpop.f32.mrb[86].mxu0  ;;  %v8727_v1 = vld [vmem:[#allocation10_spill] sm:$0xff] }
 0x2e6   : > { %6392 = vmatmul.mubr.msk.bf16.vlgmr.msra.gmra.mrb[160].mxu1 %vm546_vm0, %v8723_v33  ;;  %v5947_v20 = vpop.f32.mrb[87].mxu0  ;;  %v8728_v33 = vld [vmem:[#allocation9_spill] sm:$0xff] }
 0x2e7   : > { %6395 = vmatprep.mubr.msk.bf16.mxu1 %vm546_vm0, %v8724_v28  ;;  %v8108_v39 = vadd.f32 %v5945_v61, %v5833_v60  ;;  %v5948_v4 = vadd.f32 %v5947_v20, %v5946_v37 }
 0x2e9   : > { %v5837_v43 = vpop.f32.mrb[56].mxu1  ;;  %v8113_v54 = vadd.f32 %v5948_v4, %v5836_v30  ;;  %v6660_v4 = vld [vmem:[%s8676_s7 + $0x38] sm:$0xff]  }
 0x2ea   : > { %v5838_v45 = vpop.f32.mrb[57].mxu1  ;;  %6349 = vmatprep.subr.bf16.mxu0 %v6660_v4 }
 0x2eb   : > { %v5839_v41 = vadd.f32 %v5838_v45, %v5837_v43  ;;  %v5840_v58 = vpop.f32.mrb[58].mxu1  ;;  %v5949_v34 = vpop.f32.mrb[88].mxu0  ;;  %6350 = vmatpush3.bf16.msra.mxu0 %v6660_v4 }
 0x2ec   : > { %v5841_v56 = vpop.f32.mrb[59].mxu1  ;;  %v5950_v18 = vpop.f32.mrb[89].mxu0  ;;  %6383 = vmatprep.subr.bf16.mxu0 %v7922_v31 }
 0x2ed   : > { %v5842_v9 = vadd.f32 %v5841_v56, %v5840_v58  ;;  %v5951_v29 = vadd.f32 %v5950_v18, %v5949_v34  ;;  %v5952_v24 = vpop.f32.mrb[90].mxu0 }
 0x2ee   : > { %6396 = vmatmul.mubr.msk.bf16.gmra.mrb[164].mxu1 %vm546_vm0, %v8725_v46  ;;  %v5953_v14 = vpop.f32.mrb[91].mxu0  ;;  %v8729_v46 = vld [vmem:[#allocation11_spill] sm:$0xff] }
 0x2ef   : > { %6399 = vmatprep.mubr.msk.bf16.mxu1 %vm546_vm0, %v8726_v48  ;;  %v8119_v15 = vadd.f32 %v5951_v29, %v5839_v41  ;;  %v5954_v10 = vadd.f32 %v5953_v14, %v5952_v24  ;;  %v8730_v14 = vld [vmem:[#allocation12_spill] sm:$0xff] }
 0x2f1   : > { %v5843_v19 = vpop.f32.mrb[60].mxu1  ;;  %v8121_v17 = vadd.f32 %v5954_v10, %v5842_v9 }
 0x2f2   : > { %v5844_v52 = vpop.f32.mrb[61].mxu1 }
 0x2f3   : > { %v5845_v38 = vadd.f32 %v5844_v52, %v5843_v19  ;;  %v5846_v13 = vpop.f32.mrb[62].mxu1  ;;  %v5955_v60 = vpop.f32.mrb[92].mxu0 }
 0x2f4   : > { %v5847_v49 = vpop.f32.mrb[63].mxu1  ;;  %v5956_v26 = vpop.f32.mrb[93].mxu0 }
 0x2f5   : > { %v5848_v11 = vadd.f32 %v5847_v49, %v5846_v13  ;;  %v5957_v30 = vadd.f32 %v5956_v26, %v5955_v60  ;;  %v5958_v12 = vpop.f32.mrb[94].mxu0 }
 0x2f6   : > { %6400 = vmatmul.mubr.msk.bf16.gmra.mrb[168].mxu1 %vm546_vm0, %v8727_v1  ;;  %v5959_v61 = vpop.f32.mrb[95].mxu0 }
 0x2f7   : > { %6403 = vmatprep.mubr.msk.bf16.mxu1 %vm546_vm0, %v8728_v33  ;;  %v8127_v37 = vadd.f32 %v5957_v30, %v5845_v38  ;;  %v5960_v28 = vadd.f32 %v5959_v61, %v5958_v12  ;;  %v8731_v30 = vld [vmem:[#allocation13_spill] sm:$0xff] }
 0x2f9   : > { %v5977_v20 = vpop.f32.mrb[64].mxu1  ;;  %v8132_v55 = vadd.f32 %v5960_v28, %v5848_v11  ;;  %v8732_v28 = vld [vmem:[#allocation14_spill] sm:$0xff] }
 0x2fa   : > { %v5978_v43 = vpop.f32.mrb[65].mxu1 }
 0x2fb   : > { %v5979_v45 = vadd.f32 %v5978_v43, %v5977_v20  ;;  %v5980_v41 = vpop.f32.mrb[66].mxu1  ;;  %v6089_v34 = vpop.f32.mrb[96].mxu0 }
 0x2fc   : > { %v5981_v58 = vpop.f32.mrb[67].mxu1  ;;  %v6090_v18 = vpop.f32.mrb[97].mxu0 }
 0x2fd   : > { %v4027_v56 = vadd.f32 %v5979_v45, %v7933_v36  ;;  %v5982_v9 = vadd.f32 %v5981_v58, %v5980_v41  ;;  %v6091_v29 = vadd.f32 %v6090_v18, %v6089_v34  ;;  %v6092_v48 = vpop.f32.mrb[98].mxu0 }
 0x2fe   : > { %6404 = vmatmul.mubr.msk.bf16.gmra.mrb[172].mxu1 %vm546_vm0, %v8729_v46  ;;  %v6093_v10 = vpop.f32.mrb[99].mxu0 }
 0x2ff   : > { %v4030_v24 = vadd.f32 %v5982_v9, %v7946_v23  ;;  %6407 = vmatprep.mubr.msk.bf16.mxu1 %vm546_vm0, %v8730_v14  ;;  %v6094_v19 = vadd.f32 %v6093_v10, %v6092_v48  ;;  %v8141_v38 = vadd.f32 %v6091_v29, %v4027_v56  ;;  %v8733_v29 = vld [vmem:[#allocation15_spill] sm:$0xff]  ;;  %v8734_v10 = vld [vmem:[#allocation16_spill] sm:$0xff] }
 0x301   : > { %v5983_v52 = vpop.f32.mrb[68].mxu1  ;;  %v8143_v60 = vadd.f32 %v6094_v19, %v4030_v24 }
 0x302   : > { %v5984_v36 = vpop.f32.mrb[69].mxu1 }
 0x303   : > { %v5985_v13 = vadd.f32 %v5984_v36, %v5983_v52  ;;  %v5986_v49 = vpop.f32.mrb[70].mxu1  ;;  %v6095_v26 = vpop.f32.mrb[100].mxu0 }
 0x304   : > { %v5987_v31 = vpop.f32.mrb[71].mxu1  ;;  %v6096_v23 = vpop.f32.mrb[101].mxu0 }
 0x305   : > { %v4035_v11 = vadd.f32 %v5985_v13, %v7972_v3  ;;  %v5988_v1 = vadd.f32 %v5987_v31, %v5986_v49  ;;  %v6097_v12 = vadd.f32 %v6096_v23, %v6095_v26  ;;  %v6098_v61 = vpop.f32.mrb[102].mxu0 }
 0x306   : > { %6408 = vmatmul.mubr.msk.bf16.gmra.mrb[176].mxu1 %vm546_vm0, %v8731_v30  ;;  %v6099_v20 = vpop.f32.mrb[103].mxu0 }
 0x307   : > { %v4038_v33 = vadd.f32 %v5988_v1, %v7977_v47  ;;  %6411 = vmatprep.mubr.msk.bf16.mxu1 %vm546_vm0, %v8732_v28  ;;  %v6100_v4 = vadd.f32 %v6099_v20, %v6098_v61  ;;  %v8151_v45 = vadd.f32 %v6097_v12, %v4035_v11  ;;  %v8735_v12 = vld [vmem:[#allocation17_spill] sm:$0xff] }
 0x309   : > { %v5989_v43 = vpop.f32.mrb[72].mxu1  ;;  %v8153_v56 = vadd.f32 %v6100_v4, %v4038_v33 }
 0x30a   : > { %v5990_v41 = vpop.f32.mrb[73].mxu1 }
 0x30b   : > { %v5991_v3 = vadd.f32 %v5990_v41, %v5989_v43  ;;  %v5992_v58 = vpop.f32.mrb[74].mxu1  ;;  %v6101_v18 = vpop.f32.mrb[104].mxu0 }
 0x30c   : > { %v5993_v34 = vpop.f32.mrb[75].mxu1  ;;  %v6102_v47 = vpop.f32.mrb[105].mxu0 }
 0x30d   : > { %v4043_v9 = vadd.f32 %v5991_v3, %v7988_v51  ;;  %v5994_v46 = vadd.f32 %v5993_v34, %v5992_v58  ;;  %v6103_v24 = vadd.f32 %v6102_v47, %v6101_v18  ;;  %v6104_v14 = vpop.f32.mrb[106].mxu0 }
 0x30e   : > { %6412 = vmatmul.mubr.msk.bf16.gmra.mrb[180].mxu1 %vm546_vm0, %v8733_v29  ;;  %v6105_v19 = vpop.f32.mrb[107].mxu0 }
 0x30f   : > { %v4046_v48 = vadd.f32 %v5994_v46, %v7991_v16  ;;  %6415 = vmatprep.mubr.msk.bf16.mxu1 %vm546_vm0, %v8734_v10  ;;  %v6106_v52 = vadd.f32 %v6105_v19, %v6104_v14  ;;  %v8161_v13 = vadd.f32 %v6103_v24, %v4043_v9 }
 0x311   : > { %v5995_v36 = vpop.f32.mrb[76].mxu1  ;;  %v8163_v11 = vadd.f32 %v6106_v52, %v4046_v48 }
 0x312   : > { %v5996_v49 = vpop.f32.mrb[77].mxu1 }
 0x313   : > { %v5997_v51 = vadd.f32 %v5996_v49, %v5995_v36  ;;  %v5998_v31 = vpop.f32.mrb[78].mxu1  ;;  %v6107_v23 = vpop.f32.mrb[108].mxu0 }
 0x314   : > { %v5999_v26 = vpop.f32.mrb[79].mxu1  ;;  %v6108_v16 = vpop.f32.mrb[109].mxu0 }
 0x315   : > { %v4051_v1 = vadd.f32 %v5997_v51, %v8012_v35  ;;  %v6000_v30 = vadd.f32 %v5999_v26, %v5998_v31  ;;  %v6109_v33 = vadd.f32 %v6108_v16, %v6107_v23  ;;  %v6110_v28 = vpop.f32.mrb[110].mxu0 }
 0x316   : > { %6416 = vmatmul.mubr.msk.bf16.gmra.mrb[184].mxu1 %vm546_vm0, %v8735_v12  ;;  %v6111_v20 = vpop.f32.mrb[111].mxu0 }
 0x317   : > { %v4054_v61 = vadd.f32 %v6000_v30, %v8018_v6  ;;  %v6112_v4 = vadd.f32 %v6111_v20, %v6110_v28  ;;  %v8169_v41 = vadd.f32 %v6109_v33, %v4051_v1 }
 0x319   : > { %v6001_v43 = vpop.f32.mrb[80].mxu1  ;;  %v8171_v9 = vadd.f32 %v6112_v4, %v4054_v61 }
 0x31a   : > { %v6002_v3 = vpop.f32.mrb[81].mxu1 }
 0x31b   : > { %v6003_v58 = vadd.f32 %v6002_v3, %v6001_v43  ;;  %v6004_v34 = vpop.f32.mrb[82].mxu1  ;;  %v6113_v46 = vpop.f32.mrb[112].mxu0 }
 0x31c   : > { %v6005_v35 = vpop.f32.mrb[83].mxu1  ;;  %v6114_v29 = vpop.f32.mrb[113].mxu0 }
 0x31d   : > { %v4059_v18 = vadd.f32 %v6003_v58, %v8023_v59  ;;  %v6006_v47 = vadd.f32 %v6005_v35, %v6004_v34  ;;  %v6115_v24 = vadd.f32 %v6114_v29, %v6113_v46  ;;  %v6116_v48 = vpop.f32.mrb[114].mxu0 }
 0x31e   : > { %v6117_v14 = vpop.f32.mrb[115].mxu0 }
 0x31f   : > { %v4062_v6 = vadd.f32 %v6006_v47, %v8030_v0  ;;  %v6118_v10 = vadd.f32 %v6117_v14, %v6116_v48  ;;  %v8175_v52 = vadd.f32 %v6115_v24, %v4059_v18 }
 0x321   : > { %v6007_v19 = vpop.f32.mrb[84].mxu1  ;;  %v8177_v31 = vadd.f32 %v6118_v10, %v4062_v6 }
 0x322   : > { %v6008_v36 = vpop.f32.mrb[85].mxu1 }
 0x323   : > { %v6009_v49 = vadd.f32 %v6008_v36, %v6007_v19  ;;  %v6010_v51 = vpop.f32.mrb[86].mxu1  ;;  %v6119_v1 = vpop.f32.mrb[116].mxu0 }
 0x324   : > { %v6011_v26 = vpop.f32.mrb[87].mxu1  ;;  %v6120_v30 = vpop.f32.mrb[117].mxu0 }
 0x325   : > { %v4067_v59 = vadd.f32 %v6009_v49, %v8035_v32  ;;  %v6012_v23 = vadd.f32 %v6011_v26, %v6010_v51  ;;  %v6121_v16 = vadd.f32 %v6120_v30, %v6119_v1  ;;  %v6122_v12 = vpop.f32.mrb[118].mxu0 }
 0x326   : > { %v6123_v33 = vpop.f32.mrb[119].mxu0 }
 0x327   : > { %v4070_v0 = vadd.f32 %v6012_v23, %v8042_v44  ;;  %v6124_v61 = vadd.f32 %v6123_v33, %v6122_v12  ;;  %v8181_v20 = vadd.f32 %v6121_v16, %v4067_v59 }
 0x329   : > { %v6013_v28 = vpop.f32.mrb[88].mxu1  ;;  %v8183_v58 = vadd.f32 %v6124_v61, %v4070_v0 }
 0x32a   : > { %v6014_v4 = vpop.f32.mrb[89].mxu1 }
 0x32b   : > { %v6015_v43 = vadd.f32 %v6014_v4, %v6013_v28  ;;  %v6016_v3 = vpop.f32.mrb[90].mxu1  ;;  %v6125_v35 = vpop.f32.mrb[120].mxu0 }
 0x32c   : > { %v6017_v34 = vpop.f32.mrb[91].mxu1  ;;  %v6126_v46 = vpop.f32.mrb[121].mxu0 }
 0x32d   : > { %v4075_v32 = vadd.f32 %v6015_v43, %v8051_v21  ;;  %v6018_v18 = vadd.f32 %v6017_v34, %v6016_v3  ;;  %v6127_v47 = vadd.f32 %v6126_v46, %v6125_v35  ;;  %v6128_v29 = vpop.f32.mrb[122].mxu0 }
 0x32e   : > { %v6129_v24 = vpop.f32.mrb[123].mxu0 }
 0x32f   : > { %v4078_v44 = vadd.f32 %v6018_v18, %v8054_v2  ;;  %v6130_v6 = vadd.f32 %v6129_v24, %v6128_v29  ;;  %v8187_v14 = vadd.f32 %v6127_v47, %v4075_v32 }
 0x331   : > { %v6019_v48 = vpop.f32.mrb[92].mxu1  ;;  %v8189_v49 = vadd.f32 %v6130_v6, %v4078_v44 }
 0x332   : > { %v6020_v10 = vpop.f32.mrb[93].mxu1 }
 0x333   : > { %v6021_v19 = vadd.f32 %v6020_v10, %v6019_v48  ;;  %v6022_v36 = vpop.f32.mrb[94].mxu1  ;;  %v6131_v26 = vpop.f32.mrb[124].mxu0 }
 0x334   : > { %v6023_v51 = vpop.f32.mrb[95].mxu1  ;;  %v6132_v1 = vpop.f32.mrb[125].mxu0 }
 0x335   : > { %v4083_v21 = vadd.f32 %v6021_v19, %v8058_v62  ;;  %v6024_v59 = vadd.f32 %v6023_v51, %v6022_v36  ;;  %v6133_v23 = vadd.f32 %v6132_v1, %v6131_v26  ;;  %v6134_v30 = vpop.f32.mrb[126].mxu0 }
 0x336   : > { %v6135_v16 = vpop.f32.mrb[127].mxu0 }
 0x337   : > { %v4086_v2 = vadd.f32 %v6024_v59, %v8061_v25  ;;  %v6136_v0 = vadd.f32 %v6135_v16, %v6134_v30  ;;  %v8193_v33 = vadd.f32 %v6133_v23, %v4083_v21 }
 0x339   : > { %v6025_v12 = vpop.f32.mrb[96].mxu1  ;;  %v8195_v43 = vadd.f32 %v6136_v0, %v4086_v2 }
 0x33a   : > { %v6026_v61 = vpop.f32.mrb[97].mxu1 }
 0x33b   : > { %v6027_v28 = vadd.f32 %v6026_v61, %v6025_v12  ;;  %v6028_v4 = vpop.f32.mrb[98].mxu1  ;;  %v6137_v34 = vpop.f32.mrb[128].mxu0 }
 0x33c   : > { %v6029_v3 = vpop.f32.mrb[99].mxu1  ;;  %v6138_v35 = vpop.f32.mrb[129].mxu0 }
 0x33d   : > { %v4091_v62 = vadd.f32 %v6027_v28, %v8067_v40  ;;  %v6030_v32 = vadd.f32 %v6029_v3, %v6028_v4  ;;  %v6139_v18 = vadd.f32 %v6138_v35, %v6137_v34  ;;  %v6140_v46 = vpop.f32.mrb[130].mxu0 }
 0x33e   : > { %v6141_v47 = vpop.f32.mrb[131].mxu0 }
 0x33f   : > { %v4094_v25 = vadd.f32 %v6030_v32, %v8071_v50  ;;  %v6142_v44 = vadd.f32 %v6141_v47, %v6140_v46  ;;  %v8199_v24 = vadd.f32 %v6139_v18, %v4091_v62 }
 0x341   : > { %v6031_v29 = vpop.f32.mrb[100].mxu1  ;;  %v8201_v19 = vadd.f32 %v6142_v44, %v4094_v25 }
 0x342   : > { %v6032_v6 = vpop.f32.mrb[101].mxu1 }
 0x343   : > { %v6033_v48 = vadd.f32 %v6032_v6, %v6031_v29  ;;  %v6034_v10 = vpop.f32.mrb[102].mxu1  ;;  %v6143_v51 = vpop.f32.mrb[132].mxu0 }
 0x344   : > { %v6035_v36 = vpop.f32.mrb[103].mxu1  ;;  %v6144_v26 = vpop.f32.mrb[133].mxu0 }
 0x345   : > { %v4099_v40 = vadd.f32 %v6033_v48, %v8074_v22  ;;  %v6036_v21 = vadd.f32 %v6035_v36, %v6034_v10  ;;  %v6145_v59 = vadd.f32 %v6144_v26, %v6143_v51  ;;  %v6146_v1 = vpop.f32.mrb[134].mxu0 }
 0x346   : > { %v6147_v23 = vpop.f32.mrb[135].mxu0 }
 0x347   : > { %v4102_v50 = vadd.f32 %v6036_v21, %v8077_v27  ;;  %v6148_v2 = vadd.f32 %v6147_v23, %v6146_v1  ;;  %v8205_v16 = vadd.f32 %v6145_v59, %v4099_v40 }
 0x349   : > { %v6037_v30 = vpop.f32.mrb[104].mxu1  ;;  %v8207_v28 = vadd.f32 %v6148_v2, %v4102_v50 }
 0x34a   : > { %v6038_v0 = vpop.f32.mrb[105].mxu1 }
 0x34b   : > { %v6039_v12 = vadd.f32 %v6038_v0, %v6037_v30  ;;  %v6040_v61 = vpop.f32.mrb[106].mxu1  ;;  %v6149_v3 = vpop.f32.mrb[136].mxu0 }
 0x34c   : > { %v6041_v4 = vpop.f32.mrb[107].mxu1  ;;  %v6150_v34 = vpop.f32.mrb[137].mxu0 }
 0x34d   : > { %v4107_v22 = vadd.f32 %v6039_v12, %v8084_v7  ;;  %v6042_v62 = vadd.f32 %v6041_v4, %v6040_v61  ;;  %v6151_v32 = vadd.f32 %v6150_v34, %v6149_v3  ;;  %v6152_v35 = vpop.f32.mrb[138].mxu0 }
 0x34e   : > { %v6153_v18 = vpop.f32.mrb[139].mxu0 }
 0x34f   : > { %v4110_v27 = vadd.f32 %v6042_v62, %v8086_v5  ;;  %v6154_v25 = vadd.f32 %v6153_v18, %v6152_v35  ;;  %v8211_v47 = vadd.f32 %v6151_v32, %v4107_v22 }
 0x351   : > { %v6043_v46 = vpop.f32.mrb[108].mxu1  ;;  %v8213_v48 = vadd.f32 %v6154_v25, %v4110_v27 }
 0x352   : > { %v6044_v44 = vpop.f32.mrb[109].mxu1 }
 0x353   : > { %v6045_v29 = vadd.f32 %v6044_v44, %v6043_v46  ;;  %v6046_v6 = vpop.f32.mrb[110].mxu1  ;;  %v6155_v36 = vpop.f32.mrb[140].mxu0 }
 0x354   : > { %v6047_v10 = vpop.f32.mrb[111].mxu1  ;;  %v6156_v51 = vpop.f32.mrb[141].mxu0 }
 0x355   : > { %v4115_v7 = vadd.f32 %v6045_v29, %v8090_v53  ;;  %v6048_v40 = vadd.f32 %v6047_v10, %v6046_v6  ;;  %v6157_v21 = vadd.f32 %v6156_v51, %v6155_v36  ;;  %v6158_v26 = vpop.f32.mrb[142].mxu0 }
 0x356   : > { %v6159_v59 = vpop.f32.mrb[143].mxu0 }
 0x357   : > { %v4118_v5 = vadd.f32 %v6048_v40, %v8095_v8  ;;  %v6160_v50 = vadd.f32 %v6159_v59, %v6158_v26  ;;  %v8217_v23 = vadd.f32 %v6157_v21, %v4115_v7 }
 0x359   : > { %v6049_v1 = vpop.f32.mrb[112].mxu1  ;;  %v8219_v12 = vadd.f32 %v6160_v50, %v4118_v5 }
 0x35a   : > { %v6050_v2 = vpop.f32.mrb[113].mxu1 }
 0x35b   : > { %v6051_v30 = vadd.f32 %v6050_v2, %v6049_v1  ;;  %v6052_v0 = vpop.f32.mrb[114].mxu1  ;;  %v6161_v4 = vpop.f32.mrb[144].mxu0 }
 0x35c   : > { %v6053_v61 = vpop.f32.mrb[115].mxu1  ;;  %v6162_v3 = vpop.f32.mrb[145].mxu0 }
 0x35d   : > { %v4123_v53 = vadd.f32 %v6051_v30, %v8100_v42  ;;  %v6054_v22 = vadd.f32 %v6053_v61, %v6052_v0  ;;  %v6163_v62 = vadd.f32 %v6162_v3, %v6161_v4  ;;  %v6164_v34 = vpop.f32.mrb[146].mxu0 }
 0x35e   : > { %v6165_v32 = vpop.f32.mrb[147].mxu0 }
 0x35f   : > { %v4126_v8 = vadd.f32 %v6054_v22, %v8102_v63  ;;  %v6166_v27 = vadd.f32 %v6165_v32, %v6164_v34  ;;  %v8223_v18 = vadd.f32 %v6163_v62, %v4123_v53 }
 0x361   : > { %v6055_v35 = vpop.f32.mrb[116].mxu1  ;;  %v8225_v29 = vadd.f32 %v6166_v27, %v4126_v8 }
 0x362   : > { %v6056_v25 = vpop.f32.mrb[117].mxu1 }
 0x363   : > { %v6057_v46 = vadd.f32 %v6056_v25, %v6055_v35  ;;  %v6058_v44 = vpop.f32.mrb[118].mxu1  ;;  %v6167_v10 = vpop.f32.mrb[148].mxu0 }
 0x364   : > { %v6059_v6 = vpop.f32.mrb[119].mxu1  ;;  %v6168_v36 = vpop.f32.mrb[149].mxu0 }
 0x365   : > { %v4131_v42 = vadd.f32 %v6057_v46, %v8108_v39  ;;  %v6060_v7 = vadd.f32 %v6059_v6, %v6058_v44  ;;  %v6169_v40 = vadd.f32 %v6168_v36, %v6167_v10  ;;  %v6170_v51 = vpop.f32.mrb[150].mxu0 }
 0x366   : > { %v6171_v21 = vpop.f32.mrb[151].mxu0 }
 0x367   : > { %v4134_v63 = vadd.f32 %v6060_v7, %v8113_v54  ;;  %v6172_v5 = vadd.f32 %v6171_v21, %v6170_v51  ;;  %v8229_v59 = vadd.f32 %v6169_v40, %v4131_v42  ;;  %v8244_v21 = vld [vmem:[%s8674_s5] ss:$0 sm:$0xff] }
 0x369   : > { %v6061_v26 = vpop.f32.mrb[120].mxu1  ;;  %v8231_v30 = vadd.f32 %v6172_v5, %v4134_v63 }
 0x36a   : > { %v6062_v50 = vpop.f32.mrb[121].mxu1 }
 0x36b   : > { %v6063_v1 = vadd.f32 %v6062_v50, %v6061_v26  ;;  %v6064_v2 = vpop.f32.mrb[122].mxu1  ;;  %v6173_v61 = vpop.f32.mrb[152].mxu0  ;;  %v8252_v50 = vld [vmem:[%s8675_s6] ss:$0 sm:$0xff] }
 0x36c   : > { %v6065_v0 = vpop.f32.mrb[123].mxu1  ;;  %v6174_v4 = vpop.f32.mrb[153].mxu0 }
 0x36d   : > { %v4139_v39 = vadd.f32 %v6063_v1, %v8119_v15  ;;  %v6066_v53 = vadd.f32 %v6065_v0, %v6064_v2  ;;  %v6175_v22 = vadd.f32 %v6174_v4, %v6173_v61  ;;  %v6176_v3 = vpop.f32.mrb[154].mxu0 }
 0x36e   : > { %v6177_v62 = vpop.f32.mrb[155].mxu0 }
 0x36f   : > { %v4142_v54 = vadd.f32 %v6066_v53, %v8121_v17  ;;  %v6178_v8 = vadd.f32 %v6177_v62, %v6176_v3  ;;  %v8235_v32 = vadd.f32 %v6175_v22, %v4139_v39 }
 0x371   : > { %v6067_v34 = vpop.f32.mrb[124].mxu1  ;;  %v8237_v46 = vadd.f32 %v6178_v8, %v4142_v54 }
 0x372   : > { %v6068_v27 = vpop.f32.mrb[125].mxu1 }
 0x373   : > { %v6069_v35 = vadd.f32 %v6068_v27, %v6067_v34  ;;  %v6070_v25 = vpop.f32.mrb[126].mxu1  ;;  %v6179_v6 = vpop.f32.mrb[156].mxu0 }
 0x374   : > { %v6071_v44 = vpop.f32.mrb[127].mxu1  ;;  %v6180_v10 = vpop.f32.mrb[157].mxu0 }
 0x375   : > { %v4147_v15 = vadd.f32 %v6069_v35, %v8127_v37  ;;  %v6072_v42 = vadd.f32 %v6071_v44, %v6070_v25  ;;  %v6181_v17 = vadd.f32 %v6180_v10, %v6179_v6  ;;  %v6182_v36 = vpop.f32.mrb[158].mxu0 }
 0x376   : > { %v6183_v40 = vpop.f32.mrb[159].mxu0 }
 0x377   : > { %v4150_v7 = vadd.f32 %v6072_v42, %v8132_v55  ;;  %v6184_v63 = vadd.f32 %v6183_v40, %v6182_v36  ;;  %v8246_v5 = vadd.f32 %v6181_v17, %v4147_v15 }
 0x379   : > { %v6305_v51 = vpop.f32.mrb[128].mxu1  ;;  %v8255_v2 = vadd.f32 %v6184_v63, %v4150_v7 }
 0x37a   : > { %v4357_v26 = vadd.f32 %v6305_v51, %v8151_v45  ;;  %v4348_v37 = vpop.f32.mrb[129].mxu1 }
 0x37b   : > { %v4349_v55 = vadd.f32 %v4348_v37, %v8141_v38  ;;  %v6306_v1 = vpop.f32.mrb[130].mxu1  ;;  %v6682_v37 = vld [vmem:[%s8679_s10] sm:$0xff]  }
 0x37c   : > { %v4484_v0 = vmul.f32 %v8244_v21, %v4357_v26  ;;  %v4360_v39 = vadd.f32 %v6306_v1, %v8153_v56  ;;  %v4351_v61 = vpop.f32.mrb[131].mxu1 }
 0x37d   : > { %v4482_v53 = vmul.f32 %v8244_v21, %v4349_v55  ;;  %v4352_v45 = vadd.f32 %v4351_v61, %v8143_v60 }
 0x37e   : > { %v4523_v4 = vadd.f32 %v8252_v50, %v4484_v0  ;;  %v4485_v22 = vmul.f32 %v8244_v21, %v4360_v39 }
 0x37f   : > { %v4521_v54 = vadd.f32 %v8252_v50, %v4482_v53  ;;  %v4483_v38 = vmul.f32 %v8244_v21, %v4352_v45 }
 0x380   : > { %v4524_v3 = vadd.f32 %v8252_v50, %v4485_v22  ;;  %v4555_v34 = vmax.f32 %v4523_v4, 0.0 }
 0x381   : > { %v4522_v62 = vadd.f32 %v8252_v50, %v4483_v38  ;;  %v6309_v8 = vpop.f32.mrb[132].mxu1  ;;  %v4553_v25 = vmax.f32 %v4521_v54, 0.0 }
 0x382   : > { %v4556_v56 = vmax.f32 %v4524_v3, 0.0  ;;  %v4373_v27 = vadd.f32 %v6309_v8, %v8169_v41  ;;  %v4364_v35 = vpop.f32.mrb[133].mxu1 }
 0x383   : > { %v4554_v60 = vmax.f32 %v4522_v62, 0.0  ;;  %v4365_v44 = vadd.f32 %v4364_v35, %v8161_v13  ;;  %v6310_v15 = vpop.f32.mrb[134].mxu1 }
 0x384   : > { %v4586_v6 = vpack.c.bf16 %v4556_v56, %v4555_v34  ;;  %v4488_v42 = vmul.f32 %v8244_v21, %v4373_v27  ;;  %v4376_v10 = vadd.f32 %v6310_v15, %v8171_v9  ;;  %v4367_v7 = vpop.f32.mrb[135].mxu1 }
 0x385   : > { %v4486_v17 = vmul.f32 %v8244_v21, %v4365_v44  ;;  %v4368_v36 = vadd.f32 %v4367_v7, %v8163_v11  ;;  %v4585_v40 = vpack.c.bf16 %v4554_v60, %v4553_v25 }
 0x386   : > { %v4527_v63 = vadd.f32 %v8252_v50, %v4488_v42  ;;  %v4489_v41 = vmul.f32 %v8244_v21, %v4376_v10 }
 0x387   : > { %v4525_v51 = vadd.f32 %v8252_v50, %v4486_v17  ;;  %v4487_v13 = vmul.f32 %v8244_v21, %v4368_v36  ;;  %6351 = vmatprep.mubr.bf16.mxu0 %v4585_v40 }
 0x388   : > { %v4528_v26 = vadd.f32 %v8252_v50, %v4489_v41  ;;  %6352 = vmatmul.mubr.bf16.vlgmr.msra.gmra.mrb[160].mxu0 %v4586_v6  ;;  %v4559_v55 = vmax.f32 %v4527_v63, 0.0 }
 0x389   : > { %v4526_v9 = vadd.f32 %v8252_v50, %v4487_v13  ;;  %6384 = vmatpush3.bf16.msra.mxu0 %v6682_v37  ;;  %v6313_v11 = vpop.f32.mrb[136].mxu1  ;;  %v4557_v61 = vmax.f32 %v4525_v51, 0.0 }
 0x38a   : > { %v4560_v1 = vmax.f32 %v4528_v26, 0.0  ;;  %v4389_v0 = vadd.f32 %v6313_v11, %v8181_v20  ;;  %v4380_v39 = vpop.f32.mrb[137].mxu1  ;;  %6385 = vmatprep.subr.bf16.mxu0 %v8040_v57 }
 0x38b   : > { %v4558_v53 = vmax.f32 %v4526_v9, 0.0  ;;  %v4381_v45 = vadd.f32 %v4380_v39, %v8175_v52  ;;  %v6314_v4 = vpop.f32.mrb[138].mxu1 }
 0x38c   : > { %v4492_v22 = vmul.f32 %v8244_v21, %v4389_v0  ;;  %v4392_v54 = vadd.f32 %v6314_v4, %v8183_v58  ;;  %v4383_v38 = vpop.f32.mrb[139].mxu1  ;;  %v4588_v3 = vpack.c.bf16 %v4560_v1, %v4559_v55 }
 0x38d   : > { %v4490_v62 = vmul.f32 %v8244_v21, %v4381_v45  ;;  %v4384_v8 = vadd.f32 %v4383_v38, %v8177_v31  ;;  %v4587_v34 = vpack.c.bf16 %v4558_v53, %v4557_v61  ;;  %6386 = vmatpush3.bf16.msra.mxu0 %v8040_v57 }
 0x38e   : > { %v4531_v20 = vadd.f32 %v8252_v50, %v4492_v22  ;;  %v4493_v56 = vmul.f32 %v8244_v21, %v4392_v54 }
 0x38f   : > { %v4529_v52 = vadd.f32 %v8252_v50, %v4490_v62  ;;  %v4491_v27 = vmul.f32 %v8244_v21, %v4384_v8  ;;  %6355 = vmatprep.mubr.bf16.mxu0 %v4587_v34 }
 0x390   : > { %v4532_v58 = vadd.f32 %v8252_v50, %v4493_v56  ;;  %6356 = vmatmul.mubr.bf16.gmra.mrb[164].mxu0 %v4588_v3  ;;  %v4563_v60 = vmax.f32 %v4531_v20, 0.0 }
 0x391   : > { %v4530_v35 = vadd.f32 %v8252_v50, %v4491_v27  ;;  %v6317_v25 = vpop.f32.mrb[140].mxu1  ;;  %v4561_v15 = vmax.f32 %v4529_v52, 0.0 }
 0x392   : > { %v4564_v31 = vmax.f32 %v4532_v58, 0.0  ;;  %v4405_v44 = vadd.f32 %v6317_v25, %v8193_v33  ;;  %v4396_v57 = vpop.f32.mrb[141].mxu1 }
 0x393   : > { %v4562_v6 = vmax.f32 %v4530_v35, 0.0  ;;  %v4397_v42 = vadd.f32 %v4396_v57, %v8187_v14  ;;  %v6318_v10 = vpop.f32.mrb[142].mxu1 }
 0x394   : > { %v4496_v7 = vmul.f32 %v8244_v21, %v4405_v44  ;;  %v4408_v17 = vadd.f32 %v6318_v10, %v8195_v43  ;;  %v4399_v36 = vpop.f32.mrb[143].mxu1  ;;  %v4590_v40 = vpack.c.bf16 %v4564_v31, %v4563_v60 }
 0x395   : > { %v4494_v63 = vmul.f32 %v8244_v21, %v4397_v42  ;;  %v4400_v41 = vadd.f32 %v4399_v36, %v8189_v49  ;;  %v4589_v51 = vpack.c.bf16 %v4562_v6, %v4561_v15 }
 0x396   : > { %v4535_v13 = vadd.f32 %v8252_v50, %v4496_v7  ;;  %v4497_v33 = vmul.f32 %v8244_v21, %v4408_v17 }
 0x397   : > { %v4533_v26 = vadd.f32 %v8252_v50, %v4494_v63  ;;  %v4495_v14 = vmul.f32 %v8244_v21, %v4400_v41  ;;  %6359 = vmatprep.mubr.bf16.mxu0 %v4589_v51 }
 0x398   : > { %v4536_v9 = vadd.f32 %v8252_v50, %v4497_v33  ;;  %6360 = vmatmul.mubr.bf16.gmra.mrb[168].mxu0 %v4590_v40  ;;  %v4567_v11 = vmax.f32 %v4535_v13, 0.0 }
 0x399   : > { %v4534_v43 = vadd.f32 %v8252_v50, %v4495_v14  ;;  %v6321_v37 = vpop.f32.mrb[144].mxu1  ;;  %v4565_v0 = vmax.f32 %v4533_v26, 0.0 }
 0x39a   : > { %v4568_v55 = vmax.f32 %v4536_v9, 0.0  ;;  %v4421_v49 = vadd.f32 %v6321_v37, %v8205_v16  ;;  %v4412_v1 = vpop.f32.mrb[145].mxu1 }
 0x39b   : > { %v4566_v39 = vmax.f32 %v4534_v43, 0.0  ;;  %v4413_v61 = vadd.f32 %v4412_v1, %v8199_v24  ;;  %v6322_v53 = vpop.f32.mrb[146].mxu1 }
 0x39c   : > { %v4500_v45 = vmul.f32 %v8244_v21, %v4421_v49  ;;  %v4424_v4 = vadd.f32 %v6322_v53, %v8207_v28  ;;  %v4415_v22 = vpop.f32.mrb[147].mxu1  ;;  %v4592_v54 = vpack.c.bf16 %v4568_v55, %v4567_v11 }
 0x39d   : > { %v4498_v38 = vmul.f32 %v8244_v21, %v4413_v61  ;;  %v4416_v3 = vadd.f32 %v4415_v22, %v8201_v19  ;;  %v4591_v62 = vpack.c.bf16 %v4566_v39, %v4565_v0 }
 0x39e   : > { %v4539_v8 = vadd.f32 %v8252_v50, %v4500_v45  ;;  %v4501_v16 = vmul.f32 %v8244_v21, %v4424_v4 }
 0x39f   : > { %v4537_v34 = vadd.f32 %v8252_v50, %v4498_v38  ;;  %v4499_v24 = vmul.f32 %v8244_v21, %v4416_v3  ;;  %6363 = vmatprep.mubr.bf16.mxu0 %v4591_v62 }
 0x3a0   : > { %v4540_v20 = vadd.f32 %v8252_v50, %v4501_v16  ;;  %6364 = vmatmul.mubr.bf16.gmra.mrb[172].mxu0 %v4592_v54  ;;  %v4571_v52 = vmax.f32 %v4539_v8, 0.0 }
 0x3a1   : > { %v4538_v28 = vadd.f32 %v8252_v50, %v4499_v24  ;;  %v6325_v56 = vpop.f32.mrb[148].mxu1  ;;  %v4569_v35 = vmax.f32 %v4537_v34, 0.0 }
 0x3a2   : > { %v4572_v27 = vmax.f32 %v4540_v20, 0.0  ;;  %v4437_v19 = vadd.f32 %v6325_v56, %v8217_v23  ;;  %v4428_v58 = vpop.f32.mrb[149].mxu1 }
 0x3a3   : > { %v4570_v25 = vmax.f32 %v4538_v28, 0.0  ;;  %v4429_v60 = vadd.f32 %v4428_v58, %v8211_v47  ;;  %v6326_v31 = vpop.f32.mrb[150].mxu1 }
 0x3a4   : > { %v4504_v44 = vmul.f32 %v8244_v21, %v4437_v19  ;;  %v4440_v57 = vadd.f32 %v6326_v31, %v8219_v12  ;;  %v4431_v15 = vpop.f32.mrb[151].mxu1  ;;  %v4594_v6 = vpack.c.bf16 %v4572_v27, %v4571_v52 }
 0x3a5   : > { %v4502_v42 = vmul.f32 %v8244_v21, %v4429_v60  ;;  %v4432_v10 = vadd.f32 %v4431_v15, %v8213_v48  ;;  %v4593_v7 = vpack.c.bf16 %v4570_v25, %v4569_v35 }
 0x3a6   : > { %v4543_v17 = vadd.f32 %v8252_v50, %v4504_v44  ;;  %v4505_v23 = vmul.f32 %v8244_v21, %v4440_v57 }
 0x3a7   : > { %v4541_v36 = vadd.f32 %v8252_v50, %v4502_v42  ;;  %v4503_v47 = vmul.f32 %v8244_v21, %v4432_v10  ;;  %6367 = vmatprep.mubr.bf16.mxu0 %v4593_v7  ;;  %v8736_v10 = vld [vmem:[#allocation3_spill] sm:$0xff] }
 0x3a8   : > { %v4544_v40 = vadd.f32 %v8252_v50, %v4505_v23  ;;  %6368 = vmatmul.mubr.bf16.gmra.mrb[176].mxu0 %v4594_v6  ;;  %v4575_v41 = vmax.f32 %v4543_v17, 0.0 }
 0x3a9   : > { %v4542_v12 = vadd.f32 %v8252_v50, %v4503_v47  ;;  %v6329_v63 = vpop.f32.mrb[152].mxu1  ;;  %v4573_v33 = vmax.f32 %v4541_v36, 0.0 }
 0x3aa   : > { %v4576_v51 = vmax.f32 %v4544_v40, 0.0  ;;  %v4453_v48 = vadd.f32 %v6329_v63, %v8229_v59  ;;  %v4444_v13 = vpop.f32.mrb[153].mxu1 }
 0x3ab   : > { %v4574_v26 = vmax.f32 %v4542_v12, 0.0  ;;  %v4445_v14 = vadd.f32 %v4444_v13, %v8223_v18  ;;  %v6330_v9 = vpop.f32.mrb[154].mxu1 }
 0x3ac   : > { %v4508_v43 = vmul.f32 %v8244_v21, %v4453_v48  ;;  %v4456_v37 = vadd.f32 %v6330_v9, %v8231_v30  ;;  %v4447_v11 = vpop.f32.mrb[155].mxu1  ;;  %v4596_v55 = vpack.c.bf16 %v4576_v51, %v4575_v41 }
 0x3ad   : > { %v4506_v49 = vmul.f32 %v8244_v21, %v4445_v14  ;;  %v4448_v1 = vadd.f32 %v4447_v11, %v8225_v29  ;;  %v4595_v0 = vpack.c.bf16 %v4574_v26, %v4573_v33 }
 0x3ae   : > { %v4547_v39 = vadd.f32 %v8252_v50, %v4508_v43  ;;  %v4509_v59 = vmul.f32 %v8244_v21, %v4456_v37 }
 0x3af   : > { %v4545_v61 = vadd.f32 %v8252_v50, %v4506_v49  ;;  %v4507_v18 = vmul.f32 %v8244_v21, %v4448_v1  ;;  %6371 = vmatprep.mubr.bf16.mxu0 %v4595_v0 }
 0x3b0   : > { %v4548_v53 = vadd.f32 %v8252_v50, %v4509_v59  ;;  %6372 = vmatmul.mubr.bf16.gmra.mrb[180].mxu0 %v4596_v55  ;;  %v4579_v4 = vmax.f32 %v4547_v39, 0.0 }
 0x3b1   : > { %v4546_v30 = vadd.f32 %v8252_v50, %v4507_v18  ;;  %v6333_v45 = vpop.f32.mrb[156].mxu1  ;;  %v4577_v38 = vmax.f32 %v4545_v61, 0.0 }
 0x3b2   : > { %v4580_v22 = vmax.f32 %v4548_v53, 0.0  ;;  %v4469_v29 = vadd.f32 %v6333_v45, %v8246_v5  ;;  %v4460_v54 = vpop.f32.mrb[157].mxu1  ;;  %v8411_v53 = vld [vmem:[%s8680_s11] ss:$0 sm:$0xff] }
 0x3b3   : > { %v4578_v3 = vmax.f32 %v4546_v30, 0.0  ;;  %v4461_v62 = vadd.f32 %v4460_v54, %v8235_v32  ;;  %v6334_v8 = vpop.f32.mrb[158].mxu1  ;;  %v8417_v45 = vld [vmem:[%s8681_s12] ss:$0 sm:$0xff] }
 0x3b4   : > { %v4512_v16 = vmul.f32 %v8244_v21, %v4469_v29  ;;  %v4472_v34 = vadd.f32 %v6334_v8, %v8255_v2  ;;  %v4463_v24 = vpop.f32.mrb[159].mxu1  ;;  %v4598_v20 = vpack.c.bf16 %v4580_v22, %v4579_v4  ;;  %v8423_v22 = vld [vmem:[%s8677_s8] ss:$0 sm:$0xff] }
 0x3b5   : > { %v4510_v28 = vmul.f32 %v8244_v21, %v4461_v62  ;;  %v4464_v56 = vadd.f32 %v4463_v24, %v8237_v46  ;;  %v4597_v52 = vpack.c.bf16 %v4578_v3, %v4577_v38  ;;  %v8431_v8 = vld [vmem:[%s8678_s9] ss:$0 sm:$0xff] }
 0x3b6   : > { %v4551_v27 = vadd.f32 %v8252_v50, %v4512_v16  ;;  %v4513_v5 = vmul.f32 %v8244_v21, %v4472_v34 }
 0x3b7   : > { %v4549_v19 = vadd.f32 %v8252_v50, %v4510_v28  ;;  %v4511_v32 = vmul.f32 %v8244_v21, %v4464_v56  ;;  %6375 = vmatprep.mubr.bf16.mxu0 %v4597_v52 }
 0x3b8   : > { %v4552_v58 = vadd.f32 %v8252_v50, %v4513_v5  ;;  %6376 = vmatmul.mubr.bf16.gmra.mrb[184].mxu0 %v4598_v20  ;;  %v4583_v25 = vmax.f32 %v4551_v27, 0.0 }
 0x3b9   : > { %v4550_v2 = vadd.f32 %v8252_v50, %v4511_v32  ;;  %v6393_v35 = vpop.f32.mrb[160].mxu1  ;;  %v4581_v46 = vmax.f32 %v4549_v19, 0.0  ;;  %v8737_v50 = vld [vmem:[#allocation4_spill] sm:$0xff] }
 0x3ba   : > { %v4584_v60 = vmax.f32 %v4552_v58, 0.0  ;;  %v4970_v31 = vpop.f32.mrb[161].mxu1  ;;  %v5094_v30 = vmul.f32 %v6393_v35, %v8411_v53 }
 0x3bb   : > { %v4582_v44 = vmax.f32 %v4550_v2, 0.0  ;;  %v6394_v57 = vpop.f32.mrb[162].mxu1  ;;  %v5092_v4 = vmul.f32 %v8411_v53, %v4970_v31 }
 0x3bc   : > { %v4973_v15 = vpop.f32.mrb[163].mxu1  ;;  %v4600_v6 = vpack.c.bf16 %v4584_v60, %v4583_v25  ;;  %v5095_v54 = vmul.f32 %v6394_v57, %v8411_v53  ;;  %v5133_v24 = vadd.f32 %v8417_v45, %v5094_v30 }
 0x3bd   : > { %v4599_v42 = vpack.c.bf16 %v4582_v44, %v4581_v46  ;;  %v5093_v62 = vmul.f32 %v8411_v53, %v4973_v15  ;;  %v5131_v52 = vadd.f32 %v8417_v45, %v5092_v4 }
 0x3be   : > { %v5134_v19 = vadd.f32 %v8417_v45, %v5095_v54 }
 0x3bf   : > { %6379 = vmatprep.mubr.bf16.mxu0 %v4599_v42  ;;  %v5132_v2 = vadd.f32 %v8417_v45, %v5093_v62 }
 0x3c0   : > { %6380 = vmatmul.mubr.bf16.gmra.mrb[188].mxu0 %v4600_v6 }
 0x3c1   : > { %6387 = vmatprep.mubr.msk.bf16.mxu0 %vm546_vm0, %v8736_v10  ;;  %v6397_v21 = vpop.f32.mrb[164].mxu1 }
 0x3c2   : > { %v4986_v7 = vpop.f32.mrb[165].mxu1  ;;  %v5098_v60 = vmul.f32 %v6397_v21, %v8411_v53 }
 0x3c3   : > { %v6398_v17 = vpop.f32.mrb[166].mxu1  ;;  %v5096_v46 = vmul.f32 %v8411_v53, %v4986_v7 }
 0x3c4   : > { %v4989_v23 = vpop.f32.mrb[167].mxu1  ;;  %v5099_v15 = vmul.f32 %v6398_v17, %v8411_v53  ;;  %v5137_v4 = vadd.f32 %v8417_v45, %v5098_v60 }
 0x3c5   : > { %v5097_v10 = vmul.f32 %v8411_v53, %v4989_v23  ;;  %v5135_v54 = vadd.f32 %v8417_v45, %v5096_v46 }
 0x3c8   : > { %6388 = vmatmul.mubr.msk.bf16.vlgmr.msra.gmra.mrb[192].mxu0 %vm546_vm0, %v8737_v50 }
 0x3c9   : > { %v8360_v36 = vpop.f32.mrb[168].mxu1 }
 0x3ca   : > { %v8362_v47 = vpop.f32.mrb[169].mxu1 }
 0x3cb   : > { %v8364_v40 = vpop.f32.mrb[170].mxu1 }
 0x3cc   : > { %v8366_v12 = vpop.f32.mrb[171].mxu1 }
 0x3d1   : > { %v8368_v63 = vpop.f32.mrb[172].mxu1 }
 0x3d2   : > { %v8370_v41 = vpop.f32.mrb[173].mxu1 }
 0x3d3   : > { %v8372_v51 = vpop.f32.mrb[174].mxu1 }
 0x3d4   : > { %v8374_v48 = vpop.f32.mrb[175].mxu1 }
 0x3d9   : > { %v8376_v13 = vpop.f32.mrb[176].mxu1 }
 0x3da   : > { %v8378_v33 = vpop.f32.mrb[177].mxu1 }
 0x3db   : > { %v8380_v26 = vpop.f32.mrb[178].mxu1 }
 0x3dc   : > { %v8382_v14 = vpop.f32.mrb[179].mxu1 }
 0x3e1   : > { %v8384_v9 = vpop.f32.mrb[180].mxu1 }
 0x3e2   : > { %v8386_v43 = vpop.f32.mrb[181].mxu1 }
 0x3e3   : > { %v8388_v37 = vpop.f32.mrb[182].mxu1 }
 0x3e4   : > { %v8390_v11 = vpop.f32.mrb[183].mxu1 }
 0x3e9   : > { %v8392_v55 = vpop.f32.mrb[184].mxu1 }
 0x3ea   : > { %v8394_v49 = vpop.f32.mrb[185].mxu1 }
 0x3eb   : > { %v8396_v1 = vpop.f32.mrb[186].mxu1 }
 0x3ec   : > { %v8398_v0 = vpop.f32.mrb[187].mxu1 }
 0x45b   : > { %v8400_v39 = vpop.f32.mrb[160].mxu0 }
 0x45c   : > { %v8402_v59 = vpop.f32.mrb[161].mxu0 }
 0x45d   : > { %v8404_v61 = vpop.f32.mrb[162].mxu0 }
 0x45e   : > { %v8406_v18 = vpop.f32.mrb[163].mxu0 }
 0x463   : > { %v6357_v29 = vpop.f32.mrb[164].mxu0 }
 0x464   : > { %v4839_v38 = vmul.f32 %v6357_v29, %v8423_v22  ;;  %v4715_v3 = vpop.f32.mrb[165].mxu0 }
 0x465   : > { %v4837_v16 = vmul.f32 %v8423_v22, %v4715_v3  ;;  %v6358_v34 = vpop.f32.mrb[166].mxu0  ;;  %v5138_v3 = vadd.f32 %v8417_v45, %v5099_v15 }
 0x466   : > { %v4878_v20 = vadd.f32 %v8431_v8, %v4839_v38  ;;  %v4840_v28 = vmul.f32 %v6358_v34, %v8423_v22  ;;  %v4718_v56 = vpop.f32.mrb[167].mxu0 }
 0x467   : > { %v4876_v27 = vadd.f32 %v8431_v8, %v4837_v16  ;;  %v4838_v5 = vmul.f32 %v8423_v22, %v4718_v56  ;;  %v5136_v16 = vadd.f32 %v8417_v45, %v5097_v10  ;;  %v5100_v56 = vmul.f32 %v8411_v53, %v8362_v47 }
 0x468   : > { %v4879_v32 = vadd.f32 %v8431_v8, %v4840_v28  ;;  %v8442_v58 = vadd.f32 %v5133_v24, %v4878_v20  ;;  %v5102_v20 = vmul.f32 %v8360_v36, %v8411_v53 }
 0x469   : > { %v4877_v35 = vadd.f32 %v8431_v8, %v4838_v5  ;;  %v8446_v25 = vadd.f32 %v5131_v52, %v4876_v27  ;;  %v5103_v5 = vmul.f32 %v8364_v40, %v8411_v53  ;;  %v5139_v15 = vadd.f32 %v8417_v45, %v5100_v56 }
 0x46a   : > { %v8449_v31 = vadd.f32 %v5134_v19, %v4879_v32  ;;  %v5141_v60 = vadd.f32 %v8417_v45, %v5102_v20 }
 0x46b   : > { %v6361_v44 = vpop.f32.mrb[168].mxu0  ;;  %v8452_v57 = vadd.f32 %v5132_v2, %v4877_v35  ;;  %v5101_v2 = vmul.f32 %v8411_v53, %v8366_v12 }
 0x46c   : > { %v4843_v6 = vmul.f32 %v6361_v44, %v8423_v22  ;;  %v4731_v42 = vpop.f32.mrb[169].mxu0 }
 0x46d   : > { %v4841_v50 = vmul.f32 %v8423_v22, %v4731_v42  ;;  %v6362_v30 = vpop.f32.mrb[170].mxu0  ;;  %v5142_v42 = vadd.f32 %v8417_v45, %v5103_v5 }
 0x46e   : > { %v4882_v21 = vadd.f32 %v8431_v8, %v4843_v6  ;;  %v4844_v29 = vmul.f32 %v6362_v30, %v8423_v22  ;;  %v4734_v7 = vpop.f32.mrb[171].mxu0 }
 0x46f   : > { %v4880_v38 = vadd.f32 %v8431_v8, %v4841_v50  ;;  %v4842_v17 = vmul.f32 %v8423_v22, %v4734_v7  ;;  %v5140_v50 = vadd.f32 %v8417_v45, %v5101_v2  ;;  %v5104_v7 = vmul.f32 %v8411_v53, %v8370_v41 }
 0x470   : > { %v4883_v23 = vadd.f32 %v8431_v8, %v4844_v29  ;;  %v8466_v62 = vadd.f32 %v5137_v4, %v4882_v21  ;;  %v5106_v21 = vmul.f32 %v8368_v63, %v8411_v53 }
 0x471   : > { %v4881_v34 = vadd.f32 %v8431_v8, %v4842_v17  ;;  %v8470_v24 = vadd.f32 %v5135_v54, %v4880_v38  ;;  %v5107_v17 = vmul.f32 %v8372_v51, %v8411_v53  ;;  %v5143_v5 = vadd.f32 %v8417_v45, %v5104_v7 }
 0x472   : > { %v8474_v28 = vadd.f32 %v5138_v3, %v4883_v23  ;;  %v5145_v20 = vadd.f32 %v8417_v45, %v5106_v21 }
 0x473   : > { %v6365_v52 = vpop.f32.mrb[172].mxu0  ;;  %v8478_v27 = vadd.f32 %v5136_v16, %v4881_v34  ;;  %v5105_v16 = vmul.f32 %v8411_v53, %v8374_v48 }
 0x474   : > { %v4847_v19 = vmul.f32 %v6365_v52, %v8423_v22  ;;  %v4747_v32 = vpop.f32.mrb[173].mxu0 }
 0x475   : > { %v4845_v35 = vmul.f32 %v8423_v22, %v4747_v32  ;;  %v6366_v36 = vpop.f32.mrb[174].mxu0  ;;  %v5146_v32 = vadd.f32 %v8417_v45, %v5107_v17 }
 0x476   : > { %v4886_v46 = vadd.f32 %v8431_v8, %v4847_v19  ;;  %v4848_v47 = vmul.f32 %v6366_v36, %v8423_v22  ;;  %v4750_v44 = vpop.f32.mrb[175].mxu0 }
 0x477   : > { %v4884_v40 = vadd.f32 %v8431_v8, %v4845_v35  ;;  %v4846_v6 = vmul.f32 %v8423_v22, %v4750_v44  ;;  %v5144_v35 = vadd.f32 %v8417_v45, %v5105_v16  ;;  %v5108_v44 = vmul.f32 %v8411_v53, %v8378_v33 }
 0x478   : > { %v4887_v12 = vadd.f32 %v8431_v8, %v4848_v47  ;;  %v8494_v10 = vadd.f32 %v5141_v60, %v4886_v46  ;;  %v5110_v46 = vmul.f32 %v8376_v13, %v8411_v53 }
 0x479   : > { %v4885_v30 = vadd.f32 %v8431_v8, %v4846_v6  ;;  %v8498_v4 = vadd.f32 %v5139_v15, %v4884_v40 }
 0x47a   : > { %v8502_v29 = vadd.f32 %v5142_v42, %v4887_v12  ;;  %v5111_v42 = vmul.f32 %v8380_v26, %v8411_v53  ;;  %v5149_v7 = vadd.f32 %v8417_v45, %v5110_v46  ;;  %v5113_v46 = vmul.f32 %v8411_v53, %v8390_v11 }
 0x47b   : > { %v6369_v54 = vpop.f32.mrb[176].mxu0  ;;  %v8506_v38 = vadd.f32 %v5140_v50, %v4885_v30  ;;  %v5109_v30 = vmul.f32 %v8411_v53, %v8382_v14 }
 0x47c   : > { %v4851_v3 = vmul.f32 %v6369_v54, %v8423_v22  ;;  %v4763_v23 = vpop.f32.mrb[177].mxu0  ;;  %v5150_v14 = vadd.f32 %v8417_v45, %v5111_v42 }
 0x47d   : > { %v4849_v34 = vmul.f32 %v8423_v22, %v4763_v23  ;;  %v6370_v63 = vpop.f32.mrb[178].mxu0 }
 0x47e   : > { %v4890_v56 = vadd.f32 %v8431_v8, %v4851_v3  ;;  %v4852_v41 = vmul.f32 %v6370_v63, %v8423_v22  ;;  %v4766_v52 = vpop.f32.mrb[179].mxu0  ;;  %v5147_v3 = vadd.f32 %v8417_v45, %v5108_v44 }
 0x47f   : > { %v4888_v51 = vadd.f32 %v8431_v8, %v4849_v34  ;;  %v4850_v19 = vmul.f32 %v8423_v22, %v4766_v52  ;;  %v5114_v52 = vmul.f32 %v8384_v9, %v8411_v53 }
 0x480   : > { %v4891_v48 = vadd.f32 %v8431_v8, %v4852_v41  ;;  %v5177_v2 = vadd.f32 %v5145_v20, %v4890_v56  ;;  %v5148_v20 = vadd.f32 %v8417_v45, %v5109_v30 }
 0x481   : > { %v4889_v36 = vadd.f32 %v8431_v8, %v4850_v19  ;;  %v5175_v60 = vadd.f32 %v5143_v5, %v4888_v51  ;;  %v5112_v51 = vmul.f32 %v8411_v53, %v8386_v43 }
 0x482   : > { %v5178_v47 = vadd.f32 %v5146_v32, %v4891_v48  ;;  %v5209_v32 = vmax.f32 %v5177_v2, 0.0 }
 0x483   : > { %v6373_v15 = vpop.f32.mrb[180].mxu0  ;;  %v5207_v40 = vmax.f32 %v5175_v60, 0.0  ;;  %v5176_v6 = vadd.f32 %v5144_v35, %v4889_v36  ;;  %v5115_v35 = vmul.f32 %v8388_v37, %v8411_v53 }
 0x484   : > { %v4855_v12 = vmul.f32 %v6373_v15, %v8423_v22  ;;  %v4779_v50 = vpop.f32.mrb[181].mxu0  ;;  %v5153_v15 = vadd.f32 %v8417_v45, %v5114_v52 }
 0x485   : > { %v4853_v21 = vmul.f32 %v8423_v22, %v4779_v50  ;;  %5255 = vxpose.xlu1.b32.start [1/16] %v5207_v40, 128  ;;  %v6374_v13 = vpop.f32.mrb[182].mxu0  ;;  %v5208_v16 = vmax.f32 %v5176_v6, 0.0  ;;  %v5151_v6 = vadd.f32 %v8417_v45, %v5112_v51  ;;  %v5154_v11 = vadd.f32 %v8417_v45, %v5115_v35 }
 0x486   : > { %v4894_v33 = vadd.f32 %v8431_v8, %v4855_v12  ;;  %v4856_v54 = vmul.f32 %v6374_v13, %v8423_v22  ;;  %v4782_v17 = vpop.f32.mrb[183].mxu0  ;;  %v5210_v12 = vmax.f32 %v5178_v47, 0.0  ;;  %v5116_v47 = vmul.f32 %v8411_v53, %v8394_v49 }
 0x487   : > { %v4892_v26 = vadd.f32 %v8431_v8, %v4853_v21  ;;  %v4854_v23 = vmul.f32 %v8423_v22, %v4782_v17  ;;  %v5152_v21 = vadd.f32 %v8417_v45, %v5113_v46 }
 0x488   : > { %v4895_v34 = vadd.f32 %v8431_v8, %v4856_v54  ;;  %v8542_v63 = vadd.f32 %v5149_v7, %v4894_v33  ;;  %v5118_v33 = vmul.f32 %v8392_v55, %v8411_v53  ;;  %v5155_v51 = vadd.f32 %v8417_v45, %v5116_v47 }
 0x489   : > { %v4893_v56 = vadd.f32 %v8431_v8, %v4854_v23  ;;  %5256 = vxpose.xlu1.b32.cont [2/16] %v5208_v16, 128  ;;  %v5179_v41 = vadd.f32 %v5147_v3, %v4892_v26  ;;  %v5119_v23 = vmul.f32 %v8396_v1, %v8411_v53 }
 0x48a   : > { %v8548_v5 = vadd.f32 %v5150_v14, %v4895_v34  ;;  %v5117_v34 = vmul.f32 %v8411_v53, %v8398_v0 }
 0x48b   : > { %v6377_v19 = vpop.f32.mrb[184].mxu0  ;;  %v5180_v48 = vadd.f32 %v5148_v20, %v4893_v56  ;;  %v5211_v3 = vmax.f32 %v5179_v41, 0.0  ;;  %v5157_v56 = vadd.f32 %v8417_v45, %v5118_v33  ;;  %v5158_v0 = vadd.f32 %v8417_v45, %v5119_v23 }
 0x48c   : > { %v4859_v36 = vmul.f32 %v6377_v19, %v8423_v22  ;;  %v4795_v60 = vpop.f32.mrb[185].mxu0  ;;  %v5214_v47 = vmax.f32 %v8548_v5, 0.0 }
 0x48d   : > { %v4857_v44 = vmul.f32 %v8423_v22, %v4795_v60  ;;  %5257 = vxpose.xlu1.b32.cont [3/16] %v5209_v32, 128  ;;  %v6378_v9 = vpop.f32.mrb[186].mxu0  ;;  %v5212_v32 = vmax.f32 %v5180_v48, 0.0  ;;  %v5156_v60 = vadd.f32 %v8417_v45, %v5117_v34  ;;  %v5213_v48 = vmax.f32 %v8542_v63, 0.0 }
 0x48e   : > { %v4898_v43 = vadd.f32 %v8431_v8, %v4859_v36  ;;  %v4860_v2 = vmul.f32 %v6378_v9, %v8423_v22  ;;  %v4798_v40 = vpop.f32.mrb[187].mxu0  ;;  %v4835_v9 = vmul.f32 %v8400_v39, %v8423_v22 }
 0x48f   : > { %v4896_v37 = vadd.f32 %v8431_v8, %v4857_v44  ;;  %v4858_v42 = vmul.f32 %v8423_v22, %v4798_v40 }
 0x490   : > { %v4899_v50 = vadd.f32 %v8431_v8, %v4860_v2  ;;  %v8566_v30 = vadd.f32 %v5153_v15, %v4898_v43  ;;  %v4833_v43 = vmul.f32 %v8423_v22, %v8402_v59 }
 0x491   : > { %v4897_v13 = vadd.f32 %v8431_v8, %v4858_v42  ;;  %5258 = vxpose.xlu1.b32.cont [4/16] %v5210_v12, 128  ;;  %v5183_v7 = vadd.f32 %v5151_v6, %v4896_v37  ;;  %v4836_v6 = vmul.f32 %v8404_v61, %v8423_v22  ;;  %v4834_v12 = vmul.f32 %v8423_v22, %v8406_v18 }
 0x492   : > { %v8572_v54 = vadd.f32 %v5154_v11, %v4899_v50  ;;  %v4874_v50 = vadd.f32 %v8431_v8, %v4835_v9  ;;  %v5217_v5 = vmax.f32 %v8566_v30, 0.0  ;;  %v5197_v30 = vmax.f32 %v8442_v58, 0.0 }
 0x493   : > { %v6381_v17 = vpop.f32.mrb[188].mxu0  ;;  %v5184_v26 = vadd.f32 %v5152_v21, %v4897_v13  ;;  %v4872_v13 = vadd.f32 %v8431_v8, %v4833_v43  ;;  %v4875_v18 = vadd.f32 %v8431_v8, %v4836_v6  ;;  %v5215_v34 = vmax.f32 %v5183_v7, 0.0 }
 0x494   : > { %v4863_v16 = vmul.f32 %v6381_v17, %v8423_v22  ;;  %v4811_v14 = vpop.f32.mrb[189].mxu0  ;;  %v5195_v7 = vmax.f32 %v8446_v25, 0.0  ;;  %v5200_v25 = vmax.f32 %v8478_v27, 0.0  ;;  %v5202_v58 = vmax.f32 %v8474_v28, 0.0 }
 0x495   : > { %v4861_v20 = vmul.f32 %v8423_v22, %v4811_v14  ;;  %5259 = vxpose.xlu1.b32.cont [5/16] %v5211_v3, 128  ;;  %v6382_v55 = vpop.f32.mrb[190].mxu0  ;;  %v4873_v3 = vadd.f32 %v8431_v8, %v4834_v12 }
 0x496   : > { %v4902_v49 = vadd.f32 %v8431_v8, %v4863_v16  ;;  %v4864_v41 = vmul.f32 %v6382_v55, %v8423_v22  ;;  %v4814_v52 = vpop.f32.mrb[191].mxu0 }
 0x497   : > { %v4900_v1 = vadd.f32 %v8431_v8, %v4861_v20  ;;  %v4862_v19 = vmul.f32 %v8423_v22, %v4814_v52 }
 0x498   : > { %v4903_v35 = vadd.f32 %v8431_v8, %v4864_v41  ;;  %v5189_v36 = vadd.f32 %v5157_v56, %v4902_v49 }
 0x499   : > { %v4901_v46 = vadd.f32 %v8431_v8, %v4862_v19  ;;  %5260 = vxpose.xlu1.b32.cont [6/16] %v5212_v32, 128  ;;  %v5187_v44 = vadd.f32 %v5155_v51, %v4900_v1  ;;  %v5218_v8 = vmax.f32 %v8572_v54, 0.0  ;;  %v5198_v54 = vmax.f32 %v8449_v31, 0.0 }
 0x49a   : > { %v5190_v15 = vadd.f32 %v5158_v0, %v4903_v35  ;;  %v5221_v51 = vmax.f32 %v5189_v36, 0.0  ;;  %v5199_v19 = vmax.f32 %v8470_v24, 0.0  ;;  %v5203_v32 = vmax.f32 %v8498_v4, 0.0 }
 0x49b   : > { %v6389_v2 = vpop.f32.mrb[192].mxu0  ;;  %v5188_v40 = vadd.f32 %v5156_v60, %v4901_v46  ;;  %v5219_v41 = vmax.f32 %v5187_v44, 0.0  ;;  %v5204_v31 = vmax.f32 %v8506_v38, 0.0  ;;  %v5205_v0 = vmax.f32 %v8494_v10, 0.0 }
 0x49c   : > { %v5090_v37 = vmul.f32 %v6389_v2, %v8411_v53  ;;  %v4954_v42 = vpop.f32.mrb[193].mxu0  ;;  %v5222_v1 = vmax.f32 %v5190_v15, 0.0  ;;  %v5206_v24 = vmax.f32 %v8502_v29, 0.0 }
 0x49d   : > { %v5088_v11 = vmul.f32 %v8411_v53, %v4954_v42  ;;  %5261 = vxpose.xlu1.b32.cont [7/16] %v5213_v48, 128  ;;  %v6390_v39 = vpop.f32.mrb[194].mxu0  ;;  %v5220_v52 = vmax.f32 %v5188_v40, 0.0 }
 0x49e   : > { %v5129_v59 = vadd.f32 %v8417_v45, %v5090_v37  ;;  %v5091_v63 = vmul.f32 %v6390_v39, %v8411_v53  ;;  %v4957_v21 = vpop.f32.mrb[195].mxu0 }
 0x49f   : > { %v5127_v61 = vadd.f32 %v8417_v45, %v5088_v11  ;;  %v5089_v33 = vmul.f32 %v8411_v53, %v4957_v21  ;;  %v5216_v53 = vmax.f32 %v5184_v26, 0.0  ;;  %v5196_v26 = vmax.f32 %v8452_v57, 0.0 }
 0x4a0   : > { %v5130_v22 = vadd.f32 %v8417_v45, %v5091_v63  ;;  %v5161_v17 = vadd.f32 %v5129_v59, %v4874_v50  ;;  %v5201_v57 = vmax.f32 %v8466_v62, 0.0 }
 0x4a1   : > { %v5128_v23 = vadd.f32 %v8417_v45, %v5089_v33  ;;  %5262 = vxpose.xlu1.b32.cont [8/16] %v5214_v47, 128  ;;  %v5159_v16 = vadd.f32 %v5127_v61, %v4872_v13 }
 0x4a2   : > { %v5162_v14 = vadd.f32 %v5130_v22, %v4875_v18  ;;  %v5193_v49 = vmax.f32 %v5161_v17, 0.0 }
 0x4a3   : > { %v5191_v20 = vmax.f32 %v5159_v16, 0.0  ;;  %v5160_v55 = vadd.f32 %v5128_v23, %v4873_v3 }
 0x4a4   : > { %v5194_v45 = vmax.f32 %v5162_v14, 0.0 }
 0x4a5   : > { %5263 = vxpose.xlu1.b32.cont [9/16] %v5215_v34, 128  ;;  %5223 = vxpose.xlu0.b32.start [1/16] %v5191_v20, 128  ;;  %v5192_v56 = vmax.f32 %v5160_v55, 0.0 }
 0x4a9   : > { %5264 = vxpose.xlu1.b32.cont [10/16] %v5216_v53, 128  ;;  %5224 = vxpose.xlu0.b32.cont [2/16] %v5192_v56, 128 }
 0x4ad   : > { %5265 = vxpose.xlu1.b32.cont [11/16] %v5217_v5, 128  ;;  %5225 = vxpose.xlu0.b32.cont [3/16] %v5193_v49, 128 }
 0x4b1   : > { %5266 = vxpose.xlu1.b32.cont [12/16] %v5218_v8, 128  ;;  %5226 = vxpose.xlu0.b32.cont [4/16] %v5194_v45, 128 }
 0x4b5   : > { %5267 = vxpose.xlu1.b32.cont [13/16] %v5219_v41, 128  ;;  %5227 = vxpose.xlu0.b32.cont [5/16] %v5195_v7, 128 }
 0x4b9   : > { %5228 = vxpose.xlu0.b32.cont [6/16] %v5196_v26, 128  ;;  %5268 = vxpose.xlu1.b32.cont [14/16] %v5220_v52, 128 }
 0x4bd   : > { %5229 = vxpose.xlu0.b32.cont [7/16] %v5197_v30, 128  ;;  %5269 = vxpose.xlu1.b32.cont [15/16] %v5221_v51, 128 }
 0x4c1   : > { %5230 = vxpose.xlu0.b32.cont [8/16] %v5198_v54, 128  ;;  %5270 = vxpose.xlu1.b32.end [16/16] %v5222_v1, 128 }
 0x4c5   : > { %5231 = vxpose.xlu0.b32.cont [9/16] %v5199_v19, 128 }
 0x4c9   : > { %5232 = vxpose.xlu0.b32.cont [10/16] %v5200_v25, 128 }
 0x4cd   : > { %5233 = vxpose.xlu0.b32.cont [11/16] %v5201_v57, 128 }
 0x4d1   : > { %5234 = vxpose.xlu0.b32.cont [12/16] %v5202_v58, 128 }
 0x4d5   : > { %5235 = vxpose.xlu0.b32.cont [13/16] %v5203_v32, 128 }
 0x4d9   : > { %5236 = vxpose.xlu0.b32.cont [14/16] %v5204_v31, 128 }
 0x4dd   : > { %5237 = vxpose.xlu0.b32.cont [15/16] %v5205_v0, 128 }
 0x4e1   : > { %5238 = vxpose.xlu0.b32.end [16/16] %v5206_v24, 128 }
 0x505   : > { %v5271_v62 = vpop.trf.xlu1 }
 0x506   : > { %5288 = vst [vmem:[%s8632_s14 + $0x8] sm:$0xff] %v5271_v62 }
 0x509   : > { %v5272_v28 = vpop.trf.xlu1 }
 0x50a   : > { %5290 = vst [vmem:[%s8632_s14 + $0x18] sm:$0xff] %v5272_v28 }
 0x50d   : > { %v5273_v27 = vpop.trf.xlu1 }
 0x50e   : > { %5292 = vst [vmem:[%s8632_s14 + $0x28] sm:$0xff] %v5273_v27 }
 0x511   : > { %v5274_v10 = vpop.trf.xlu1 }
 0x512   : > { %5294 = vst [vmem:[%s8632_s14 + $0x38] sm:$0xff] %v5274_v10 }
 0x515   : > { %v5275_v4 = vpop.trf.xlu1 }
 0x516   : > { %5296 = vst [vmem:[%s8632_s14 + $0x48] sm:$0xff] %v5275_v4 }
 0x519   : > { %v5276_v29 = vpop.trf.xlu1 }
 0x51a   : > { %5298 = vst [vmem:[%s8632_s14 + $0x58] sm:$0xff] %v5276_v29 }
 0x51d   : > { %v5277_v38 = vpop.trf.xlu1 }
 0x51e   : > { %5300 = vst [vmem:[%s8632_s14 + $0x68] sm:$0xff] %v5277_v38 }
 0x521   : > { %v5278_v35 = vpop.trf.xlu1 }
 0x522   : > { %5302 = vst [vmem:[%s8632_s14 + $0x78] sm:$0xff] %v5278_v35 }
 0x525   : > { %v5239_v36 = vpop.trf.xlu0  ;;  %v5279_v60 = vpop.trf.xlu1 }
 0x526   : > { %5287 = vst [vmem:[%s8632_s14] sm:$0xff] %v5239_v36  ;;  %5304 = vst [vmem:[%s8632_s14 + $0x88] sm:$0xff] %v5279_v60 }
 0x529   : > { %v5240_v46 = vpop.trf.xlu0  ;;  %v5280_v44 = vpop.trf.xlu1 }
 0x52a   : > { %5289 = vst [vmem:[%s8632_s14 + $0x10] sm:$0xff] %v5240_v46  ;;  %5306 = vst [vmem:[%s8632_s14 + $0x98] sm:$0xff] %v5280_v44 }
 0x52d   : > { %v5241_v9 = vpop.trf.xlu0  ;;  %v5281_v15 = vpop.trf.xlu1 }
 0x52e   : > { %5291 = vst [vmem:[%s8632_s14 + $0x20] sm:$0xff] %v5241_v9  ;;  %5308 = vst [vmem:[%s8632_s14 + $0xa8] sm:$0xff] %v5281_v15 }
 0x531   : > { %v5242_v43 = vpop.trf.xlu0  ;;  %v5282_v2 = vpop.trf.xlu1 }
 0x532   : > { %5293 = vst [vmem:[%s8632_s14 + $0x30] sm:$0xff] %v5242_v43  ;;  %5310 = vst [vmem:[%s8632_s14 + $0xb8] sm:$0xff] %v5282_v2 }
 0x535   : > { %v5243_v48 = vpop.trf.xlu0  ;;  %v5283_v40 = vpop.trf.xlu1 }
 0x536   : > { %5295 = vst [vmem:[%s8632_s14 + $0x40] sm:$0xff] %v5243_v48  ;;  %5312 = vst [vmem:[%s8632_s14 + $0xc8] sm:$0xff] %v5283_v40 }
 0x539   : > { %v5244_v6 = vpop.trf.xlu0  ;;  %v5284_v37 = vpop.trf.xlu1 }
 0x53a   : > { %5297 = vst [vmem:[%s8632_s14 + $0x50] sm:$0xff] %v5244_v6  ;;  %5314 = vst [vmem:[%s8632_s14 + $0xd8] sm:$0xff] %v5284_v37 }
 0x53d   : > { %v5245_v42 = vpop.trf.xlu0  ;;  %v5285_v12 = vpop.trf.xlu1 }
 0x53e   : > { %5299 = vst [vmem:[%s8632_s14 + $0x60] sm:$0xff] %v5245_v42  ;;  %5316 = vst [vmem:[%s8632_s14 + $0xe8] sm:$0xff] %v5285_v12 }
 0x541   : > { %v5246_v11 = vpop.trf.xlu0  ;;  %v5286_v39 = vpop.trf.xlu1 }
 0x542   : > { %5301 = vst [vmem:[%s8632_s14 + $0x70] sm:$0xff] %v5246_v11  ;;  %5318 = vst [vmem:[%s8632_s14 + $0xf8] sm:$0xff] %v5286_v39 }
 0x545   : > { %v5247_v50 = vpop.trf.xlu0 }
 0x546   : > { %5303 = vst [vmem:[%s8632_s14 + $0x80] sm:$0xff] %v5247_v50 }
 0x549   : > { %v5248_v59 = vpop.trf.xlu0 }
 0x54a   : > { %5305 = vst [vmem:[%s8632_s14 + $0x90] sm:$0xff] %v5248_v59 }
 0x54d   : > { %v5249_v63 = vpop.trf.xlu0 }
 0x54e   : > { %5307 = vst [vmem:[%s8632_s14 + $0xa0] sm:$0xff] %v5249_v63 }
 0x551   : > { %v5250_v21 = vpop.trf.xlu0 }
 0x552   : > { %5309 = vst [vmem:[%s8632_s14 + $0xb0] sm:$0xff] %v5250_v21 }
 0x555   : > { %v5251_v13 = vpop.trf.xlu0 }
 0x556   : > { %5311 = vst [vmem:[%s8632_s14 + $0xc0] sm:$0xff] %v5251_v13 }
 0x559   : > { %v5252_v61 = vpop.trf.xlu0 }
 0x55a   : > { %5313 = vst [vmem:[%s8632_s14 + $0xd0] sm:$0xff] %v5252_v61 }
 0x55d   : > { %v5253_v33 = vpop.trf.xlu0 }
 0x55e   : > { %5315 = vst [vmem:[%s8632_s14 + $0xe0] sm:$0xff] %v5253_v33 }
 0x561   : > { %v5254_v47 = vpop.trf.xlu0 }
 0x562   : > { %5317 = vst [vmem:[%s8632_s14 + $0xf0] sm:$0xff] %v5254_v47 }
 0x563 PF: > { %s23_s25 = sadd.s32 1, %s6689_s25  }
 0x564   : > { %p20_p4 = scmp.ge.s32.totalorder %s23_s25, 4  }
 0x566   :  { %22 = sbr.rel (!%p20_p4) target bundleno = 1 (0x1), region = 105 }

</bundles_post_ra>
